<compile_context>
chip_gen: v6e
topology: v6e:2x2x1
jax: 0.10.0
libtpu: 0.0.40
codegen_flags: <defaults>
</compile_context>

<pallas_src>
import math
import functools

import jax
import jax.numpy as jnp
from jax import lax
from jax.experimental import pallas as pl
from jax.experimental.pallas import tpu as pltpu

# ----- model config (matches the PyTorch module's globals / defaults) -----
D_MODEL = 64
NHEAD = 4
HEAD_DIM = D_MODEL // NHEAD
NUM_LAYERS = 2
VOCAB_SIZE = 3
MAX_SEQ_LENGTH = 7            # N + 1 with N = 6
DIM_FEEDFORWARD = 2048        # nn.TransformerEncoderLayer default
LN_EPS = 1e-5                 # nn.LayerNorm default
FC_PAD = 128                  # lane-dense padded width of the 2-way fc_out


# ------------------------------ fused kernel --------------------------------

def _fused_forward_kernel(x_ref, inw_ref, inb_ref, outw_ref, l1w_ref, l1b_ref,
                          l2w_ref, small_ref, fcw_ref, fcb_ref, o_ref, x2_ref,
                          *, nhead, head_dim, ln_eps):
    l = pl.program_id(1)                  # encoder-layer grid axis (pipelined)
    n_layers = pl.num_programs(1)

    Bg, S, D = x_ref.shape
    rows = Bg * S
    hd = head_dim

    # 2-D additive causal mask, large finite negative (no -inf -> no NaN risk).
    row_ids = lax.broadcasted_iota(jnp.int32, (S, S), 0)
    col_ids = lax.broadcasted_iota(jnp.int32, (S, S), 1)
    mask = jnp.where(col_ids <= row_ids, 0.0, -1e30).astype(jnp.float32)

    def layer_norm(z, w, b):              # f32 statistics
        mean = jnp.mean(z, axis=-1, keepdims=True)
        zc = z - mean
        var = jnp.mean(zc * zc, axis=-1, keepdims=True)
        return zc * lax.rsqrt(var + ln_eps) * w + b

    # First layer step: load embedded input into the persistent residual scratch.
    @pl.when(l == 0)
    def _():
        x2_ref[...] = x_ref[...].reshape(rows, D)

    x2 = x2_ref[...]                       # f32 residual stream, VMEM-resident
    small = small_ref[0]                   # packed per-layer (6, D) f32 vectors

    # -------- self-attention (1/sqrt(hd) pre-folded into Q cols of in_proj) --------
    qkv = jnp.dot(x2.astype(jnp.bfloat16), inw_ref[0],
                  preferred_element_type=jnp.float32) + inb_ref[0]
    qkv3 = qkv.reshape(Bg, S, 3 * D).astype(jnp.bfloat16)

    ctx_heads = []
    for h in range(nhead):
        q = qkv3[:, :, h * hd:(h + 1) * hd]
        k = qkv3[:, :, D + h * hd:D + (h + 1) * hd]
        v = qkv3[:, :, 2 * D + h * hd:2 * D + (h + 1) * hd]
        s = jnp.einsum("bqd,bkd->bqk", q, k,
                       preferred_element_type=jnp.float32)
        s = s + mask[None, :, :]
        m = jnp.max(s, axis=-1, keepdims=True)
        p = jnp.exp(s - m)
        denom = jnp.sum(p, axis=-1, keepdims=True)
        attn = (p * pl.reciprocal(denom, approx=True)).astype(jnp.bfloat16)  # EUP
        ctx_heads.append(
            jnp.einsum("bqk,bkd->bqd", attn, v,
                       preferred_element_type=jnp.float32).reshape(rows, hd))
    # merge heads once; single K=64 out_proj matmul (not 4x K=16)
    ctx = jnp.concatenate(ctx_heads, axis=-1)
    attn_out = jnp.dot(ctx.astype(jnp.bfloat16), outw_ref[0],
                       preferred_element_type=jnp.float32) + small[0:1, :]
    x2 = layer_norm(x2 + attn_out, small[1:2, :], small[2:3, :])

    # -------- feed-forward: single un-chunked matmul pair (hidden stays VMEM) --------
    hid = jnp.dot(x2.astype(jnp.bfloat16), l1w_ref[0],
                  preferred_element_type=jnp.float32) + l1b_ref[0]
    hid = jnp.maximum(hid, 0.0).astype(jnp.bfloat16)
    ff = jnp.dot(hid, l2w_ref[0],
                 preferred_element_type=jnp.float32) + small[3:4, :]
    x2 = layer_norm(x2 + ff, small[4:5, :], small[5:6, :])

    x2_ref[...] = x2                       # carry residual to next layer step

    # Last layer: lane-dense padded fc_out projection (real logits in cols 0:2).
    @pl.when(l == n_layers - 1)
    def _():
        logits = jnp.dot(x2.astype(jnp.bfloat16), fcw_ref[...],
                         preferred_element_type=jnp.float32) + fcb_ref[...]
        o_ref[...] = logits.reshape(Bg, S, fcw_ref.shape[1])


# ------------------------------ host wrapper --------------------------------

def _tensorcores_per_device():
    """2 only on parts with two TensorCores per device (v7x, v4/v5p megacore)."""
    try:
        kind = jax.devices()[0].device_kind.lower()
    except Exception:
        return 1
    if any(tag in kind for tag in ("v7", "7x", "v4", "v5p")):
        return 2
    return 1


def pallas_forward(src, params):
    """src: (S, B) int32 token ids -> logits (S, B, 2) f32 (eval-mode forward)."""
    S, B = src.shape
    D = D_MODEL

    # embedding * sqrt(d_model) + positional encoding (vocab-3 gather = glue)
    x = params["emb_w"][src] * math.sqrt(D) + params["pe"][:S][:, None, :]  # (S,B,D)

    # batch-major layout, pad seq to a full 8-sublane tile
    s_pad = ((S + 7) // 8) * 8
    xb = jnp.transpose(x, (1, 0, 2))
    xb = jnp.pad(xb, ((0, 0), (0, s_pad - S), (0, 0)))

    # single-TC chips (v5e/v6e): grid_b=1 -> no pointless serial split, 2x matmul M
    grid_b = 2 if (B % 2 == 0 and _tensorcores_per_device() >= 2) else 1
    bg = B // grid_b

    st = params["stacked"]
    ff = st["lin1_w_t"].shape[-1]

    in_specs = [
        pl.BlockSpec((bg, s_pad, D), lambda i, l: (i, 0, 0)),        # embedded x
        pl.BlockSpec((1, D, 3 * D), lambda i, l: (l, 0, 0)),         # in_proj W
        pl.BlockSpec((1, 1, 3 * D), lambda i, l: (l, 0, 0)),         # in_proj b
        pl.BlockSpec((1, D, D), lambda i, l: (l, 0, 0)),             # out_proj W
        pl.BlockSpec((1, D, ff), lambda i, l: (l, 0, 0)),            # lin1 W
        pl.BlockSpec((1, 1, ff), lambda i, l: (l, 0, 0)),            # lin1 b
        pl.BlockSpec((1, ff, D), lambda i, l: (l, 0, 0)),            # lin2 W
        pl.BlockSpec((1, 6, D), lambda i, l: (l, 0, 0)),             # packed small
        pl.BlockSpec((D, FC_PAD), lambda i, l: (0, 0)),              # fc_out W (resident)
        pl.BlockSpec((1, FC_PAD), lambda i, l: (0, 0)),              # fc_out b (resident)
    ]

    out = pl.pallas_call(
        functools.partial(_fused_forward_kernel, nhead=NHEAD,
                          head_dim=HEAD_DIM, ln_eps=LN_EPS),
        out_shape=jax.ShapeDtypeStruct((B, s_pad, FC_PAD), jnp.float32),
        grid=(grid_b, NUM_LAYERS),
        in_specs=in_specs,
        out_specs=pl.BlockSpec((bg, s_pad, FC_PAD), lambda i, l: (i, 0, 0)),
        scratch_shapes=[pltpu.VMEM((bg * s_pad, D), jnp.float32)],   # residual carry
        compiler_params=pltpu.CompilerParams(
            dimension_semantics=("parallel", "arbitrary")),
    )(xb, st["in_proj_w_t"], st["in_proj_b"], st["out_proj_w_t"],
      st["lin1_w_t"], st["lin1_b"], st["lin2_w_t"], st["small"],
      params["fc_w_pad"], params["fc_b_pad"])

    return jnp.transpose(out[:, :S, :2], (1, 0, 2))   # (S, B, 2)


# ------------------------ pure-JAX reference forward ------------------------

def reference_forward(src, params):
    """f32 reference of the same forward pass (bf16 weights upcast, no folding)."""
    S, B = src.shape
    D = D_MODEL
    x = params["emb_w"][src] * math.sqrt(D) + params["pe"][:S][:, None, :]
    causal = jnp.tril(jnp.ones((S, S), dtype=bool))

    def ln(z, w, b):
        mean = jnp.mean(z, -1, keepdims=True)
        var = jnp.mean((z - mean) ** 2, -1, keepdims=True)
        return (z - mean) / jnp.sqrt(var + LN_EPS) * w + b

    for lp in params["layers"]:
        small = lp["small"]
        qkv = x @ lp["in_proj_w_t"].astype(jnp.float32) + lp["in_proj_b"][0]
        q, k, v = jnp.split(qkv, 3, axis=-1)

        def heads(t):  # (S,B,D) -> (B,H,S,hd)
            return jnp.transpose(t.reshape(S, B, NHEAD, HEAD_DIM), (1, 2, 0, 3))

        s = jnp.einsum("bhqd,bhkd->bhqk", heads(q), heads(k)) / math.sqrt(HEAD_DIM)
        s = jnp.where(causal[None, None], s, -jnp.inf)
        attn = jax.nn.softmax(s, axis=-1)
        ctx = jnp.einsum("bhqk,bhkd->bhqd", attn, heads(v))
        ctx = jnp.transpose(ctx, (2, 0, 1, 3)).reshape(S, B, D)
        attn_out = ctx @ lp["out_proj_w_t"].astype(jnp.float32) + small[0]
        x = ln(x + attn_out, small[1], small[2])

        h = jnp.maximum(x @ lp["lin1_w_t"].astype(jnp.float32) + lp["lin1_b"][0], 0.0)
        ff = h @ lp["lin2_w_t"].astype(jnp.float32) + small[3]
        x = ln(x + ff, small[4], small[5])

    fc_w = params["fc_w_pad"].astype(jnp.float32)[:, :2]
    return x @ fc_w + params["fc_b_pad"][0, :2]


# ------------------------- deterministic parameters -------------------------

def init_params(key):
    def nrm(k, shape, scale=0.02):
        return scale * jax.random.normal(k, shape, dtype=jnp.float32)

    keys = jax.random.split(key, 2 + NUM_LAYERS)
    params = {"emb_w": nrm(keys[0], (VOCAB_SIZE, D_MODEL))}

    # sinusoidal positional-encoding table (same math as PositionalEncoding)
    position = jnp.arange(MAX_SEQ_LENGTH, dtype=jnp.float32)[:, None]
    div_term = jnp.exp(jnp.arange(0, D_MODEL, 2, dtype=jnp.float32)
                       * (-math.log(10000.0) / D_MODEL))
    pe = jnp.zeros((MAX_SEQ_LENGTH, D_MODEL), jnp.float32)
    pe = pe.at[:, 0::2].set(jnp.sin(position * div_term))
    pe = pe.at[:, 1::2].set(jnp.cos(position * div_term))
    params["pe"] = pe

    layers = []
    for l in range(NUM_LAYERS):
        lk = jax.random.split(keys[2 + l], 8)
        out_proj_b = nrm(lk[3], (D_MODEL,))
        lin2_b = nrm(lk[7], (D_MODEL,))
        layers.append({
            # weight matrices pre-transposed to (in, out), stored bf16 (MXU-native)
            "in_proj_w_t": nrm(lk[0], (D_MODEL, 3 * D_MODEL)).astype(jnp.bfloat16),
            "in_proj_b": nrm(lk[1], (1, 3 * D_MODEL)),
            "out_proj_w_t": nrm(lk[2], (D_MODEL, D_MODEL)).astype(jnp.bfloat16),
            "lin1_w_t": nrm(lk[4], (D_MODEL, DIM_FEEDFORWARD)).astype(jnp.bfloat16),
            "lin1_b": nrm(lk[5], (1, DIM_FEEDFORWARD)),
            "lin2_w_t": nrm(lk[6], (DIM_FEEDFORWARD, D_MODEL)).astype(jnp.bfloat16),
            # packed small f32 vectors: [out_proj_b, ln1_w, ln1_b, lin2_b, ln2_w, ln2_b]
            "small": jnp.stack([out_proj_b,
                                jnp.ones((D_MODEL,), jnp.float32),
                                jnp.zeros((D_MODEL,), jnp.float32),
                                lin2_b,
                                jnp.ones((D_MODEL,), jnp.float32),
                                jnp.zeros((D_MODEL,), jnp.float32)], axis=0),
        })
    params["layers"] = layers

    # Kernel-ready stacked weights (leading layer axis -> streamed per grid step),
    # with the 1/sqrt(head_dim) attention scale folded into the Q columns of the
    # in_proj weight & bias (one-time host transform).
    scale = 1.0 / math.sqrt(HEAD_DIM)
    q_col_scale = jnp.concatenate(
        [jnp.full((D_MODEL,), scale, jnp.float32),
         jnp.ones((2 * D_MODEL,), jnp.float32)])
    params["stacked"] = {
        "in_proj_w_t": jnp.stack(
            [(lp["in_proj_w_t"].astype(jnp.float32) * q_col_scale
              ).astype(jnp.bfloat16) for lp in layers]),
        "in_proj_b": jnp.stack([lp["in_proj_b"] * q_col_scale for lp in layers]),
        "out_proj_w_t": jnp.stack([lp["out_proj_w_t"] for lp in layers]),
        "lin1_w_t": jnp.stack([lp["lin1_w_t"] for lp in layers]),
        "lin1_b": jnp.stack([lp["lin1_b"] for lp in layers]),
        "lin2_w_t": jnp.stack([lp["lin2_w_t"] for lp in layers]),
        "small": jnp.stack([lp["small"] for lp in layers]),
    }

    fc_w = nrm(keys[1], (D_MODEL, 2))
    params["fc_w_pad"] = jnp.pad(fc_w, ((0, 0), (0, FC_PAD - 2))).astype(jnp.bfloat16)
    params["fc_b_pad"] = jnp.zeros((1, FC_PAD), jnp.float32)
    return params


# ---------------------------------- main ------------------------------------

if __name__ == "__main__":
    key = jax.random.PRNGKey(0)
    pkey, skey = jax.random.split(key)
    params = init_params(pkey)

    S, B = MAX_SEQ_LENGTH, 8
    src = jax.random.randint(skey, (S, B), 0, VOCAB_SIZE, dtype=jnp.int32)

    fwd = jax.jit(pallas_forward)
    logits = jax.block_until_ready(fwd(src, params))
    assert logits.shape == (S, B, 2), logits.shape

    # cross-check against the pure-JAX f32 reference (kernel uses bf16 matmuls
    # with f32 accumulation + approx reciprocal -> ~1e-3 expected error)
    ref = reference_forward(src, params)
    max_err = float(jnp.max(jnp.abs(logits - ref)))
    assert jnp.allclose(logits, ref, atol=1e-2, rtol=1e-2), max_err

    print("KERNEL_OK")
</pallas_src>

<mosaic_0001>
module attributes {stable_mosaic.version = 11 : i64} {
  func.func @_fused_forward_kernel(%arg0: i32, %arg1: i32, %arg2: memref<8x8x64xf32, #tpu.memory_space<vmem>>, %arg3: memref<1x64x192xbf16, #tpu.memory_space<vmem>>, %arg4: memref<1x1x192xf32, #tpu.memory_space<vmem>>, %arg5: memref<1x64x64xbf16, #tpu.memory_space<vmem>>, %arg6: memref<1x64x2048xbf16, #tpu.memory_space<vmem>>, %arg7: memref<1x1x2048xf32, #tpu.memory_space<vmem>>, %arg8: memref<1x2048x64xbf16, #tpu.memory_space<vmem>>, %arg9: memref<1x6x64xf32, #tpu.memory_space<vmem>>, %arg10: memref<64x128xbf16, #tpu.memory_space<vmem>>, %arg11: memref<1x128xf32, #tpu.memory_space<vmem>>, %arg12: memref<8x8x128xf32, #tpu.memory_space<vmem>>, %arg13: memref<64x64xf32, #tpu.memory_space<vmem>>) attributes {dimension_semantics = [#tpu.dimension_semantics<parallel>, #tpu.dimension_semantics<arbitrary>], iteration_bounds = array<i64: 1, 2>, scalar_prefetch = 0 : i64, scratch_operands = 1 : i64, tpu.core_type = #tpu.core_type<tc>, window_params = [{transform_indices = @transform_0, window_bounds = array<i64: 8, 8, 64>}, {transform_indices = @transform_1, window_bounds = array<i64: 1, 64, 192>}, {transform_indices = @transform_2, window_bounds = array<i64: 1, 1, 192>}, {transform_indices = @transform_3, window_bounds = array<i64: 1, 64, 64>}, {transform_indices = @transform_4, window_bounds = array<i64: 1, 64, 2048>}, {transform_indices = @transform_5, window_bounds = array<i64: 1, 1, 2048>}, {transform_indices = @transform_6, window_bounds = array<i64: 1, 2048, 64>}, {transform_indices = @transform_7, window_bounds = array<i64: 1, 6, 64>}, {pipeline_mode = #tpu.pipeline_mode<synchronous>, transform_indices = @transform_8, window_bounds = array<i64: 64, 128>}, {pipeline_mode = #tpu.pipeline_mode<synchronous>, transform_indices = @transform_9, window_bounds = array<i64: 1, 128>}, {transform_indices = @transform_10, window_bounds = array<i64: 8, 8, 128>}]} {
    %0 = tpu.iota {dimensions = array<i32: 0>} : vector<8x8xi32>
    %1 = tpu.iota {dimensions = array<i32: 1>} : vector<8x8xi32>
    %2 = arith.cmpi sle, %1, %0 : vector<8x8xi32>
    %cst = arith.constant 0.000000e+00 : f32
    %cst_0 = arith.constant -1.000000e+30 : f32
    %3 = vector.broadcast %cst : f32 to vector<8x8xf32>
    %4 = vector.broadcast %cst_0 : f32 to vector<8x8xf32>
    %5 = arith.select %2, %3, %4 : vector<8x8xi1>, vector<8x8xf32>
    %c0_i32 = arith.constant 0 : i32
    %6 = arith.cmpi eq, %arg1, %c0_i32 : i32
    %7 = arith.extui %6 : i1 to i32
    %c0_i32_1 = arith.constant 0 : i32
    %8 = arith.cmpi ne, %7, %c0_i32_1 : i32
    scf.if %8 {
      %c0_58 = arith.constant 0 : index
      %c0_59 = arith.constant 0 : index
      %c0_60 = arith.constant 0 : index
      %177 = vector.load %arg2[%c0_58, %c0_59, %c0_60] : memref<8x8x64xf32, #tpu.memory_space<vmem>>, vector<8x8x64xf32>
      %178 = vector.shape_cast %177 : vector<8x8x64xf32> to vector<64x64xf32>
      %c0_61 = arith.constant 0 : index
      %c0_62 = arith.constant 0 : index
      %179 = vector.load %arg13[%c0_61, %c0_62] : memref<64x64xf32, #tpu.memory_space<vmem>>, vector<64x64xf32>
      tpu.vector_store %arg13[%c0_61, %c0_62], %178 {strides = array<i32>} : memref<64x64xf32, #tpu.memory_space<vmem>>, vector<64x64xf32>,
    } else {
    }
    %c0 = arith.constant 0 : index
    %c0_2 = arith.constant 0 : index
    %9 = vector.load %arg13[%c0, %c0_2] : memref<64x64xf32, #tpu.memory_space<vmem>>, vector<64x64xf32>
    %c0_3 = arith.constant 0 : index
    %c0_4 = arith.constant 0 : index
    %c0_5 = arith.constant 0 : index
    %10 = vector.load %arg9[%c0_3, %c0_4, %c0_5] : memref<1x6x64xf32, #tpu.memory_space<vmem>>, vector<1x6x64xf32>
    %11 = vector.shape_cast %10 : vector<1x6x64xf32> to vector<6x64xf32>
    %12 = arith.truncf %9 : vector<64x64xf32> to vector<64x64xbf16>
    %c0_6 = arith.constant 0 : index
    %c0_7 = arith.constant 0 : index
    %c0_8 = arith.constant 0 : index
    %13 = vector.load %arg3[%c0_6, %c0_7, %c0_8] : memref<1x64x192xbf16, #tpu.memory_space<vmem>>, vector<1x64x192xbf16>
    %14 = vector.shape_cast %13 : vector<1x64x192xbf16> to vector<64x192xbf16>
    %cst_9 = arith.constant dense<0.000000e+00> : vector<64x192xf32>
    %15 = tpu.matmul %12, %14, %cst_9 {dimension_numbers = #tpu.dot_dimension_numbers<[1], [0], [0], [1], [0, 0, 1, 1], [], []>} : vector<64x64xbf16>, vector<64x192xbf16>, vector<64x192xf32> -> vector<64x192xf32>
    %c0_10 = arith.constant 0 : index
    %c0_11 = arith.constant 0 : index
    %c0_12 = arith.constant 0 : index
    %16 = vector.load %arg4[%c0_10, %c0_11, %c0_12] : memref<1x1x192xf32, #tpu.memory_space<vmem>>, vector<1x1x192xf32>
    %17 = vector.shape_cast %16 : vector<1x1x192xf32> to vector<1x192xf32>
    %18 = vector.broadcast %17 : vector<1x192xf32> to vector<64x192xf32>
    %19 = arith.addf %15, %18 : vector<64x192xf32>
    %20 = vector.shape_cast %19 : vector<64x192xf32> to vector<8x8x192xf32>
    %21 = arith.truncf %20 : vector<8x8x192xf32> to vector<8x8x192xbf16>
    %22 = vector.extract_strided_slice %21 {offsets = [0, 0, 0], sizes = [8, 8, 16], strides = [1, 1, 1]} : vector<8x8x192xbf16> to vector<8x8x16xbf16>
    %23 = vector.extract_strided_slice %21 {offsets = [0, 0, 64], sizes = [8, 8, 16], strides = [1, 1, 1]} : vector<8x8x192xbf16> to vector<8x8x16xbf16>
    %24 = vector.extract_strided_slice %21 {offsets = [0, 0, 128], sizes = [8, 8, 16], strides = [1, 1, 1]} : vector<8x8x192xbf16> to vector<8x8x16xbf16>
    "tpu.trace_start"() <{level = 10 : i32, message = "bqd,bkd->bqk"}> : () -> ()
    %cst_13 = arith.constant dense<0.000000e+00> : vector<8x8x8xf32>
    %25 = tpu.matmul %22, %23, %cst_13 {dimension_numbers = #tpu.dot_dimension_numbers<[2], [2], [1], [1], [0, 0, 0, 1, 1, 1], [0], [0]>} : vector<8x8x16xbf16>, vector<8x8x16xbf16>, vector<8x8x8xf32> -> vector<8x8x8xf32>
    "tpu.trace_stop"() : () -> ()
    %26 = vector.shape_cast %5 : vector<8x8xf32> to vector<1x8x8xf32>
    %27 = vector.broadcast %26 : vector<1x8x8xf32> to vector<8x8x8xf32>
    %28 = arith.addf %25, %27 : vector<8x8x8xf32>
    %cst_14 = arith.constant dense<0xFF800000> : vector<8x8xf32>
    %29 = vector.multi_reduction <maximumf>, %28, %cst_14 [2] : vector<8x8x8xf32> to vector<8x8xf32>
    %30 = vector.shape_cast %29 : vector<8x8xf32> to vector<8x8x1xf32>
    %31 = vector.broadcast %30 : vector<8x8x1xf32> to vector<8x8x8xf32>
    %32 = arith.subf %28, %31 : vector<8x8x8xf32>
    %33 = math.exp %32 : vector<8x8x8xf32>
    %cst_15 = arith.constant dense<0.000000e+00> : vector<8x8xf32>
    %34 = vector.multi_reduction <add>, %33, %cst_15 [2] : vector<8x8x8xf32> to vector<8x8xf32>
    %35 = vector.shape_cast %34 : vector<8x8xf32> to vector<8x8x1xf32>
    %36 = tpu.reciprocal %35 {approx = true} : vector<8x8x1xf32> -> vector<8x8x1xf32>
    %37 = vector.broadcast %36 : vector<8x8x1xf32> to vector<8x8x8xf32>
    %38 = arith.mulf %33, %37 : vector<8x8x8xf32>
    %39 = arith.truncf %38 : vector<8x8x8xf32> to vector<8x8x8xbf16>
    "tpu.trace_start"() <{level = 10 : i32, message = "bqk,bkd->bqd"}> : () -> ()
    %cst_16 = arith.constant dense<0.000000e+00> : vector<8x8x16xf32>
    %40 = tpu.matmul %39, %24, %cst_16 {dimension_numbers = #tpu.dot_dimension_numbers<[2], [1], [1], [2], [0, 0, 0, 1, 1, 2], [0], [0]>} : vector<8x8x8xbf16>, vector<8x8x16xbf16>, vector<8x8x16xf32> -> vector<8x8x16xf32>
    "tpu.trace_stop"() : () -> ()
    %41 = vector.shape_cast %40 : vector<8x8x16xf32> to vector<64x16xf32>
    %42 = vector.extract_strided_slice %21 {offsets = [0, 0, 16], sizes = [8, 8, 16], strides = [1, 1, 1]} : vector<8x8x192xbf16> to vector<8x8x16xbf16>
    %43 = vector.extract_strided_slice %21 {offsets = [0, 0, 80], sizes = [8, 8, 16], strides = [1, 1, 1]} : vector<8x8x192xbf16> to vector<8x8x16xbf16>
    %44 = vector.extract_strided_slice %21 {offsets = [0, 0, 144], sizes = [8, 8, 16], strides = [1, 1, 1]} : vector<8x8x192xbf16> to vector<8x8x16xbf16>
    "tpu.trace_start"() <{level = 10 : i32, message = "bqd,bkd->bqk"}> : () -> ()
    %cst_17 = arith.constant dense<0.000000e+00> : vector<8x8x8xf32>
    %45 = tpu.matmul %42, %43, %cst_17 {dimension_numbers = #tpu.dot_dimension_numbers<[2], [2], [1], [1], [0, 0, 0, 1, 1, 1], [0], [0]>} : vector<8x8x16xbf16>, vector<8x8x16xbf16>, vector<8x8x8xf32> -> vector<8x8x8xf32>
    "tpu.trace_stop"() : () -> ()
    %46 = vector.shape_cast %5 : vector<8x8xf32> to vector<1x8x8xf32>
    %47 = vector.broadcast %46 : vector<1x8x8xf32> to vector<8x8x8xf32>
    %48 = arith.addf %45, %47 : vector<8x8x8xf32>
    %cst_18 = arith.constant dense<0xFF800000> : vector<8x8xf32>
    %49 = vector.multi_reduction <maximumf>, %48, %cst_18 [2] : vector<8x8x8xf32> to vector<8x8xf32>
    %50 = vector.shape_cast %49 : vector<8x8xf32> to vector<8x8x1xf32>
    %51 = vector.broadcast %50 : vector<8x8x1xf32> to vector<8x8x8xf32>
    %52 = arith.subf %48, %51 : vector<8x8x8xf32>
    %53 = math.exp %52 : vector<8x8x8xf32>
    %cst_19 = arith.constant dense<0.000000e+00> : vector<8x8xf32>
    %54 = vector.multi_reduction <add>, %53, %cst_19 [2] : vector<8x8x8xf32> to vector<8x8xf32>
    %55 = vector.shape_cast %54 : vector<8x8xf32> to vector<8x8x1xf32>
    %56 = tpu.reciprocal %55 {approx = true} : vector<8x8x1xf32> -> vector<8x8x1xf32>
    %57 = vector.broadcast %56 : vector<8x8x1xf32> to vector<8x8x8xf32>
    %58 = arith.mulf %53, %57 : vector<8x8x8xf32>
    %59 = arith.truncf %58 : vector<8x8x8xf32> to vector<8x8x8xbf16>
    "tpu.trace_start"() <{level = 10 : i32, message = "bqk,bkd->bqd"}> : () -> ()
    %cst_20 = arith.constant dense<0.000000e+00> : vector<8x8x16xf32>
    %60 = tpu.matmul %59, %44, %cst_20 {dimension_numbers = #tpu.dot_dimension_numbers<[2], [1], [1], [2], [0, 0, 0, 1, 1, 2], [0], [0]>} : vector<8x8x8xbf16>, vector<8x8x16xbf16>, vector<8x8x16xf32> -> vector<8x8x16xf32>
    "tpu.trace_stop"() : () -> ()
    %61 = vector.shape_cast %60 : vector<8x8x16xf32> to vector<64x16xf32>
    %62 = vector.extract_strided_slice %21 {offsets = [0, 0, 32], sizes = [8, 8, 16], strides = [1, 1, 1]} : vector<8x8x192xbf16> to vector<8x8x16xbf16>
    %63 = vector.extract_strided_slice %21 {offsets = [0, 0, 96], sizes = [8, 8, 16], strides = [1, 1, 1]} : vector<8x8x192xbf16> to vector<8x8x16xbf16>
    %64 = vector.extract_strided_slice %21 {offsets = [0, 0, 160], sizes = [8, 8, 16], strides = [1, 1, 1]} : vector<8x8x192xbf16> to vector<8x8x16xbf16>
    "tpu.trace_start"() <{level = 10 : i32, message = "bqd,bkd->bqk"}> : () -> ()
    %cst_21 = arith.constant dense<0.000000e+00> : vector<8x8x8xf32>
    %65 = tpu.matmul %62, %63, %cst_21 {dimension_numbers = #tpu.dot_dimension_numbers<[2], [2], [1], [1], [0, 0, 0, 1, 1, 1], [0], [0]>} : vector<8x8x16xbf16>, vector<8x8x16xbf16>, vector<8x8x8xf32> -> vector<8x8x8xf32>
    "tpu.trace_stop"() : () -> ()
    %66 = vector.shape_cast %5 : vector<8x8xf32> to vector<1x8x8xf32>
    %67 = vector.broadcast %66 : vector<1x8x8xf32> to vector<8x8x8xf32>
    %68 = arith.addf %65, %67 : vector<8x8x8xf32>
    %cst_22 = arith.constant dense<0xFF800000> : vector<8x8xf32>
    %69 = vector.multi_reduction <maximumf>, %68, %cst_22 [2] : vector<8x8x8xf32> to vector<8x8xf32>
    %70 = vector.shape_cast %69 : vector<8x8xf32> to vector<8x8x1xf32>
    %71 = vector.broadcast %70 : vector<8x8x1xf32> to vector<8x8x8xf32>
    %72 = arith.subf %68, %71 : vector<8x8x8xf32>
    %73 = math.exp %72 : vector<8x8x8xf32>
    %cst_23 = arith.constant dense<0.000000e+00> : vector<8x8xf32>
    %74 = vector.multi_reduction <add>, %73, %cst_23 [2] : vector<8x8x8xf32> to vector<8x8xf32>
    %75 = vector.shape_cast %74 : vector<8x8xf32> to vector<8x8x1xf32>
    %76 = tpu.reciprocal %75 {approx = true} : vector<8x8x1xf32> -> vector<8x8x1xf32>
    %77 = vector.broadcast %76 : vector<8x8x1xf32> to vector<8x8x8xf32>
    %78 = arith.mulf %73, %77 : vector<8x8x8xf32>
    %79 = arith.truncf %78 : vector<8x8x8xf32> to vector<8x8x8xbf16>
    "tpu.trace_start"() <{level = 10 : i32, message = "bqk,bkd->bqd"}> : () -> ()
    %cst_24 = arith.constant dense<0.000000e+00> : vector<8x8x16xf32>
    %80 = tpu.matmul %79, %64, %cst_24 {dimension_numbers = #tpu.dot_dimension_numbers<[2], [1], [1], [2], [0, 0, 0, 1, 1, 2], [0], [0]>} : vector<8x8x8xbf16>, vector<8x8x16xbf16>, vector<8x8x16xf32> -> vector<8x8x16xf32>
    "tpu.trace_stop"() : () -> ()
    %81 = vector.shape_cast %80 : vector<8x8x16xf32> to vector<64x16xf32>
    %82 = vector.extract_strided_slice %21 {offsets = [0, 0, 48], sizes = [8, 8, 16], strides = [1, 1, 1]} : vector<8x8x192xbf16> to vector<8x8x16xbf16>
    %83 = vector.extract_strided_slice %21 {offsets = [0, 0, 112], sizes = [8, 8, 16], strides = [1, 1, 1]} : vector<8x8x192xbf16> to vector<8x8x16xbf16>
    %84 = vector.extract_strided_slice %21 {offsets = [0, 0, 176], sizes = [8, 8, 16], strides = [1, 1, 1]} : vector<8x8x192xbf16> to vector<8x8x16xbf16>
    "tpu.trace_start"() <{level = 10 : i32, message = "bqd,bkd->bqk"}> : () -> ()
    %cst_25 = arith.constant dense<0.000000e+00> : vector<8x8x8xf32>
    %85 = tpu.matmul %82, %83, %cst_25 {dimension_numbers = #tpu.dot_dimension_numbers<[2], [2], [1], [1], [0, 0, 0, 1, 1, 1], [0], [0]>} : vector<8x8x16xbf16>, vector<8x8x16xbf16>, vector<8x8x8xf32> -> vector<8x8x8xf32>
    "tpu.trace_stop"() : () -> ()
    %86 = vector.shape_cast %5 : vector<8x8xf32> to vector<1x8x8xf32>
    %87 = vector.broadcast %86 : vector<1x8x8xf32> to vector<8x8x8xf32>
    %88 = arith.addf %85, %87 : vector<8x8x8xf32>
    %cst_26 = arith.constant dense<0xFF800000> : vector<8x8xf32>
    %89 = vector.multi_reduction <maximumf>, %88, %cst_26 [2] : vector<8x8x8xf32> to vector<8x8xf32>
    %90 = vector.shape_cast %89 : vector<8x8xf32> to vector<8x8x1xf32>
    %91 = vector.broadcast %90 : vector<8x8x1xf32> to vector<8x8x8xf32>
    %92 = arith.subf %88, %91 : vector<8x8x8xf32>
    %93 = math.exp %92 : vector<8x8x8xf32>
    %cst_27 = arith.constant dense<0.000000e+00> : vector<8x8xf32>
    %94 = vector.multi_reduction <add>, %93, %cst_27 [2] : vector<8x8x8xf32> to vector<8x8xf32>
    %95 = vector.shape_cast %94 : vector<8x8xf32> to vector<8x8x1xf32>
    %96 = tpu.reciprocal %95 {approx = true} : vector<8x8x1xf32> -> vector<8x8x1xf32>
    %97 = vector.broadcast %96 : vector<8x8x1xf32> to vector<8x8x8xf32>
    %98 = arith.mulf %93, %97 : vector<8x8x8xf32>
    %99 = arith.truncf %98 : vector<8x8x8xf32> to vector<8x8x8xbf16>
    "tpu.trace_start"() <{level = 10 : i32, message = "bqk,bkd->bqd"}> : () -> ()
    %cst_28 = arith.constant dense<0.000000e+00> : vector<8x8x16xf32>
    %100 = tpu.matmul %99, %84, %cst_28 {dimension_numbers = #tpu.dot_dimension_numbers<[2], [1], [1], [2], [0, 0, 0, 1, 1, 2], [0], [0]>} : vector<8x8x8xbf16>, vector<8x8x16xbf16>, vector<8x8x16xf32> -> vector<8x8x16xf32>
    "tpu.trace_stop"() : () -> ()
    %101 = vector.shape_cast %100 : vector<8x8x16xf32> to vector<64x16xf32>
    %102 = tpu.concatenate %41, %61, %81, %101 in 1 : vector<64x16xf32>, vector<64x16xf32>, vector<64x16xf32>, vector<64x16xf32> -> vector<64x64xf32>
    %103 = arith.truncf %102 : vector<64x64xf32> to vector<64x64xbf16>
    %c0_29 = arith.constant 0 : index
    %c0_30 = arith.constant 0 : index
    %c0_31 = arith.constant 0 : index
    %104 = vector.load %arg5[%c0_29, %c0_30, %c0_31] : memref<1x64x64xbf16, #tpu.memory_space<vmem>>, vector<1x64x64xbf16>
    %105 = vector.shape_cast %104 : vector<1x64x64xbf16> to vector<64x64xbf16>
    %cst_32 = arith.constant dense<0.000000e+00> : vector<64x64xf32>
    %106 = tpu.matmul %103, %105, %cst_32 {dimension_numbers = #tpu.dot_dimension_numbers<[1], [0], [0], [1], [0, 0, 1, 1], [], []>} : vector<64x64xbf16>, vector<64x64xbf16>, vector<64x64xf32> -> vector<64x64xf32>
    %107 = vector.extract_strided_slice %11 {offsets = [0, 0], sizes = [1, 64], strides = [1, 1]} : vector<6x64xf32> to vector<1x64xf32>
    %108 = vector.broadcast %107 : vector<1x64xf32> to vector<64x64xf32>
    %109 = arith.addf %106, %108 : vector<64x64xf32>
    %110 = arith.addf %9, %109 : vector<64x64xf32>
    %111 = vector.extract_strided_slice %11 {offsets = [1, 0], sizes = [1, 64], strides = [1, 1]} : vector<6x64xf32> to vector<1x64xf32>
    %112 = vector.extract_strided_slice %11 {offsets = [2, 0], sizes = [1, 64], strides = [1, 1]} : vector<6x64xf32> to vector<1x64xf32>
    %cst_33 = arith.constant dense<0.000000e+00> : vector<64xf32>
    %113 = vector.multi_reduction <add>, %110, %cst_33 [1] : vector<64x64xf32> to vector<64xf32>
    %114 = vector.shape_cast %113 : vector<64xf32> to vector<64x1xf32>
    %cst_34 = arith.constant 6.400000e+01 : f32
    %115 = vector.broadcast %cst_34 : f32 to vector<64x1xf32>
    %116 = arith.divf %114, %115 : vector<64x1xf32>
    %117 = vector.broadcast %116 : vector<64x1xf32> to vector<64x64xf32>
    %118 = arith.subf %110, %117 : vector<64x64xf32>
    %119 = arith.mulf %118, %118 : vector<64x64xf32>
    %cst_35 = arith.constant dense<0.000000e+00> : vector<64xf32>
    %120 = vector.multi_reduction <add>, %119, %cst_35 [1] : vector<64x64xf32> to vector<64xf32>
    %121 = vector.shape_cast %120 : vector<64xf32> to vector<64x1xf32>
    %cst_36 = arith.constant 6.400000e+01 : f32
    %122 = vector.broadcast %cst_36 : f32 to vector<64x1xf32>
    %123 = arith.divf %121, %122 : vector<64x1xf32>
    %cst_37 = arith.constant 9.99999974E-6 : f32
    %124 = vector.broadcast %cst_37 : f32 to vector<64x1xf32>
    %125 = arith.addf %123, %124 : vector<64x1xf32>
    %126 = math.rsqrt %125 : vector<64x1xf32>
    %127 = vector.broadcast %126 : vector<64x1xf32> to vector<64x64xf32>
    %128 = arith.mulf %118, %127 : vector<64x64xf32>
    %129 = vector.broadcast %111 : vector<1x64xf32> to vector<64x64xf32>
    %130 = arith.mulf %128, %129 : vector<64x64xf32>
    %131 = vector.broadcast %112 : vector<1x64xf32> to vector<64x64xf32>
    %132 = arith.addf %130, %131 : vector<64x64xf32>
    %133 = arith.truncf %132 : vector<64x64xf32> to vector<64x64xbf16>
    %c0_38 = arith.constant 0 : index
    %c0_39 = arith.constant 0 : index
    %c0_40 = arith.constant 0 : index
    %134 = vector.load %arg6[%c0_38, %c0_39, %c0_40] : memref<1x64x2048xbf16, #tpu.memory_space<vmem>>, vector<1x64x2048xbf16>
    %135 = vector.shape_cast %134 : vector<1x64x2048xbf16> to vector<64x2048xbf16>
    %cst_41 = arith.constant dense<0.000000e+00> : vector<64x2048xf32>
    %136 = tpu.matmul %133, %135, %cst_41 {dimension_numbers = #tpu.dot_dimension_numbers<[1], [0], [0], [1], [0, 0, 1, 1], [], []>} : vector<64x64xbf16>, vector<64x2048xbf16>, vector<64x2048xf32> -> vector<64x2048xf32>
    %c0_42 = arith.constant 0 : index
    %c0_43 = arith.constant 0 : index
    %c0_44 = arith.constant 0 : index
    %137 = vector.load %arg7[%c0_42, %c0_43, %c0_44] : memref<1x1x2048xf32, #tpu.memory_space<vmem>>, vector<1x1x2048xf32>
    %138 = vector.shape_cast %137 : vector<1x1x2048xf32> to vector<1x2048xf32>
    %139 = vector.broadcast %138 : vector<1x2048xf32> to vector<64x2048xf32>
    %140 = arith.addf %136, %139 : vector<64x2048xf32>
    %cst_45 = arith.constant 0.000000e+00 : f32
    %141 = vector.broadcast %cst_45 : f32 to vector<64x2048xf32>
    %142 = arith.maximumf %140, %141 : vector<64x2048xf32>
    %143 = arith.truncf %142 : vector<64x2048xf32> to vector<64x2048xbf16>
    %c0_46 = arith.constant 0 : index
    %c0_47 = arith.constant 0 : index
    %c0_48 = arith.constant 0 : index
    %144 = vector.load %arg8[%c0_46, %c0_47, %c0_48] : memref<1x2048x64xbf16, #tpu.memory_space<vmem>>, vector<1x2048x64xbf16>
    %145 = vector.shape_cast %144 : vector<1x2048x64xbf16> to vector<2048x64xbf16>
    %cst_49 = arith.constant dense<0.000000e+00> : vector<64x64xf32>
    %146 = tpu.matmul %143, %145, %cst_49 {dimension_numbers = #tpu.dot_dimension_numbers<[1], [0], [0], [1], [0, 0, 1, 1], [], []>} : vector<64x2048xbf16>, vector<2048x64xbf16>, vector<64x64xf32> -> vector<64x64xf32>
    %147 = vector.extract_strided_slice %11 {offsets = [3, 0], sizes = [1, 64], strides = [1, 1]} : vector<6x64xf32> to vector<1x64xf32>
    %148 = vector.broadcast %147 : vector<1x64xf32> to vector<64x64xf32>
    %149 = arith.addf %146, %148 : vector<64x64xf32>
    %150 = arith.addf %132, %149 : vector<64x64xf32>
    %151 = vector.extract_strided_slice %11 {offsets = [4, 0], sizes = [1, 64], strides = [1, 1]} : vector<6x64xf32> to vector<1x64xf32>
    %152 = vector.extract_strided_slice %11 {offsets = [5, 0], sizes = [1, 64], strides = [1, 1]} : vector<6x64xf32> to vector<1x64xf32>
    %cst_50 = arith.constant dense<0.000000e+00> : vector<64xf32>
    %153 = vector.multi_reduction <add>, %150, %cst_50 [1] : vector<64x64xf32> to vector<64xf32>
    %154 = vector.shape_cast %153 : vector<64xf32> to vector<64x1xf32>
    %cst_51 = arith.constant 6.400000e+01 : f32
    %155 = vector.broadcast %cst_51 : f32 to vector<64x1xf32>
    %156 = arith.divf %154, %155 : vector<64x1xf32>
    %157 = vector.broadcast %156 : vector<64x1xf32> to vector<64x64xf32>
    %158 = arith.subf %150, %157 : vector<64x64xf32>
    %159 = arith.mulf %158, %158 : vector<64x64xf32>
    %cst_52 = arith.constant dense<0.000000e+00> : vector<64xf32>
    %160 = vector.multi_reduction <add>, %159, %cst_52 [1] : vector<64x64xf32> to vector<64xf32>
    %161 = vector.shape_cast %160 : vector<64xf32> to vector<64x1xf32>
    %cst_53 = arith.constant 6.400000e+01 : f32
    %162 = vector.broadcast %cst_53 : f32 to vector<64x1xf32>
    %163 = arith.divf %161, %162 : vector<64x1xf32>
    %cst_54 = arith.constant 9.99999974E-6 : f32
    %164 = vector.broadcast %cst_54 : f32 to vector<64x1xf32>
    %165 = arith.addf %163, %164 : vector<64x1xf32>
    %166 = math.rsqrt %165 : vector<64x1xf32>
    %167 = vector.broadcast %166 : vector<64x1xf32> to vector<64x64xf32>
    %168 = arith.mulf %158, %167 : vector<64x64xf32>
    %169 = vector.broadcast %151 : vector<1x64xf32> to vector<64x64xf32>
    %170 = arith.mulf %168, %169 : vector<64x64xf32>
    %171 = vector.broadcast %152 : vector<1x64xf32> to vector<64x64xf32>
    %172 = arith.addf %170, %171 : vector<64x64xf32>
    %c0_55 = arith.constant 0 : index
    %c0_56 = arith.constant 0 : index
    %173 = vector.load %arg13[%c0_55, %c0_56] : memref<64x64xf32, #tpu.memory_space<vmem>>, vector<64x64xf32>
    tpu.vector_store %arg13[%c0_55, %c0_56], %172 {strides = array<i32>} : memref<64x64xf32, #tpu.memory_space<vmem>>, vector<64x64xf32>,
    %c1_i32 = arith.constant 1 : i32
    %174 = arith.cmpi eq, %arg1, %c1_i32 : i32
    %175 = arith.extui %174 : i1 to i32
    %c0_i32_57 = arith.constant 0 : i32
    %176 = arith.cmpi ne, %175, %c0_i32_57 : i32
    scf.if %176 {
      %177 = arith.truncf %172 : vector<64x64xf32> to vector<64x64xbf16>
      %c0_58 = arith.constant 0 : index
      %c0_59 = arith.constant 0 : index
      %178 = vector.load %arg10[%c0_58, %c0_59] : memref<64x128xbf16, #tpu.memory_space<vmem>>, vector<64x128xbf16>
      %cst_60 = arith.constant dense<0.000000e+00> : vector<64x128xf32>
      %179 = tpu.matmul %177, %178, %cst_60 {dimension_numbers = #tpu.dot_dimension_numbers<[1], [0], [0], [1], [0, 0, 1, 1], [], []>} : vector<64x64xbf16>, vector<64x128xbf16>, vector<64x128xf32> -> vector<64x128xf32>
      %c0_61 = arith.constant 0 : index
      %c0_62 = arith.constant 0 : index
      %180 = vector.load %arg11[%c0_61, %c0_62] : memref<1x128xf32, #tpu.memory_space<vmem>>, vector<1x128xf32>
      %181 = vector.broadcast %180 : vector<1x128xf32> to vector<64x128xf32>
      %182 = arith.addf %179, %181 : vector<64x128xf32>
      %183 = vector.shape_cast %182 : vector<64x128xf32> to vector<8x8x128xf32>
      %c0_63 = arith.constant 0 : index
      %c0_64 = arith.constant 0 : index
      %c0_65 = arith.constant 0 : index
      %184 = vector.load %arg12[%c0_63, %c0_64, %c0_65] : memref<8x8x128xf32, #tpu.memory_space<vmem>>, vector<8x8x128xf32>
      tpu.vector_store %arg12[%c0_63, %c0_64, %c0_65], %183 {strides = array<i32>} : memref<8x8x128xf32, #tpu.memory_space<vmem>>, vector<8x8x128xf32>,
    } else {
    }
    return
  }
  func.func @transform_0(%arg0: i32, %arg1: i32) -> (i32, i32, i32) {
    %c0_i32 = arith.constant 0 : i32
    %c0_i32_0 = arith.constant 0 : i32
    %c0_i32_1 = arith.constant 0 : i32
    return %arg0, %c0_i32, %c0_i32_0 : i32, i32, i32
  }
  func.func @transform_1(%arg0: i32, %arg1: i32) -> (i32, i32, i32) {
    %c0_i32 = arith.constant 0 : i32
    %c0_i32_0 = arith.constant 0 : i32
    %c0_i32_1 = arith.constant 0 : i32
    return %arg1, %c0_i32, %c0_i32_0 : i32, i32, i32
  }
  func.func @transform_2(%arg0: i32, %arg1: i32) -> (i32, i32, i32) {
    %c0_i32 = arith.constant 0 : i32
    %c0_i32_0 = arith.constant 0 : i32
    %c0_i32_1 = arith.constant 0 : i32
    return %arg1, %c0_i32, %c0_i32_0 : i32, i32, i32
  }
  func.func @transform_3(%arg0: i32, %arg1: i32) -> (i32, i32, i32) {
    %c0_i32 = arith.constant 0 : i32
    %c0_i32_0 = arith.constant 0 : i32
    %c0_i32_1 = arith.constant 0 : i32
    return %arg1, %c0_i32, %c0_i32_0 : i32, i32, i32
  }
  func.func @transform_4(%arg0: i32, %arg1: i32) -> (i32, i32, i32) {
    %c0_i32 = arith.constant 0 : i32
    %c0_i32_0 = arith.constant 0 : i32
    %c0_i32_1 = arith.constant 0 : i32
    return %arg1, %c0_i32, %c0_i32_0 : i32, i32, i32
  }
  func.func @transform_5(%arg0: i32, %arg1: i32) -> (i32, i32, i32) {
    %c0_i32 = arith.constant 0 : i32
    %c0_i32_0 = arith.constant 0 : i32
    %c0_i32_1 = arith.constant 0 : i32
    return %arg1, %c0_i32, %c0_i32_0 : i32, i32, i32
  }
  func.func @transform_6(%arg0: i32, %arg1: i32) -> (i32, i32, i32) {
    %c0_i32 = arith.constant 0 : i32
    %c0_i32_0 = arith.constant 0 : i32
    %c0_i32_1 = arith.constant 0 : i32
    return %arg1, %c0_i32, %c0_i32_0 : i32, i32, i32
  }
  func.func @transform_7(%arg0: i32, %arg1: i32) -> (i32, i32, i32) {
    %c0_i32 = arith.constant 0 : i32
    %c0_i32_0 = arith.constant 0 : i32
    %c0_i32_1 = arith.constant 0 : i32
    return %arg1, %c0_i32, %c0_i32_0 : i32, i32, i32
  }
  func.func @transform_8(%arg0: i32, %arg1: i32) -> (i32, i32) {
    %c0_i32 = arith.constant 0 : i32
    %c0_i32_0 = arith.constant 0 : i32
    %c0_i32_1 = arith.constant 0 : i32
    return %c0_i32, %c0_i32_0 : i32, i32
  }
  func.func @transform_9(%arg0: i32, %arg1: i32) -> (i32, i32) {
    %c0_i32 = arith.constant 0 : i32
    %c0_i32_0 = arith.constant 0 : i32
    %c0_i32_1 = arith.constant 0 : i32
    return %c0_i32, %c0_i32_0 : i32, i32
  }
  func.func @transform_10(%arg0: i32, %arg1: i32) -> (i32, i32, i32) {
    %c0_i32 = arith.constant 0 : i32
    %c0_i32_0 = arith.constant 0 : i32
    %c0_i32_1 = arith.constant 0 : i32
    return %arg0, %c0_i32, %c0_i32_0 : i32, i32, i32
  }
}

</mosaic_0001>

<bundles_post_ra>
// kernel: pallas_forward.1
= control target key start
LH: loop header
LB: loop body
LE: loop exit
PB: predicated region body
PF: predicated region fallthrough
CT: control target
= control target key end

     0   :  { %s9558_s13 = smov 0   ;;  %s9560_s14 = smov 0   ;;  %s11630_s0 = inlined_call_operand.vmem [shape: f32[8,8,64], index: 0, kind: input, shape index: {}]   ;;  %s11631_s1 = inlined_call_operand.vmem [shape: bf16[2,64,192], index: 1, kind: input, shape index: {}]   ;;  %s11632_s2 = inlined_call_operand.vmem [shape: f32[2,1,192], index: 2, kind: input, shape index: {}]   ;;  %s11633_s3 = inlined_call_operand.vmem [shape: bf16[2,64,64], index: 3, kind: input, shape index: {}]   ;;  %s11634_s4 = inlined_call_operand.vmem [shape: bf16[2,64,2048], index: 4, kind: input, shape index: {}]   ;;  %s11635_s5 = inlined_call_operand.vmem [shape: f32[2,1,2048], index: 5, kind: input, shape index: {}]   ;;  %s11636_s6 = inlined_call_operand.vmem [shape: bf16[2,2048,64], index: 6, kind: input, shape index: {}]   ;;  %s11637_s7 = inlined_call_operand.vmem [shape: f32[2,6,64], index: 7, kind: input, shape index: {}]   ;;  %s11638_s8 = inlined_call_operand.vmem [shape: bf16[64,128], index: 8, kind: input, shape index: {}]   ;;  %s11639_s9 = inlined_call_operand.vmem [shape: f32[1,128], index: 9, kind: input, shape index: {}]   ;;  %s11640_s10 = inlined_call_operand.vmem [shape: f32[8,8,128], index: 10, kind: output, shape index: {}]  }
   0x1   :  { %11653 = sst [smem:[#allocation29_spill]] %s11631_s1  ;;  %s9562_s15 = smov 0  }
   0x2   :  { %11654 = sst [smem:[#allocation30_spill]] %s11632_s2 }
   0x3   :  { %11655 = sst [smem:[#allocation31_spill]] %s11633_s3 }
   0x4 LB: > { %s29_s16 = sadd.s32 1, %s9486_s14  ;;  %p7829_p0 = scmp.ge.s32.totalorder %s9490_s15, 1  ;;  %s9490_s15 = sphi %s9562_s15, %s20_s15   ;;  %s9486_s14 = sphi %s9560_s14, %s11717_s14   ;;  %s9482_s13 = sphi %s9558_s13, %s11716_s13  }
   0x5   : > { %p30_p1 = scmp.ge.s32.totalorder %s29_s16, 2  ;;  %p392_p2 = scmp.lt.s32.totalorder %s9490_s15, 3 }
   0x7   : > { %s11719_s16 = smov (%p30_p1, %s29_s16), 0  ;;  %p393_p3 = pnand %p7829_p0, %p392_p2 }
   0x8   : > { %11656 = sst [smem:[#allocation3_spill]] %s11719_s16 }
   0x9   : > { %396 = sbr.rel (%p393_p3) target bundleno = 4638 (0x121e), region = 60 }
   0xe   : > { %p468_p4 = scmp.lt.s32.totalorder %s9482_s13, 1  ;;  %v507_v0 = vlaneseq  ;;  %s11657_s1 = sld [smem:[#allocation29_spill]]  ;;  %v9492_v3 = vmov -1e+30  }
   0xf   : > { %s11658_s2 = sld [smem:[#allocation30_spill]]  ;;  %p7841_p5 = scmp.ne.s32.totalorder %s9482_s13, 0 }
  0x10   : > { %s469_s17 = scalar_select %p468_p4, %s9482_s13, 1  ;;  %v9580_v1 = vshrl.u32 %v507_v0, 7  ;;  %v510_v2 = vand.u32 127, %v507_v0 }
  0x11   : > { %s11659_s3 = sld [smem:[#allocation31_spill]] }
  0x12   : > { %s8164_s18 = sshll.u32 %s469_s17, 6  ;;  %s7832_s19 = sshll.u32 %s469_s17, 1  ;;  %vm511_vm0 = vcmp.le.s32.totalorder %v510_v2, %v9580_v1 }
  0x13   : > { %v9593_v4 = vsel %vm511_vm0, 0.0, %v9492_v3  ;;  %s8165_s26 = sshll.u32 %s469_s17, 5  ;;  %s8166_s27 = sshll.u32 %s469_s17, 9 }
  0x14   : > { %s9586_s22 = scalar_lea.vmem %s11657_s1, %s8164_s18  ;;  %s9603_s18 = scalar_lea.vmem %s11634_s4, %s8166_s27 }
  0x15   : > { %s9591_s25 = scalar_lea.vmem %s11658_s2, %s7832_s19  ;;  %s7837_s20 = sshll.u32 %s469_s17, 4 }
  0x16   : > { %s8167_s21 = sshll.u32 %s469_s17, 10  ;;  %s9608_s24 = scalar_lea.vmem %s11635_s5, %s7837_s20 }
  0x17   : > { %s9598_s30 = scalar_lea.vmem %s11659_s3, %s8165_s26  ;;  %s9613_s16 = scalar_lea.vmem %s11636_s6, %s8167_s21 }
  0x18   : > { %s7840_s28 = sshll.u32 %s469_s17, 3  ;;  %516 = sbr.rel (%p7841_p5) target bundleno = 34 (0x22), region = 64 }
  0x19   : > { %s9618_s3 = scalar_lea.vmem %s11637_s7, %s7840_s28 }
  0x1d   : > { %v517_v5 = vld [vmem:[%s11630_s0] sm:$0xff]  ;;  %vm525_vm1 = vcmask 523264   ;;  %v518_v6 = vld [vmem:[%s11630_s0 + $0x8] sm:$0xff]  ;;  %v519_v7 = vld [vmem:[%s11630_s0 + $0x10] sm:$0xff] }
  0x1e   : > { %526 = vst.msk [vmem:[#allocation2] sm:$0xff] %vm525_vm1, %v517_v5  ;;  %527 = vst.msk [vmem:[#allocation2 + $0x8] sm:$0xff] %vm525_vm1, %v518_v6  ;;  %v520_v8 = vld [vmem:[%s11630_s0 + $0x18] sm:$0xff]  ;;  %v521_v9 = vld [vmem:[%s11630_s0 + $0x20] sm:$0xff] }
  0x1f   : > { %528 = vst.msk [vmem:[#allocation2 + $0x10] sm:$0xff] %vm525_vm1, %v519_v7  ;;  %v522_v10 = vld [vmem:[%s11630_s0 + $0x28] sm:$0xff]  ;;  %529 = vst.msk [vmem:[#allocation2 + $0x18] sm:$0xff] %vm525_vm1, %v520_v8  ;;  %v523_v11 = vld [vmem:[%s11630_s0 + $0x30] sm:$0xff] }
  0x20   : > { %530 = vst.msk [vmem:[#allocation2 + $0x20] sm:$0xff] %vm525_vm1, %v521_v9  ;;  %531 = vst.msk [vmem:[#allocation2 + $0x28] sm:$0xff] %vm525_vm1, %v522_v10  ;;  %v524_v12 = vld [vmem:[%s11630_s0 + $0x38] sm:$0xff] }
  0x21   : > { %532 = vst.msk [vmem:[#allocation2 + $0x30] sm:$0xff] %vm525_vm1, %v523_v11  ;;  %533 = vst.msk [vmem:[#allocation2 + $0x38] sm:$0xff] %vm525_vm1, %v524_v12 }
  0x22 PF: > { %v9151_v13 = vld [vmem:[%s9586_s22 + $0x34] ss:$8 sps:$4 sm:$0xff]   ;;  %v9153_v14 = vld [vmem:[%s9586_s22 + $0x30] ss:$8 sps:$4 sm:$0xff]   ;;  %v11641_v15 = vmov 0   ;;  %vm607_vm2 = vcmask 523264  }
  0x23   : > { %652 = vmatprep.mubr.bf16.mxu0 %v11641_v15  ;;  %628 = vmatprep.subr.bf16.mxu0 %v9151_v13  ;;  %v9154_v16 = vld [vmem:[%s9586_s22 + $0x24] ss:$8 sps:$4 sm:$0xff]   ;;  %v9156_v17 = vld [vmem:[%s9586_s22 + $0x20] ss:$8 sps:$4 sm:$0xff]   ;;  %v9157_v18 = vld [vmem:[%s9586_s22 + $0x14] ss:$8 sps:$4 sm:$0xff]  }
  0x24   : > { %629 = vmatpush1.bf16.msra.mxu0 %v9153_v14  ;;  %v9159_v19 = vld [vmem:[%s9586_s22 + $0x10] ss:$8 sps:$4 sm:$0xff]   ;;  %v9160_v20 = vld [vmem:[%s9586_s22 + $0x4] ss:$8 sps:$4 sm:$0xff]   ;;  %v9162_v21 = vld [vmem:[%s9586_s22] ss:$8 sps:$4 sm:$0xff]  }
  0x25   : > { %630 = vmatprep.subr.bf16.mxu0 %v9154_v16  ;;  %v534_v22 = vld [vmem:[#allocation2] sm:$0xff]  ;;  %v535_v23 = vld [vmem:[#allocation2 + $0x8] sm:$0xff]  ;;  %v9494_v34 = vmov 0.0   ;;  %v9664_v35 = vsub.s32 0, %v9580_v1  ;;  %vm9495_vm3 = vmmov 0   ;;  %v9677_v43 = vsub.s32 1, %v9580_v1 }
  0x26   : > { %v543_v24 = vpack.c.bf16 %v535_v23, %v534_v22  ;;  %v536_v25 = vld [vmem:[#allocation2 + $0x10] sm:$0xff]  ;;  %v537_v26 = vld [vmem:[#allocation2 + $0x18] sm:$0xff]  ;;  %8632 = vmatprep.subr.bf16.mxu1 %v9494_v34  ;;  %v555_v36 = vld [vmem:[%s9591_s25] sm:$0x3]  ;;  %8634 = vmatprep.mubr.msk.bf16.mxu1 %vm9495_vm3, %v9494_v34  ;;  %s9496_s22 = smov 64   ;;  %vm712_vm4 = vcmask 130048  }
  0x27   : > { %v544_v27 = vpack.c.bf16 %v537_v26, %v536_v25  ;;  %v538_v28 = vld [vmem:[#allocation2 + $0x20] sm:$0xff]  ;;  %v539_v29 = vld [vmem:[#allocation2 + $0x28] sm:$0xff]  ;;  %v560_v37 = vrot.slane %v555_v36, %v9664_v35  ;;  %v9686_v48 = vrot.slane %v555_v36, %v9677_v43  ;;  %vm1202_vm5 = vcmask 1043456   ;;  %s9497_s25 = smov 48   ;;  %s9498_s20 = smov 112  }
  0x28   : > { %631 = vmatpush1.bf16.msra.mxu0 %v9156_v17  ;;  %v545_v30 = vpack.c.bf16 %v539_v29, %v538_v28  ;;  %v540_v31 = vld [vmem:[#allocation2 + $0x30] sm:$0xff]  ;;  %v541_v32 = vld [vmem:[#allocation2 + $0x38] sm:$0xff]  ;;  %vm1102_vm6 = vcmask 64512   ;;  %s9499_s1 = smov 32   ;;  %s9500_s2 = smov 96   ;;  %vm4320_vm7 = vcmask 261120  }
  0x29   : > { %632 = vmatprep.subr.bf16.mxu0 %v9157_v18  ;;  %v546_v33 = vpack.c.bf16 %v541_v32, %v540_v31  ;;  %s9501_s17 = smov 16   ;;  %s9502_s21 = smov 80   ;;  %vm4329_vm8 = vcmask 392192  }
  0x2a   : > { %p8150_p6 = scmp.ne.s32.totalorder %s9482_s13, 1 }
  0x2c   : > { %633 = vmatpush1.bf16.msra.mxu0 %v9159_v19 }
  0x2d   : > { %634 = vmatprep.subr.bf16.mxu0 %v9160_v20 }
  0x30   : > { %635 = vmatpush1.bf16.msra.mxu0 %v9162_v21 }
  0x31   : > { %8662 = vmatprep.subr.bf16.mxu0 %v9494_v34 }
  0x33   : > { %7850 = vmatmul.mubr.msk.bf16.vlgmr.msra.gmra.mxu0 %vm607_vm2, %v543_v24 }
  0x34   : > { %662 = vmatprep.mubr.bf16.mxu0 %v11641_v15 }
  0x3b   : > { %7851 = vmatmul.mubr.msk.bf16.gmra.mxu0 %vm607_vm2, %v544_v27 }
  0x3c   : > { %672 = vmatprep.mubr.bf16.mxu0 %v11641_v15 }
  0x43   : > { %7852 = vmatmul.mubr.msk.bf16.gmra.mxu0 %vm607_vm2, %v545_v30 }
  0x44   : > { %682 = vmatprep.mubr.bf16.mxu0 %v11641_v15 }
  0x4b   : > { %7853 = vmatmul.mubr.msk.bf16.gmra.mxu0 %vm607_vm2, %v546_v33 }
  0x4c   : > { %8664 = vmatprep.mubr.msk.bf16.mxu0 %vm9495_vm3, %v9494_v34 }
  0xf3   : > { %v654_v38 = vpop.f32.mrf.mxu0 }
  0xf4   : > { %v655_v39 = vadd.f32 %v654_v38, %v560_v37 }
  0xf5   : > { %v9672_v40 = vpop.f32.mrf.mxu0 }
  0xf6   : > { %v9674_v41 = vpack.c.bf16 %v655_v39, %v655_v39  ;;  %v657_v32 = vadd.f32 %v9672_v40, %v9686_v48 }
  0xf7   : > { %v658_v42 = vpop.f32.mrf.mxu0 }
  0xf8   : > { %v659_v44 = vadd.f32 %v658_v42, %v560_v37  ;;  %710 = vrot.lane.b32.xlu0 %v9674_v41, %s9496_s22  ;;  %v9780_v33 = vpack.c.bf16 %v657_v32, %v657_v32 }
  0xf9   : > { %v9681_v45 = vpop.f32.mrf.mxu0 }
  0xfa   : > { %v9683_v46 = vpack.c.bf16 %v659_v44, %v659_v44  ;;  %v661_v25 = vadd.f32 %v9681_v45, %v9686_v48  ;;  %v1204_v36 = vsel %vm1202_vm5, %v9780_v33, 0 }
  0xfb   : > { %v664_v47 = vpop.f32.mrf.mxu0 }
  0xfc   : > { %v665_v49 = vadd.f32 %v664_v47, %v560_v37  ;;  %760 = vrot.lane.b32.xlu0 %v9683_v46, %s9496_s22  ;;  %v9758_v28 = vpack.c.bf16 %v661_v25, %v661_v25 }
  0xfd   : > { %v666_v50 = vpop.f32.mrf.mxu0 }
  0xfe   : > { %v9690_v51 = vpack.c.bf16 %v665_v49, %v665_v49  ;;  %v9693_v52 = vadd.f32 %v666_v50, %v9686_v48  ;;  %v1250_v30 = vsel %vm1202_vm5, %v9758_v28, 0 }
  0xff   : > { %v668_v53 = vpop.f32.mrf.mxu0 }
 0x100   : > { %v669_v54 = vadd.f32 %v668_v53, %v560_v37  ;;  %809 = vrot.lane.b32.xlu1 %v9690_v51, %s9496_s22 }
 0x101   : > { %v9697_v55 = vpop.f32.mrf.mxu0 }
 0x102   : > { %v9699_v56 = vpack.c.bf16 %v669_v54, %v669_v54 }
 0x103   : > { %v674_v57 = vpop.f32.mrf.mxu0 }
 0x104   : > { %v675_v58 = vadd.f32 %v674_v57, %v560_v37  ;;  %858 = vrot.lane.b32.xlu1 %v9699_v56, %s9496_s22 }
 0x105   : > { %v676_v59 = vpop.f32.mrf.mxu0 }
 0x106   : > { %v9703_v60 = vpack.c.bf16 %v675_v58, %v675_v58  ;;  %v9706_v61 = vadd.f32 %v676_v59, %v9686_v48 }
 0x107   : > { %v678_v62 = vpop.f32.mrf.mxu0 }
 0x108   : > { %v679_v63 = vadd.f32 %v678_v62, %v560_v37  ;;  %907 = vrot.lane.b32.xlu0 %v9703_v60, %s9496_s22 }
 0x109   : > { %v9710_v0 = vpop.f32.mrf.mxu0 }
 0x10a   : > { %v9712_v2 = vpack.c.bf16 %v679_v63, %v679_v63 }
 0x10b   : > { %v684_v3 = vpop.f32.mrf.mxu0 }
 0x10c   : > { %v685_v5 = vadd.f32 %v684_v3, %v560_v37  ;;  %956 = vrot.lane.b32.xlu1 %v9712_v2, %s9496_s22 }
 0x10d   : > { %v686_v6 = vpop.f32.mrf.mxu0 }
 0x10e   : > { %v9716_v7 = vpack.c.bf16 %v685_v5, %v685_v5  ;;  %v9719_v8 = vadd.f32 %v686_v6, %v9686_v48 }
 0x10f   : > { %v688_v9 = vpop.f32.mrf.mxu0 }
 0x110   : > { %v689_v10 = vadd.f32 %v688_v9, %v560_v37  ;;  %1005 = vrot.lane.b32.xlu0 %v9716_v7, %s9496_s22 }
 0x111   : > { %v9794_v59 = vpop.f32.mrf.mxu0 }
 0x112   : > { %v9723_v11 = vpack.c.bf16 %v689_v10, %v689_v10 }
 0x114   : > { %1054 = vrot.lane.b32.xlu1 %v9723_v11, %s9496_s22 }
 0x16a   : > { %v711_v12 = vpop.permute.xlu0 %710 }
 0x16b   : > { %v717_v13 = vsel %vm712_vm4, %v711_v12, 0 }
 0x16c   : > { %8633 = vmatpush3.bf16.xpose.msra.mxu1 %v717_v13 }
 0x16d   : > { %8638 = vmatprep.subr.bf16.mxu1 %v9494_v34 }
 0x16e   : > { %v761_v14 = vpop.permute.xlu0 %760 }
 0x16f   : > { %v766_v17 = vsel %vm712_vm4, %v761_v14, 0 }
 0x172   : > { %v810_v16 = vpop.permute.xlu1 %809 }
 0x173   : > { %8635 = vmatmul.mubr.msk.bf16.vlgmr.msra.gmra.mxu1 %vm712_vm4, %v9674_v41  ;;  %v815_v19 = vsel %vm712_vm4, %v810_v16, 0 }
 0x174   : > { %8639 = vmatpush3.bf16.xpose.msra.mxu1 %v766_v17  ;;  %8640 = vmatprep.mubr.msk.bf16.mxu1 %vm9495_vm3, %v9494_v34 }
 0x175   : > { %8644 = vmatprep.subr.bf16.mxu1 %v9494_v34 }
 0x176   : > { %v859_v18 = vpop.permute.xlu1 %858 }
 0x177   : > { %v864_v22 = vsel %vm712_vm4, %v859_v18, 0 }
 0x17a   : > { %v908_v24 = vpop.permute.xlu0 %907 }
 0x17b   : > { %8641 = vmatmul.mubr.msk.bf16.vlgmr.msra.gmra.mxu1 %vm712_vm4, %v9683_v46  ;;  %v913_v27 = vsel %vm712_vm4, %v908_v24, 0 }
 0x17c   : > { %8645 = vmatpush3.bf16.xpose.msra.mxu1 %v815_v19  ;;  %8646 = vmatprep.mubr.msk.bf16.mxu1 %vm9495_vm3, %v9494_v34 }
 0x17d   : > { %8650 = vmatprep.subr.bf16.mxu1 %v9494_v34 }
 0x17e   : > { %v957_v20 = vpop.permute.xlu1 %956 }
 0x17f   : > { %v962_v21 = vsel %vm712_vm4, %v957_v20, 0 }
 0x180   : > { %8663 = vmatpush3.bf16.xpose.msra.mxu0 %v962_v21 }
 0x181   : > { %8674 = vmatprep.subr.bf16.mxu0 %v9494_v34 }
 0x182   : > { %v1006_v29 = vpop.permute.xlu0 %1005 }
 0x183   : > { %8647 = vmatmul.mubr.msk.bf16.vlgmr.msra.gmra.mxu1 %vm712_vm4, %v9690_v51  ;;  %v1011_v31 = vsel %vm712_vm4, %v1006_v29, 0 }
 0x184   : > { %8651 = vmatpush3.bf16.xpose.msra.mxu1 %v864_v22  ;;  %8652 = vmatprep.mubr.msk.bf16.mxu1 %vm9495_vm3, %v9494_v34 }
 0x185   : > { %8656 = vmatprep.subr.bf16.mxu1 %v9494_v34 }
 0x186   : > { %v1055_v23 = vpop.permute.xlu1 %1054 }
 0x187   : > { %v1060_v26 = vsel %vm712_vm4, %v1055_v23, 0  ;;  %8665 = vmatmul.mubr.msk.bf16.vlgmr.msra.gmra.mxu0 %vm712_vm4, %v9712_v2 }
 0x188   : > { %8675 = vmatpush3.bf16.xpose.msra.mxu0 %v1060_v26  ;;  %8676 = vmatprep.mubr.msk.bf16.mxu0 %vm9495_vm3, %v9494_v34 }
 0x189   : > { %8686 = vmatprep.subr.bf16.mxu0 %v9494_v34 }
 0x18b   : > { %8653 = vmatmul.mubr.msk.bf16.vlgmr.msra.gmra.mxu1 %vm712_vm4, %v9699_v56 }
 0x18c   : > { %8657 = vmatpush3.bf16.xpose.msra.mxu1 %v913_v27  ;;  %8658 = vmatprep.mubr.msk.bf16.mxu1 %vm9495_vm3, %v9494_v34 }
 0x18d   : > { %8668 = vmatprep.subr.bf16.mxu1 %v9494_v34 }
 0x18f   : > { %8677 = vmatmul.mubr.msk.bf16.vlgmr.msra.gmra.mxu0 %vm712_vm4, %v9723_v11 }
 0x190   : > { %8687 = vmatpush3.bf16.msra.mxu0 %v1250_v30  ;;  %8688 = vmatprep.mubr.msk.bf16.mxu0 %vm9495_vm3, %v9494_v34 }
 0x191   : > { %8698 = vmatprep.subr.bf16.mxu0 %v9494_v34 }
 0x193   : > { %8659 = vmatmul.mubr.msk.bf16.vlgmr.msra.gmra.mxu1 %vm712_vm4, %v9703_v60 }
 0x194   : > { %8669 = vmatpush3.bf16.xpose.msra.mxu1 %v1011_v31  ;;  %8670 = vmatprep.mubr.msk.bf16.mxu1 %vm9495_vm3, %v9494_v34 }
 0x195   : > { %8680 = vmatprep.subr.bf16.mxu1 %v9494_v34 }
 0x19b   : > { %8671 = vmatmul.mubr.msk.bf16.vlgmr.msra.gmra.mxu1 %vm712_vm4, %v9716_v7 }
 0x19c   : > { %8681 = vmatpush3.bf16.msra.mxu1 %v1204_v36  ;;  %8682 = vmatprep.mubr.msk.bf16.mxu1 %vm9495_vm3, %v9494_v34 }
 0x19d   : > { %8692 = vmatprep.subr.bf16.mxu1 %v9494_v34 }
 0x233   : > { %v753_v37 = vpop.f32.mrf.mxu1 }
 0x234   : > { %v754_v38 = vadd.f32 %v753_v37, %v9593_v4 }
 0x235   : > { %v8636_v39 = vpop.f32.mrf.mxu1 }
 0x236   : > { %v1103_v40 = vsel %vm1102_vm6, %v754_v38, -inf }
 0x237   : > { %1104 = vmax.xlane.f32.xlu0 %v1103_v40  ;;  %v756_v42 = vpop.f32.mrf.mxu1 }
 0x239   : > { %v8637_v44 = vpop.f32.mrf.mxu1 }
 0x23b   : > { %v802_v45 = vpop.f32.mrf.mxu1 }
 0x23c   : > { %v803_v47 = vadd.f32 %v802_v45, %v9593_v4 }
 0x23d   : > { %v8642_v49 = vpop.f32.mrf.mxu1 }
 0x23e   : > { %v1106_v50 = vsel %vm1102_vm6, %v803_v47, -inf }
 0x23f   : > { %1107 = vmax.xlane.f32.xlu1 %v1106_v50  ;;  %v805_v53 = vpop.f32.mrf.mxu1 }
 0x241   : > { %v8643_v54 = vpop.f32.mrf.mxu1 }
 0x243   : > { %v851_v57 = vpop.f32.mrf.mxu1 }
 0x244   : > { %v852_v58 = vadd.f32 %v851_v57, %v9593_v4 }
 0x245   : > { %v8648_v62 = vpop.f32.mrf.mxu1 }
 0x246   : > { %v1109_v63 = vsel %vm1102_vm6, %v852_v58, -inf }
 0x247   : > { %v998_v3 = vpop.f32.mrf.mxu0  ;;  %1110 = vmax.xlane.f32.xlu0 %v1109_v63  ;;  %v854_v5 = vpop.f32.mrf.mxu1 }
 0x248   : > { %v999_v17 = vadd.f32 %v998_v3, %v9593_v4 }
 0x249   : > { %v8649_v6 = vpop.f32.mrf.mxu1  ;;  %v8666_v9 = vpop.f32.mrf.mxu0 }
 0x24a   : > { %v1118_v24 = vsel %vm1102_vm6, %v999_v17, -inf }
 0x24b   : > { %v900_v10 = vpop.f32.mrf.mxu1  ;;  %v1001_v12 = vpop.f32.mrf.mxu0 }
 0x24c   : > { %v901_v13 = vadd.f32 %v900_v10, %v9593_v4 }
 0x24d   : > { %v8654_v14 = vpop.f32.mrf.mxu1  ;;  %v8667_v16 = vpop.f32.mrf.mxu0 }
 0x24e   : > { %v1112_v18 = vsel %vm1102_vm6, %v901_v13, -inf }
 0x24f   : > { %v1096_v19 = vpop.f32.mrf.mxu0  ;;  %1113 = vmax.xlane.f32.xlu0 %v1112_v18  ;;  %v903_v20 = vpop.f32.mrf.mxu1 }
 0x250   : > { %v1097_v23 = vadd.f32 %v1096_v19, %v9593_v4 }
 0x251   : > { %v8655_v21 = vpop.f32.mrf.mxu1  ;;  %v8678_v22 = vpop.f32.mrf.mxu0 }
 0x252   : > { %v1124_v31 = vsel %vm1102_vm6, %v1097_v23, -inf }
 0x253   : > { %v1099_v25 = vpop.f32.mrf.mxu0  ;;  %1119 = vmax.xlane.f32.xlu0 %v1118_v24  ;;  %v949_v26 = vpop.f32.mrf.mxu1 }
 0x254   : > { %v950_v27 = vadd.f32 %v949_v26, %v9593_v4 }
 0x255   : > { %v8660_v29 = vpop.f32.mrf.mxu1  ;;  %v8679_v30 = vpop.f32.mrf.mxu0 }
 0x256   : > { %v1115_v32 = vsel %vm1102_vm6, %v950_v27, -inf }
 0x257   : > { %1125 = vmax.xlane.f32.xlu0 %v1124_v31  ;;  %1116 = vmax.xlane.f32.xlu1 %v1115_v32  ;;  %v952_v36 = vpop.f32.mrf.mxu1 }
 0x259   : > { %v8661_v37 = vpop.f32.mrf.mxu1 }
 0x25b   : > { %v1047_v39 = vpop.f32.mrf.mxu1 }
 0x25c   : > { %v9806_v40 = vadd.f32 %v1047_v39, %v9593_v4 }
 0x25d   : > { %v8672_v42 = vpop.f32.mrf.mxu1 }
 0x25e   : > { %v1121_v44 = vsel %vm1102_vm6, %v9806_v40, -inf }
 0x25f   : > { %1122 = vmax.xlane.f32.xlu1 %v1121_v44  ;;  %v1050_v45 = vpop.f32.mrf.mxu1 }
 0x261   : > { %v8673_v49 = vpop.f32.mrf.mxu1 }
 0x2c0   : > { %v1105_v50 = vpop.xlane.xlu0 %1104 }
 0x2c1   : > { %v1127_v53 = vsub.f32 %v754_v38, %v1105_v50 }
 0x2c3   : > { %v1135_v54 = vmul.f32 1.442695, %v1127_v53 }
 0x2c5   : > { %9295 = vpow2.f32 %v1135_v54  ;;  %v9873_v54 = vpack.c.bf16 %v9693_v52, %v9693_v52 }
 0x2c8   : > { %v1108_v57 = vpop.xlane.xlu1 %1107 }
 0x2c9   : > { %v1128_v62 = vsub.f32 %v803_v47, %v1108_v57 }
 0x2cb   : > { %v1137_v63 = vmul.f32 1.442695, %v1128_v62 }
 0x2cd   : > { %9297 = vpow2.f32 %v1137_v63 }
 0x2d0   : > { %v1111_v3 = vpop.xlane.xlu0 %1110 }
 0x2d1   : > { %v1129_v5 = vsub.f32 %v852_v58, %v1111_v3  ;;  %v671_v3 = vadd.f32 %v9697_v55, %v9686_v48 }
 0x2d2   : > { %v9810_v6 = vpop.eup %9295 }
 0x2d3   : > { %v1139_v9 = vmul.f32 1.442695, %v1129_v5  ;;  %v1151_v10 = vsel %vm1102_vm6, %v9810_v6, 0.0  ;;  %v1296_v5 = vsel %vm1202_vm5, %v9873_v54, 0 }
 0x2d4   : > { %1152 = vadd.xlane.f32.xlu1 %v1151_v10 }
 0x2d5   : > { %9299 = vpow2.f32 %v1139_v9 }
 0x2d8   : > { %v1114_v12 = vpop.xlane.xlu0 %1113 }
 0x2d9   : > { %v1130_v14 = vsub.f32 %v901_v13, %v1114_v12 }
 0x2da   : > { %v9814_v16 = vpop.eup %9297 }
 0x2db   : > { %v1141_v38 = vmul.f32 1.442695, %v1130_v14  ;;  %v1154_v47 = vsel %vm1102_vm6, %v9814_v16, 0.0 }
 0x2dc   : > { %1155 = vadd.xlane.f32.xlu0 %v1154_v47  ;;  %v1120_v18 = vpop.xlane.xlu0 %1119 }
 0x2dd   : > { %9301 = vpow2.f32 %v1141_v38  ;;  %v1132_v58 = vsub.f32 %v999_v17, %v1120_v18  ;;  %v9903_v38 = vpack.c.bf16 %v9706_v61, %v9706_v61 }
 0x2df   : > { %v1145_v19 = vmul.f32 1.442695, %v1132_v58 }
 0x2e0   : > { %v1126_v20 = vpop.xlane.xlu0 %1125  ;;  %v1117_v31 = vpop.xlane.xlu1 %1116 }
 0x2e1   : > { %9303 = vpow2.f32 %v1145_v19  ;;  %v1134_v21 = vsub.f32 %v1097_v23, %v1126_v20  ;;  %v1131_v32 = vsub.f32 %v950_v27, %v1117_v31  ;;  %v681_v19 = vadd.f32 %v9710_v0, %v9686_v48 }
 0x2e2   : > { %v9818_v22 = vpop.eup %9299  ;;  %v1388_v20 = vsel %vm1202_vm5, %v9903_v38, 0 }
 0x2e3   : > { %v1149_v24 = vmul.f32 1.442695, %v1134_v21  ;;  %v1157_v13 = vsel %vm1102_vm6, %v9818_v22, 0.0  ;;  %v1143_v36 = vmul.f32 1.442695, %v1131_v32  ;;  %v9918_v21 = vpack.c.bf16 %v681_v19, %v681_v19 }
 0x2e4   : > { %1158 = vadd.xlane.f32.xlu1 %v1157_v13  ;;  %v691_v13 = vadd.f32 %v9794_v59, %v9686_v48 }
 0x2e5   : > { %9305 = vpow2.f32 %v1149_v24 }
 0x2e6   : > { %9307 = vpow2.f32 %v1143_v36 }
 0x2e8   : > { %v1123_v39 = vpop.xlane.xlu1 %1122 }
 0x2e9   : > { %v1133_v42 = vsub.f32 %v9806_v40, %v1123_v39 }
 0x2ea   : > { %v9822_v25 = vpop.eup %9301 }
 0x2eb   : > { %v1160_v26 = vsel %vm1102_vm6, %v9822_v25, 0.0  ;;  %v1147_v44 = vmul.f32 1.442695, %v1133_v42 }
 0x2ec   : > { %1161 = vadd.xlane.f32.xlu0 %v1160_v26  ;;  %v1434_v26 = vsel %vm1202_vm5, %v9918_v21, 0 }
 0x2ed   : > { %9309 = vpow2.f32 %v1147_v44  ;;  %v9946_v44 = vpack.c.bf16 %v9719_v8, %v9719_v8 }
 0x2ee   : > { %v9826_v29 = vpop.eup %9303 }
 0x2ef   : > { %v1166_v17 = vsel %vm1102_vm6, %v9826_v29, 0.0 }
 0x2f0   : > { %1167 = vadd.xlane.f32.xlu0 %v1166_v17 }
 0x2f2   : > { %v9830_v23 = vpop.eup %9305 }
 0x2f3   : > { %v1172_v30 = vsel %vm1102_vm6, %v9830_v23, 0.0  ;;  %v9842_v37 = vpop.eup %9307 }
 0x2f4   : > { %1173 = vadd.xlane.f32.xlu0 %v1172_v30  ;;  %v1163_v27 = vsel %vm1102_vm6, %v9842_v37, 0.0  ;;  %v9930_v30 = vpack.c.bf16 %v691_v13, %v691_v13 }
 0x2f5   : > { %1570 = vrot.lane.b32.xlu1 %v9674_v41, %s9497_s25 }
 0x2f6   : > { %v1526_v48 = vsel %vm1202_vm5, %v9930_v30, 0 }
 0x2fa   : > { %v9859_v45 = vpop.eup %9309 }
 0x2fb   : > { %v1169_v49 = vsel %vm1102_vm6, %v9859_v45, 0.0 }
 0x30a   : > { %1620 = vrot.lane.b32.xlu0 %v9683_v46, %s9497_s25 }
 0x30e   : > { %1670 = vrot.lane.b32.xlu0 %v9690_v51, %s9497_s25 }
 0x312   : > { %1668 = vrot.lane.b32.xlu0 %v9690_v51, %s9498_s20 }
 0x316   : > { %1770 = vrot.lane.b32.xlu0 %v9703_v60, %s9497_s25 }
 0x319   : > { %1164 = vadd.xlane.f32.xlu1 %v1163_v27 }
 0x31a   : > { %1768 = vrot.lane.b32.xlu0 %v9703_v60, %s9498_s20 }
 0x31e   : > { %1870 = vrot.lane.b32.xlu0 %v9716_v7, %s9497_s25 }
 0x322   : > { %1868 = vrot.lane.b32.xlu0 %v9716_v7, %s9498_s20 }
 0x326   : > { %2114 = vrot.lane.b32.xlu0 %v9758_v28, %s9498_s20 }
 0x32a   : > { %1568 = vrot.lane.b32.xlu1 %v9674_v41, %s9498_s20 }
 0x34e   : > { %1170 = vadd.xlane.f32.xlu1 %v1169_v49 }
 0x35d   : > { %v1153_v50 = vpop.xlane.xlu1 %1152 }
 0x35e   : > { %9311 = vrcp.f32 %v1153_v50  ;;  %v1480_v50 = vsel %vm1202_vm5, %v9946_v44, 0 }
 0x35f   : > { %1618 = vrot.lane.b32.xlu1 %v9683_v46, %s9498_s20 }
 0x363   : > { %1720 = vrot.lane.b32.xlu1 %v9699_v56, %s9497_s25 }
 0x365   : > { %v1156_v53 = vpop.xlane.xlu0 %1155 }
 0x366   : > { %9313 = vrcp.f32 %v1156_v53 }
 0x367   : > { %1718 = vrot.lane.b32.xlu1 %v9699_v56, %s9498_s20 }
 0x36b   : > { %v9312_v40 = vpop.eup %9311  ;;  %1820 = vrot.lane.b32.xlu1 %v9712_v2, %s9497_s25 }
 0x36c   : > { %v1183_v57 = vmul.f32 %v9312_v40, %v9810_v6  ;;  %v9888_v6 = vpack.c.bf16 %v671_v3, %v671_v3 }
 0x36d   : > { %v1159_v62 = vpop.xlane.xlu1 %1158 }
 0x36e   : > { %9315 = vrcp.f32 %v1159_v62  ;;  %v1191_v63 = vpack.c.bf16 %v1183_v57, %v1183_v57  ;;  %v1342_v12 = vsel %vm1202_vm5, %v9888_v6, 0 }
 0x36f   : > { %1818 = vrot.lane.b32.xlu1 %v9712_v2, %s9498_s20 }
 0x370   : > { %8683 = vmatmul.mubr.msk.bf16.vlgmr.msra.gmra.mxu1 %vm1102_vm6, %v1191_v63 }
 0x371   : > { %8693 = vmatpush3.bf16.msra.mxu1 %v1296_v5  ;;  %8694 = vmatprep.mubr.msk.bf16.mxu1 %vm9495_vm3, %v9494_v34  ;;  %v1571_v27 = vpop.permute.xlu1 %1570 }
 0x372   : > { %8704 = vmatprep.subr.bf16.mxu1 %v9494_v34 }
 0x373   : > { %v9314_v52 = vpop.eup %9313  ;;  %1920 = vrot.lane.b32.xlu1 %v9723_v11, %s9497_s25 }
 0x374   : > { %v1184_v9 = vmul.f32 %v9314_v52, %v9814_v16 }
 0x375   : > { %v1162_v55 = vpop.xlane.xlu0 %1161 }
 0x376   : > { %9317 = vrcp.f32 %v1162_v55  ;;  %v1192_v10 = vpack.c.bf16 %v1184_v9, %v1184_v9 }
 0x377   : > { %1918 = vrot.lane.b32.xlu1 %v9723_v11, %s9498_s20 }
 0x378   : > { %8689 = vmatmul.mubr.msk.bf16.vlgmr.msra.gmra.mxu0 %vm1102_vm6, %v1192_v10 }
 0x379   : > { %8699 = vmatpush3.bf16.msra.mxu0 %v1342_v12  ;;  %v1168_v14 = vpop.xlane.xlu0 %1167  ;;  %8700 = vmatprep.mubr.msk.bf16.mxu0 %vm9495_vm3, %v9494_v34 }
 0x37a   : > { %9319 = vrcp.f32 %v1168_v14  ;;  %8710 = vmatprep.subr.bf16.mxu0 %v9494_v34 }
 0x37b   : > { %v9316_v16 = vpop.eup %9315  ;;  %2065 = vrot.lane.b32.xlu1 %v9780_v33, %s9498_s20 }
 0x37c   : > { %v1185_v47 = vmul.f32 %v9316_v16, %v9818_v22 }
 0x37d   : > { %v1174_v58 = vpop.xlane.xlu0 %1173 }
 0x37e   : > { %v1193_v18 = vpack.c.bf16 %v1185_v47, %v1185_v47  ;;  %9321 = vrcp.f32 %v1174_v58  ;;  %v1576_v47 = vsel %vm712_vm4, %v1571_v27, 0 }
 0x37f   : > { %2163 = vrot.lane.b32.xlu1 %v9873_v54, %s9498_s20 }
 0x380   : > { %8695 = vmatmul.mubr.msk.bf16.vlgmr.msra.gmra.mxu1 %vm1102_vm6, %v1193_v18 }
 0x381   : > { %8705 = vmatpush3.bf16.msra.mxu1 %v1388_v20  ;;  %8706 = vmatprep.mubr.msk.bf16.mxu1 %vm9495_vm3, %v9494_v34  ;;  %v1621_v32 = vpop.permute.xlu0 %1620 }
 0x382   : > { %8716 = vmatprep.subr.bf16.mxu1 %v9494_v34 }
 0x383   : > { %v9318_v61 = vpop.eup %9317  ;;  %2212 = vrot.lane.b32.xlu1 %v9888_v6, %s9498_s20 }
 0x384   : > { %v1186_v0 = vmul.f32 %v9318_v61, %v9822_v25 }
 0x385   : > { %v1671_v53 = vpop.permute.xlu0 %1670 }
 0x386   : > { %v1194_v22 = vpack.c.bf16 %v1186_v0, %v1186_v0  ;;  %v1676_v20 = vsel %vm712_vm4, %v1671_v53, 0 }
 0x387   : > { %v9320_v24 = vpop.eup %9319 }
 0x388   : > { %8701 = vmatmul.mubr.msk.bf16.vlgmr.msra.gmra.mxu0 %vm1102_vm6, %v1194_v22  ;;  %v1188_v17 = vmul.f32 %v9320_v24, %v9826_v29  ;;  %v1626_v29 = vsel %vm712_vm4, %v1621_v32, 0 }
 0x389   : > { %8711 = vmatpush3.bf16.msra.mxu0 %v1434_v26  ;;  %8712 = vmatprep.mubr.msk.bf16.mxu0 %vm9495_vm3, %v9494_v34  ;;  %v1669_v57 = vpop.permute.xlu0 %1668 }
 0x38a   : > { %8722 = vmatprep.subr.bf16.mxu0 %v9494_v34  ;;  %v1196_v25 = vpack.c.bf16 %v1188_v17, %v1188_v17 }
 0x38b   : > { %v9322_v31 = vpop.eup %9321 }
 0x38c   : > { %v1190_v59 = vmul.f32 %v9322_v31, %v9830_v23 }
 0x38e   : > { %v1198_v36 = vpack.c.bf16 %v1190_v59, %v1190_v59 }
 0x390   : > { %8713 = vmatmul.mubr.msk.bf16.vlgmr.msra.gmra.mxu0 %vm1102_vm6, %v1196_v25 }
 0x391   : > { %8723 = vmatpush3.bf16.msra.mxu0 %v1526_v48  ;;  %8724 = vmatprep.mubr.msk.bf16.mxu0 %vm9495_vm3, %v9494_v34 }
 0x392   : > { %8734 = vmatprep.subr.bf16.mxu0 %v9494_v34 }
 0x398   : > { %8725 = vmatmul.mubr.msk.bf16.vlgmr.msra.gmra.mxu0 %vm1102_vm6, %v1198_v36 }
 0x399   : > { %8735 = vmatpush3.bf16.xpose.msra.mxu0 %v1626_v29  ;;  %8736 = vmatprep.mubr.msk.bf16.mxu0 %vm9495_vm3, %v9494_v34 }
 0x39a   : > { %8746 = vmatprep.subr.bf16.mxu0 %v9494_v34 }
 0x3a2   : > { %v1165_v39 = vpop.xlane.xlu1 %1164 }
 0x3a3   : > { %9323 = vrcp.f32 %v1165_v39 }
 0x3a6   : > { %v1569_v40 = vpop.permute.xlu1 %1568 }
 0x3b0   : > { %v9324_v42 = vpop.eup %9323 }
 0x3b1   : > { %v1187_v23 = vmul.f32 %v9324_v42, %v9842_v37  ;;  %v1771_v37 = vpop.permute.xlu0 %1770 }
 0x3b2   : > { %v1776_v24 = vsel %vm712_vm4, %v1771_v37, 0 }
 0x3b3   : > { %v1195_v49 = vpack.c.bf16 %v1187_v23, %v1187_v23 }
 0x3b5   : > { %8707 = vmatmul.mubr.msk.bf16.vlgmr.msra.gmra.mxu1 %vm1102_vm6, %v1195_v49  ;;  %v1769_v5 = vpop.permute.xlu0 %1768 }
 0x3b6   : > { %8717 = vmatpush3.bf16.msra.mxu1 %v1480_v50  ;;  %8718 = vmatprep.mubr.msk.bf16.mxu1 %vm9495_vm3, %v9494_v34 }
 0x3b7   : > { %8728 = vmatprep.subr.bf16.mxu1 %v9494_v34 }
 0x3b9   : > { %v1871_v16 = vpop.permute.xlu0 %1870 }
 0x3ba   : > { %v1876_v13 = vsel %vm712_vm4, %v1871_v16, 0 }
 0x3d7   : > { %v1171_v62 = vpop.xlane.xlu1 %1170 }
 0x3d8   : > { %9325 = vrcp.f32 %v1171_v62 }
 0x3db   : > { %v1619_v8 = vpop.permute.xlu1 %1618 }
 0x3dc   : > { %8737 = vmatmul.mubr.msk.bf16.vlgmr.msra.gmra.mxu0 %vm712_vm4, %v1619_v8 }
 0x3dd   : > { %8748 = vmatprep.mubr.msk.bf16.mxu0 %vm9495_vm3, %v9494_v34 }
 0x3df   : > { %v1721_v63 = vpop.permute.xlu1 %1720 }
 0x3e0   : > { %v1726_v3 = vsel %vm712_vm4, %v1721_v63, 0 }
 0x3e1   : > { %8747 = vmatpush3.bf16.xpose.msra.mxu0 %v1726_v3 }
 0x3e2   : > { %8758 = vmatprep.subr.bf16.mxu0 %v9494_v34 }
 0x3e3   : > { %v1719_v52 = vpop.permute.xlu1 %1718 }
 0x3e5   : > { %v9326_v9 = vpop.eup %9325 }
 0x3e6   : > { %v1189_v55 = vmul.f32 %v9326_v9, %v9859_v45  ;;  %v1869_v45 = vpop.permute.xlu0 %1868 }
 0x3e7   : > { %v1821_v10 = vpop.permute.xlu1 %1820 }
 0x3e8   : > { %v1826_v12 = vsel %vm712_vm4, %v1821_v10, 0  ;;  %8749 = vmatmul.mubr.msk.bf16.vlgmr.msra.gmra.mxu0 %vm712_vm4, %v1719_v52  ;;  %v1197_v14 = vpack.c.bf16 %v1189_v55, %v1189_v55 }
 0x3e9   : > { %8759 = vmatpush3.bf16.xpose.msra.mxu0 %v1826_v12  ;;  %8760 = vmatprep.mubr.msk.bf16.mxu0 %vm9495_vm3, %v9494_v34 }
 0x3ea   : > { %8719 = vmatmul.mubr.msk.bf16.vlgmr.msra.gmra.mxu1 %vm1102_vm6, %v1197_v14  ;;  %8770 = vmatprep.subr.bf16.mxu0 %v9494_v34  ;;  %v2115_v61 = vpop.permute.xlu0 %2114 }
 0x3eb   : > { %8729 = vmatpush3.bf16.xpose.msra.mxu1 %v1576_v47  ;;  %v1819_v18 = vpop.permute.xlu1 %1818  ;;  %8730 = vmatprep.mubr.msk.bf16.mxu1 %vm9495_vm3, %v9494_v34  ;;  %v2120_v22 = vsel %vm1202_vm5, %v2115_v61, 0 }
 0x3ec   : > { %8740 = vmatprep.subr.bf16.mxu1 %v9494_v34 }
 0x3ef   : > { %v1921_v58 = vpop.permute.xlu1 %1920 }
 0x3f0   : > { %v1926_v19 = vsel %vm712_vm4, %v1921_v58, 0  ;;  %8761 = vmatmul.mubr.msk.bf16.vlgmr.msra.gmra.mxu0 %vm712_vm4, %v1819_v18 }
 0x3f1   : > { %8771 = vmatpush3.bf16.xpose.msra.mxu0 %v1926_v19  ;;  %8772 = vmatprep.mubr.msk.bf16.mxu0 %vm9495_vm3, %v9494_v34 }
 0x3f2   : > { %8731 = vmatmul.mubr.msk.bf16.vlgmr.msra.gmra.mxu1 %vm712_vm4, %v1569_v40  ;;  %8782 = vmatprep.subr.bf16.mxu0 %v9494_v34 }
 0x3f3   : > { %8741 = vmatpush3.bf16.xpose.msra.mxu1 %v1676_v20  ;;  %8742 = vmatprep.mubr.msk.bf16.mxu1 %vm9495_vm3, %v9494_v34  ;;  %v1919_v0 = vpop.permute.xlu1 %1918 }
 0x3f4   : > { %8752 = vmatprep.subr.bf16.mxu1 %v9494_v34 }
 0x3f7   : > { %v2066_v26 = vpop.permute.xlu1 %2065 }
 0x3f8   : > { %8773 = vmatmul.mubr.msk.bf16.vlgmr.msra.gmra.mxu0 %vm712_vm4, %v1919_v0  ;;  %v2071_v17 = vsel %vm1202_vm5, %v2066_v26, 0 }
 0x3f9   : > { %8783 = vmatpush3.bf16.msra.mxu0 %v2120_v22  ;;  %8784 = vmatprep.mubr.msk.bf16.mxu0 %vm9495_vm3, %v9494_v34 }
 0x3fa   : > { %8743 = vmatmul.mubr.msk.bf16.vlgmr.msra.gmra.mxu1 %vm712_vm4, %v1669_v57  ;;  %8794 = vmatprep.subr.bf16.mxu0 %v9494_v34 }
 0x3fb   : > { %8753 = vmatpush3.bf16.xpose.msra.mxu1 %v1776_v24  ;;  %8754 = vmatprep.mubr.msk.bf16.mxu1 %vm9495_vm3, %v9494_v34 }
 0x3fc   : > { %8764 = vmatprep.subr.bf16.mxu1 %v9494_v34 }
 0x402   : > { %8755 = vmatmul.mubr.msk.bf16.vlgmr.msra.gmra.mxu1 %vm712_vm4, %v1769_v5 }
 0x403   : > { %8765 = vmatpush3.bf16.xpose.msra.mxu1 %v1876_v13  ;;  %8766 = vmatprep.mubr.msk.bf16.mxu1 %vm9495_vm3, %v9494_v34 }
 0x404   : > { %8776 = vmatprep.subr.bf16.mxu1 %v9494_v34 }
 0x40a   : > { %8767 = vmatmul.mubr.msk.bf16.vlgmr.msra.gmra.mxu1 %vm712_vm4, %v1869_v45 }
 0x40b   : > { %8777 = vmatpush3.bf16.msra.mxu1 %v2071_v17  ;;  %8778 = vmatprep.mubr.msk.bf16.mxu1 %vm9495_vm3, %v9494_v34 }
 0x40c   : > { %8788 = vmatprep.subr.bf16.mxu1 %v9494_v34 }
 0x430   : > { %v10001_v25 = vpop.f32.mrf.mxu1 }
 0x432   : > { %v8684_v31 = vpop.f32.mrf.mxu1 }
 0x434   : > { %v1243_v48 = vpop.f32.mrf.mxu1 }
 0x436   : > { %v8685_v59 = vpop.f32.mrf.mxu1 }
 0x438   : > { %v10003_v32 = vpop.f32.mrf.mxu0 }
 0x43a   : > { %v8690_v36 = vpop.f32.mrf.mxu0 }
 0x43c   : > { %v1289_v29 = vpop.f32.mrf.mxu0 }
 0x43e   : > { %v8691_v27 = vpop.f32.mrf.mxu0 }
 0x440   : > { %v10005_v39 = vpop.f32.mrf.mxu1 }
 0x442   : > { %v8696_v42 = vpop.f32.mrf.mxu1 }
 0x444   : > { %v1335_v23 = vpop.f32.mrf.mxu1 }
 0x446   : > { %v8697_v49 = vpop.f32.mrf.mxu1 }
 0x448   : > { %v10007_v50 = vpop.f32.mrf.mxu0 }
 0x44a   : > { %v8702_v53 = vpop.f32.mrf.mxu0 }
 0x44c   : > { %v1381_v40 = vpop.f32.mrf.mxu0 }
 0x44e   : > { %v8703_v57 = vpop.f32.mrf.mxu0 }
 0x450   : > { %v10009_v62 = vpop.f32.mrf.mxu0 }
 0x452   : > { %v8714_v8 = vpop.f32.mrf.mxu0 }
 0x454   : > { %v1473_v37 = vpop.f32.mrf.mxu0 }
 0x456   : > { %v8715_v63 = vpop.f32.mrf.mxu0 }
 0x458   : > { %v10011_v3 = vpop.f32.mrf.mxu0 }
 0x45a   : > { %v8726_v5 = vpop.f32.mrf.mxu0 }
 0x45c   : > { %v1565_v52 = vpop.f32.mrf.mxu0 }
 0x45e   : > { %v8727_v9 = vpop.f32.mrf.mxu0 }
 0x475   : > { %v10013_v55 = vpop.f32.mrf.mxu1 }
 0x477   : > { %v8708_v10 = vpop.f32.mrf.mxu1 }
 0x479   : > { %v1427_v12 = vpop.f32.mrf.mxu1 }
 0x47b   : > { %v8709_v14 = vpop.f32.mrf.mxu1 }
 0x49c   : > { %v1662_v16 = vpop.f32.mrf.mxu0 }
 0x49d   : > { %v10016_v47 = vadd.f32 %v1662_v16, %v9593_v4 }
 0x49e   : > { %v8738_v18 = vpop.f32.mrf.mxu0 }
 0x49f   : > { %v1971_v45 = vsel %vm1102_vm6, %v10016_v47, -inf }
 0x4a0   : > { %1972 = vmax.xlane.f32.xlu1 %v1971_v45  ;;  %v1665_v58 = vpop.f32.mrf.mxu0 }
 0x4a2   : > { %v8739_v19 = vpop.f32.mrf.mxu0 }
 0x4a8   : > { %v1762_v20 = vpop.f32.mrf.mxu0 }
 0x4a9   : > { %v1763_v52 = vadd.f32 %v1762_v20, %v9593_v4 }
 0x4aa   : > { %v10020_v61 = vpop.f32.mrf.mxu1  ;;  %v8750_v0 = vpop.f32.mrf.mxu0 }
 0x4ab   : > { %v1977_v18 = vsel %vm1102_vm6, %v1763_v52, -inf }
 0x4ac   : > { %v8720_v22 = vpop.f32.mrf.mxu1  ;;  %v1765_v24 = vpop.f32.mrf.mxu0 }
 0x4ae   : > { %v1519_v13 = vpop.f32.mrf.mxu1  ;;  %v8751_v26 = vpop.f32.mrf.mxu0 }
 0x4b0   : > { %v8721_v17 = vpop.f32.mrf.mxu1  ;;  %v1862_v31 = vpop.f32.mrf.mxu0 }
 0x4b1   : > { %v1863_v16 = vadd.f32 %v1862_v31, %v9593_v4 }
 0x4b2   : > { %v1612_v48 = vpop.f32.mrf.mxu1  ;;  %v8762_v59 = vpop.f32.mrf.mxu0 }
 0x4b3   : > { %v1613_v36 = vadd.f32 %v1612_v48, %v9593_v4  ;;  %v1983_v20 = vsel %vm1102_vm6, %v1863_v16, -inf }
 0x4b4   : > { %v8732_v29 = vpop.f32.mrf.mxu1  ;;  %v1865_v27 = vpop.f32.mrf.mxu0 }
 0x4b5   : > { %v1968_v42 = vsel %vm1102_vm6, %v1613_v36, -inf }
 0x4b6   : > { %v1615_v23 = vpop.f32.mrf.mxu1  ;;  %1969 = vmax.xlane.f32.xlu0 %v1968_v42  ;;  %v8763_v49 = vpop.f32.mrf.mxu0 }
 0x4b7   : > { %v10043_v42 = vpop.permute.xlu1 %2163 }
 0x4b8   : > { %v8733_v53 = vpop.f32.mrf.mxu1  ;;  %v1962_v40 = vpop.f32.mrf.mxu0 }
 0x4b9   : > { %v10031_v0 = vadd.f32 %v1962_v40, %v9593_v4 }
 0x4ba   : > { %v1712_v57 = vpop.f32.mrf.mxu1  ;;  %v8774_v8 = vpop.f32.mrf.mxu0 }
 0x4bb   : > { %v1713_v37 = vadd.f32 %v1712_v57, %v9593_v4  ;;  %v1989_v26 = vsel %vm1102_vm6, %v10031_v0, -inf  ;;  %v10045_v23 = vpop.permute.xlu1 %2212 }
 0x4bc   : > { %v8744_v63 = vpop.f32.mrf.mxu1  ;;  %v1965_v5 = vpop.f32.mrf.mxu0 }
 0x4bd   : > { %v1974_v9 = vsel %vm1102_vm6, %v1713_v37, -inf }
 0x4be   : > { %v8775_v10 = vpop.f32.mrf.mxu0  ;;  %1975 = vmax.xlane.f32.xlu0 %v1974_v9  ;;  %v1715_v12 = vpop.f32.mrf.mxu1 }
 0x4c0   : > { %v8745_v14 = vpop.f32.mrf.mxu1 }
 0x4c2   : > { %1978 = vmax.xlane.f32.xlu0 %v1977_v18  ;;  %v1812_v45 = vpop.f32.mrf.mxu1 }
 0x4c3   : > { %v1813_v58 = vadd.f32 %v1812_v45, %v9593_v4 }
 0x4c4   : > { %v8756_v19 = vpop.f32.mrf.mxu1 }
 0x4c5   : > { %v1980_v22 = vsel %vm1102_vm6, %v1813_v58, -inf }
 0x4c6   : > { %1984 = vmax.xlane.f32.xlu0 %v1983_v20  ;;  %1981 = vmax.xlane.f32.xlu1 %v1980_v22  ;;  %v1815_v24 = vpop.f32.mrf.mxu1 }
 0x4c8   : > { %v8757_v13 = vpop.f32.mrf.mxu1 }
 0x4ca   : > { %1990 = vmax.xlane.f32.xlu0 %v1989_v26  ;;  %v1912_v17 = vpop.f32.mrf.mxu1 }
 0x4cb   : > { %v1913_v31 = vadd.f32 %v1912_v17, %v9593_v4 }
 0x4cc   : > { %v8768_v48 = vpop.f32.mrf.mxu1 }
 0x4cd   : > { %v1986_v59 = vsel %vm1102_vm6, %v1913_v31, -inf }
 0x4ce   : > { %1987 = vmax.xlane.f32.xlu1 %v1986_v59  ;;  %v1915_v29 = vpop.f32.mrf.mxu1 }
 0x4d0   : > { %v8769_v27 = vpop.f32.mrf.mxu1 }
 0x4df   : > { %2310 = vrot.lane.b32.xlu1 %v9918_v21, %s9498_s20 }
 0x4e0   : > { %2261 = vrot.lane.b32.xlu0 %v9903_v38, %s9498_s20 }
 0x529   : > { %v1973_v49 = vpop.xlane.xlu1 %1972 }
 0x52a   : > { %v1993_v53 = vsub.f32 %v10016_v47, %v1973_v49 }
 0x52c   : > { %v2002_v40 = vmul.f32 1.442695, %v1993_v53 }
 0x52e   : > { %9327 = vpow2.f32 %v2002_v40 }
 0x53b   : > { %v10048_v57 = vpop.eup %9327 }
 0x53c   : > { %v2019_v8 = vsel %vm1102_vm6, %v10048_v57, 0.0 }
 0x53d   : > { %2020 = vadd.xlane.f32.xlu0 %v2019_v8 }
 0x53f   : > { %v1970_v63 = vpop.xlane.xlu0 %1969 }
 0x540   : > { %v1992_v5 = vsub.f32 %v1613_v36, %v1970_v63 }
 0x542   : > { %v2000_v9 = vmul.f32 1.442695, %v1992_v5 }
 0x544   : > { %9329 = vpow2.f32 %v2000_v9 }
 0x547   : > { %v1976_v10 = vpop.xlane.xlu0 %1975 }
 0x548   : > { %v1994_v12 = vsub.f32 %v1713_v37, %v1976_v10 }
 0x54a   : > { %v2004_v14 = vmul.f32 1.442695, %v1994_v12 }
 0x54b   : > { %v1979_v18 = vpop.xlane.xlu0 %1978 }
 0x54c   : > { %9331 = vpow2.f32 %v2004_v14  ;;  %v1995_v45 = vsub.f32 %v1763_v52, %v1979_v18 }
 0x54e   : > { %v2006_v19 = vmul.f32 1.442695, %v1995_v45 }
 0x54f   : > { %v1982_v47 = vpop.xlane.xlu1 %1981  ;;  %v1985_v20 = vpop.xlane.xlu0 %1984 }
 0x550   : > { %9333 = vpow2.f32 %v2006_v19  ;;  %v1996_v22 = vsub.f32 %v1813_v58, %v1982_v47  ;;  %v1997_v24 = vsub.f32 %v1863_v16, %v1985_v20  ;;  %v2218_v20 = vsel %vm1202_vm5, %v10045_v23, 0 }
 0x551   : > { %v10052_v13 = vpop.eup %9329 }
 0x552   : > { %v2008_v26 = vmul.f32 1.442695, %v1996_v22  ;;  %v2010_v17 = vmul.f32 1.442695, %v1997_v24  ;;  %v2016_v36 = vsel %vm1102_vm6, %v10052_v13, 0.0 }
 0x553   : > { %2017 = vadd.xlane.f32.xlu1 %v2016_v36  ;;  %v1991_v53 = vpop.xlane.xlu0 %1990 }
 0x554   : > { %9335 = vpow2.f32 %v2008_v26  ;;  %v1999_v8 = vsub.f32 %v10031_v0, %v1991_v53 }
 0x555   : > { %9337 = vpow2.f32 %v2010_v17 }
 0x556   : > { %v2014_v5 = vmul.f32 1.442695, %v1999_v8 }
 0x557   : > { %v1988_v49 = vpop.xlane.xlu1 %1987  ;;  %v2262_v0 = vpop.permute.xlu0 %2261 }
 0x558   : > { %v1998_v40 = vsub.f32 %v1913_v31, %v1988_v49  ;;  %v2267_v53 = vsel %vm1202_vm5, %v2262_v0, 0 }
 0x559   : > { %v10056_v37 = vpop.eup %9331 }
 0x55a   : > { %v2022_v52 = vsel %vm1102_vm6, %v10056_v37, 0.0  ;;  %v2012_v63 = vmul.f32 1.442695, %v1998_v40 }
 0x55b   : > { %2023 = vadd.xlane.f32.xlu1 %v2022_v52  ;;  %v2311_v47 = vpop.permute.xlu1 %2310 }
 0x55c   : > { %9339 = vpow2.f32 %v2012_v63 }
 0x55d   : > { %v10060_v48 = vpop.eup %9333  ;;  %9341 = vpow2.f32 %v2014_v5  ;;  %v2316_v5 = vsel %vm1202_vm5, %v2311_v47, 0 }
 0x55e   : > { %v2025_v16 = vsel %vm1102_vm6, %v10060_v48, 0.0 }
 0x55f   : > { %2026 = vadd.xlane.f32.xlu0 %v2025_v16  ;;  %v2169_v16 = vsel %vm1202_vm5, %v10043_v42, 0 }
 0x561   : > { %v10064_v58 = vpop.eup %9335 }
 0x562   : > { %v10066_v59 = vpop.eup %9337  ;;  %v2028_v29 = vsel %vm1102_vm6, %v10064_v58, 0.0 }
 0x563   : > { %2029 = vadd.xlane.f32.xlu1 %v2028_v29  ;;  %v2031_v27 = vsel %vm1102_vm6, %v10066_v59, 0.0 }
 0x564   : > { %2032 = vadd.xlane.f32.xlu0 %v2031_v27 }
 0x569   : > { %v10077_v9 = vpop.eup %9339 }
 0x56a   : > { %v10079_v10 = vpop.eup %9341  ;;  %v2034_v12 = vsel %vm1102_vm6, %v10077_v9, 0.0 }
 0x56b   : > { %v2037_v14 = vsel %vm1102_vm6, %v10079_v10, 0.0 }
 0x574   : > { %2408 = vrot.lane.b32.xlu1 %v9930_v30, %s9498_s20 }
 0x57a   : > { %2359 = vrot.lane.b32.xlu0 %v9946_v44, %s9498_s20 }
 0x598   : > { %2035 = vadd.xlane.f32.xlu1 %v2034_v12 }
 0x599   : > { %2038 = vadd.xlane.f32.xlu0 %v2037_v14 }
 0x5a9   : > { %2508 = vrot.lane.b32.xlu1 %v9683_v46, %s9499_s1 }
 0x5ad   : > { %2506 = vrot.lane.b32.xlu1 %v9683_v46, %s9500_s2 }
 0x5af   : > { %2458 = vrot.lane.b32.xlu0 %v9674_v41, %s9499_s1 }
 0x5b1   : > { %2608 = vrot.lane.b32.xlu1 %v9699_v56, %s9499_s1 }
 0x5b3   : > { %2456 = vrot.lane.b32.xlu0 %v9674_v41, %s9500_s2 }
 0x5b5   : > { %2606 = vrot.lane.b32.xlu1 %v9699_v56, %s9500_s2 }
 0x5b7   : > { %2558 = vrot.lane.b32.xlu0 %v9690_v51, %s9499_s1 }
 0x5b9   : > { %2708 = vrot.lane.b32.xlu1 %v9712_v2, %s9499_s1 }
 0x5bb   : > { %2556 = vrot.lane.b32.xlu0 %v9690_v51, %s9500_s2 }
 0x5bd   : > { %2706 = vrot.lane.b32.xlu1 %v9712_v2, %s9500_s2 }
 0x5bf   : > { %2658 = vrot.lane.b32.xlu0 %v9703_v60, %s9499_s1 }
 0x5c1   : > { %2808 = vrot.lane.b32.xlu1 %v9723_v11, %s9499_s1 }
 0x5c3   : > { %2656 = vrot.lane.b32.xlu0 %v9703_v60, %s9500_s2 }
 0x5c5   : > { %2806 = vrot.lane.b32.xlu1 %v9723_v11, %s9500_s2 }
 0x5c6   : > { %v2021_v31 = vpop.xlane.xlu0 %2020 }
 0x5c7   : > { %2758 = vrot.lane.b32.xlu0 %v9716_v7, %s9499_s1  ;;  %9343 = vrcp.f32 %v2021_v31 }
 0x5c9   : > { %2952 = vrot.lane.b32.xlu1 %v9780_v33, %s9500_s2 }
 0x5cb   : > { %2756 = vrot.lane.b32.xlu0 %v9716_v7, %s9500_s2 }
 0x5cd   : > { %3048 = vrot.lane.b32.xlu1 %v9873_v54, %s9500_s2 }
 0x5cf   : > { %3000 = vrot.lane.b32.xlu0 %v9758_v28, %s9500_s2 }
 0x5d1   : > { %3096 = vrot.lane.b32.xlu1 %v9888_v6, %s9500_s2 }
 0x5d4   : > { %v9344_v18 = vpop.eup %9343 }
 0x5d5   : > { %v2049_v45 = vmul.f32 %v9344_v18, %v10048_v57 }
 0x5d7   : > { %v2057_v19 = vpack.c.bf16 %v2049_v45, %v2049_v45 }
 0x5d9   : > { %8785 = vmatmul.mubr.msk.bf16.vlgmr.msra.gmra.mxu0 %vm1102_vm6, %v2057_v19 }
 0x5da   : > { %8795 = vmatpush3.bf16.msra.mxu0 %v2218_v20  ;;  %8796 = vmatprep.mubr.msk.bf16.mxu0 %vm9495_vm3, %v9494_v34 }
 0x5db   : > { %8806 = vmatprep.subr.bf16.mxu0 %v9494_v34 }
 0x5dc   : > { %v2018_v22 = vpop.xlane.xlu1 %2017 }
 0x5dd   : > { %9345 = vrcp.f32 %v2018_v22 }
 0x5e4   : > { %v2024_v24 = vpop.xlane.xlu1 %2023 }
 0x5e5   : > { %9347 = vrcp.f32 %v2024_v24 }
 0x5e8   : > { %v2027_v26 = vpop.xlane.xlu0 %2026 }
 0x5e9   : > { %9349 = vrcp.f32 %v2027_v26 }
 0x5ea   : > { %v9346_v57 = vpop.eup %9345 }
 0x5eb   : > { %v2048_v17 = vmul.f32 %v9346_v57, %v10052_v13 }
 0x5ec   : > { %v2030_v36 = vpop.xlane.xlu1 %2029 }
 0x5ed   : > { %9351 = vrcp.f32 %v2030_v36  ;;  %v2033_v23 = vpop.xlane.xlu0 %2032  ;;  %v2056_v52 = vpack.c.bf16 %v2048_v17, %v2048_v17 }
 0x5ee   : > { %9353 = vrcp.f32 %v2033_v23 }
 0x5ef   : > { %8779 = vmatmul.mubr.msk.bf16.vlgmr.msra.gmra.mxu1 %vm1102_vm6, %v2056_v52 }
 0x5f0   : > { %8789 = vmatpush3.bf16.msra.mxu1 %v2169_v16  ;;  %8790 = vmatprep.mubr.msk.bf16.mxu1 %vm9495_vm3, %v9494_v34  ;;  %v2409_v31 = vpop.permute.xlu1 %2408 }
 0x5f1   : > { %8800 = vmatprep.subr.bf16.mxu1 %v9494_v34  ;;  %v2360_v12 = vpop.permute.xlu0 %2359  ;;  %v2414_v18 = vsel %vm1202_vm5, %v2409_v31, 0 }
 0x5f2   : > { %v9348_v29 = vpop.eup %9347  ;;  %v2365_v0 = vsel %vm1202_vm5, %v2360_v12, 0 }
 0x5f3   : > { %v2050_v27 = vmul.f32 %v9348_v29, %v10056_v37 }
 0x5f5   : > { %v2058_v13 = vpack.c.bf16 %v2050_v27, %v2050_v27 }
 0x5f6   : > { %v9350_v49 = vpop.eup %9349 }
 0x5f7   : > { %8791 = vmatmul.mubr.msk.bf16.vlgmr.msra.gmra.mxu1 %vm1102_vm6, %v2058_v13  ;;  %v2051_v40 = vmul.f32 %v9350_v49, %v10060_v48 }
 0x5f8   : > { %8801 = vmatpush3.bf16.msra.mxu1 %v2267_v53  ;;  %8802 = vmatprep.mubr.msk.bf16.mxu1 %vm9495_vm3, %v9494_v34 }
 0x5f9   : > { %v2059_v42 = vpack.c.bf16 %v2051_v40, %v2051_v40  ;;  %8812 = vmatprep.subr.bf16.mxu1 %v9494_v34 }
 0x5fa   : > { %v9352_v8 = vpop.eup %9351 }
 0x5fb   : > { %v9354_v63 = vpop.eup %9353  ;;  %8797 = vmatmul.mubr.msk.bf16.vlgmr.msra.gmra.mxu0 %vm1102_vm6, %v2059_v42  ;;  %v2052_v37 = vmul.f32 %v9352_v8, %v10064_v58 }
 0x5fc   : > { %8807 = vmatpush3.bf16.msra.mxu0 %v2316_v5  ;;  %8808 = vmatprep.mubr.msk.bf16.mxu0 %vm9495_vm3, %v9494_v34  ;;  %v2053_v14 = vmul.f32 %v9354_v63, %v10066_v59 }
 0x5fd   : > { %v2060_v48 = vpack.c.bf16 %v2052_v37, %v2052_v37  ;;  %8818 = vmatprep.subr.bf16.mxu0 %v9494_v34 }
 0x5fe   : > { %v2061_v58 = vpack.c.bf16 %v2053_v14, %v2053_v14 }
 0x5ff   : > { %8803 = vmatmul.mubr.msk.bf16.vlgmr.msra.gmra.mxu1 %vm1102_vm6, %v2060_v48 }
 0x600   : > { %8813 = vmatpush3.bf16.msra.mxu1 %v2365_v0  ;;  %8814 = vmatprep.mubr.msk.bf16.mxu1 %vm9495_vm3, %v9494_v34 }
 0x601   : > { %8824 = vmatprep.subr.bf16.mxu1 %v9494_v34 }
 0x603   : > { %8809 = vmatmul.mubr.msk.bf16.vlgmr.msra.gmra.mxu0 %vm1102_vm6, %v2061_v58 }
 0x604   : > { %8819 = vmatpush3.bf16.msra.mxu0 %v2414_v18  ;;  %8820 = vmatprep.mubr.msk.bf16.mxu0 %vm9495_vm3, %v9494_v34 }
 0x605   : > { %8830 = vmatprep.subr.bf16.mxu0 %v9494_v34 }
 0x621   : > { %v2036_v59 = vpop.xlane.xlu1 %2035 }
 0x622   : > { %9355 = vrcp.f32 %v2036_v59  ;;  %v2039_v45 = vpop.xlane.xlu0 %2038 }
 0x623   : > { %9357 = vrcp.f32 %v2039_v45 }
 0x625   : > { %v2509_v19 = vpop.permute.xlu1 %2508 }
 0x626   : > { %v2459_v47 = vpop.permute.xlu0 %2458  ;;  %v2514_v49 = vsel %vm712_vm4, %v2509_v19, 0 }
 0x627   : > { %v2464_v27 = vsel %vm712_vm4, %v2459_v47, 0 }
 0x629   : > { %v2507_v20 = vpop.permute.xlu1 %2506 }
 0x62a   : > { %v2457_v22 = vpop.permute.xlu0 %2456 }
 0x62d   : > { %v2609_v24 = vpop.permute.xlu1 %2608 }
 0x62e   : > { %v2559_v26 = vpop.permute.xlu0 %2558  ;;  %v2614_v40 = vsel %vm712_vm4, %v2609_v24, 0 }
 0x62f   : > { %v9356_v57 = vpop.eup %9355  ;;  %v2564_v53 = vsel %vm712_vm4, %v2559_v26, 0 }
 0x630   : > { %v9358_v17 = vpop.eup %9357  ;;  %v2054_v36 = vmul.f32 %v9356_v57, %v10077_v9 }
 0x631   : > { %v2055_v23 = vmul.f32 %v9358_v17, %v10079_v10  ;;  %v2607_v16 = vpop.permute.xlu1 %2606 }
 0x632   : > { %v2062_v52 = vpack.c.bf16 %v2054_v36, %v2054_v36  ;;  %v2557_v13 = vpop.permute.xlu0 %2556 }
 0x633   : > { %v2063_v29 = vpack.c.bf16 %v2055_v23, %v2055_v23 }
 0x634   : > { %8815 = vmatmul.mubr.msk.bf16.vlgmr.msra.gmra.mxu1 %vm1102_vm6, %v2062_v52 }
 0x635   : > { %8821 = vmatmul.mubr.msk.bf16.vlgmr.msra.gmra.mxu0 %vm1102_vm6, %v2063_v29  ;;  %8825 = vmatpush3.bf16.xpose.msra.mxu1 %v2464_v27  ;;  %v2709_v9 = vpop.permute.xlu1 %2708 }
 0x636   : > { %8831 = vmatpush3.bf16.xpose.msra.mxu0 %v2514_v49  ;;  %8826 = vmatprep.mubr.msk.bf16.mxu1 %vm9495_vm3, %v9494_v34  ;;  %v2659_v10 = vpop.permute.xlu0 %2658  ;;  %v2714_v5 = vsel %vm712_vm4, %v2709_v9, 0 }
 0x637   : > { %8832 = vmatprep.mubr.msk.bf16.mxu0 %vm9495_vm3, %v9494_v34  ;;  %8836 = vmatprep.subr.bf16.mxu1 %v9494_v34  ;;  %v2664_v63 = vsel %vm712_vm4, %v2659_v10, 0 }
 0x638   : > { %8842 = vmatprep.subr.bf16.mxu0 %v9494_v34 }
 0x639   : > { %v2707_v42 = vpop.permute.xlu1 %2706 }
 0x63a   : > { %v2657_v8 = vpop.permute.xlu0 %2656 }
 0x63c   : > { %8827 = vmatmul.mubr.msk.bf16.vlgmr.msra.gmra.mxu1 %vm712_vm4, %v2457_v22 }
 0x63d   : > { %8833 = vmatmul.mubr.msk.bf16.vlgmr.msra.gmra.mxu0 %vm712_vm4, %v2507_v20  ;;  %8837 = vmatpush3.bf16.xpose.msra.mxu1 %v2564_v53  ;;  %v2809_v37 = vpop.permute.xlu1 %2808 }
 0x63e   : > { %8843 = vmatpush3.bf16.xpose.msra.mxu0 %v2614_v40  ;;  %8838 = vmatprep.mubr.msk.bf16.mxu1 %vm9495_vm3, %v9494_v34  ;;  %v2759_v12 = vpop.permute.xlu0 %2758  ;;  %v2814_v31 = vsel %vm712_vm4, %v2809_v37, 0 }
 0x63f   : > { %8844 = vmatprep.mubr.msk.bf16.mxu0 %vm9495_vm3, %v9494_v34  ;;  %8848 = vmatprep.subr.bf16.mxu1 %v9494_v34  ;;  %v2764_v14 = vsel %vm712_vm4, %v2759_v12, 0 }
 0x640   : > { %8854 = vmatprep.subr.bf16.mxu0 %v9494_v34 }
 0x641   : > { %v2807_v48 = vpop.permute.xlu1 %2806 }
 0x642   : > { %v2757_v0 = vpop.permute.xlu0 %2756 }
 0x644   : > { %8839 = vmatmul.mubr.msk.bf16.vlgmr.msra.gmra.mxu1 %vm712_vm4, %v2557_v13 }
 0x645   : > { %8845 = vmatmul.mubr.msk.bf16.vlgmr.msra.gmra.mxu0 %vm712_vm4, %v2607_v16  ;;  %8849 = vmatpush3.bf16.xpose.msra.mxu1 %v2664_v63  ;;  %v2953_v58 = vpop.permute.xlu1 %2952 }
 0x646   : > { %8855 = vmatpush3.bf16.xpose.msra.mxu0 %v2714_v5  ;;  %8850 = vmatprep.mubr.msk.bf16.mxu1 %vm9495_vm3, %v9494_v34  ;;  %v3001_v18 = vpop.permute.xlu0 %3000  ;;  %v2958_v59 = vsel %vm1202_vm5, %v2953_v58, 0 }
 0x647   : > { %8856 = vmatprep.mubr.msk.bf16.mxu0 %vm9495_vm3, %v9494_v34  ;;  %8860 = vmatprep.subr.bf16.mxu1 %v9494_v34  ;;  %v3006_v45 = vsel %vm1202_vm5, %v3001_v18, 0 }
 0x648   : > { %8866 = vmatprep.subr.bf16.mxu0 %v9494_v34 }
 0x64c   : > { %8851 = vmatmul.mubr.msk.bf16.vlgmr.msra.gmra.mxu1 %vm712_vm4, %v2657_v8 }
 0x64d   : > { %8857 = vmatmul.mubr.msk.bf16.vlgmr.msra.gmra.mxu0 %vm712_vm4, %v2707_v42  ;;  %8861 = vmatpush3.bf16.xpose.msra.mxu1 %v2764_v14 }
 0x64e   : > { %8867 = vmatpush3.bf16.xpose.msra.mxu0 %v2814_v31  ;;  %8862 = vmatprep.mubr.msk.bf16.mxu1 %vm9495_vm3, %v9494_v34 }
 0x64f   : > { %8868 = vmatprep.mubr.msk.bf16.mxu0 %vm9495_vm3, %v9494_v34  ;;  %8872 = vmatprep.subr.bf16.mxu1 %v9494_v34 }
 0x650   : > { %8878 = vmatprep.subr.bf16.mxu0 %v9494_v34 }
 0x654   : > { %8863 = vmatmul.mubr.msk.bf16.vlgmr.msra.gmra.mxu1 %vm712_vm4, %v2757_v0 }
 0x655   : > { %8869 = vmatmul.mubr.msk.bf16.vlgmr.msra.gmra.mxu0 %vm712_vm4, %v2807_v48  ;;  %8873 = vmatpush3.bf16.msra.mxu1 %v2958_v59 }
 0x656   : > { %8879 = vmatpush3.bf16.msra.mxu0 %v3006_v45  ;;  %8874 = vmatprep.mubr.msk.bf16.mxu1 %vm9495_vm3, %v9494_v34 }
 0x657   : > { %8880 = vmatprep.mubr.msk.bf16.mxu0 %vm9495_vm3, %v9494_v34  ;;  %8884 = vmatprep.subr.bf16.mxu1 %v9494_v34 }
 0x658   : > { %8890 = vmatprep.subr.bf16.mxu0 %v9494_v34 }
 0x699   : > { %v10215_v19 = vpop.f32.mrf.mxu0 }
 0x69b   : > { %v8786_v47 = vpop.f32.mrf.mxu0 }
 0x69d   : > { %v2159_v20 = vpop.f32.mrf.mxu0 }
 0x69f   : > { %v8787_v22 = vpop.f32.mrf.mxu0 }
 0x6af   : > { %v10217_v24 = vpop.f32.mrf.mxu1 }
 0x6b1   : > { %v8780_v57 = vpop.f32.mrf.mxu1 }
 0x6b3   : > { %v2110_v17 = vpop.f32.mrf.mxu1 }
 0x6b5   : > { %v8781_v36 = vpop.f32.mrf.mxu1 }
 0x6b7   : > { %v10221_v23 = vpop.f32.mrf.mxu1 }
 0x6b9   : > { %v8792_v52 = vpop.f32.mrf.mxu1 }
 0x6bb   : > { %v2208_v16 = vpop.f32.mrf.mxu1  ;;  %v10223_v29 = vpop.f32.mrf.mxu0 }
 0x6bd   : > { %v8793_v13 = vpop.f32.mrf.mxu1  ;;  %v8798_v49 = vpop.f32.mrf.mxu0 }
 0x6bf   : > { %v2257_v9 = vpop.f32.mrf.mxu0  ;;  %v10227_v10 = vpop.f32.mrf.mxu1 }
 0x6c1   : > { %v8799_v53 = vpop.f32.mrf.mxu0  ;;  %v8804_v40 = vpop.f32.mrf.mxu1 }
 0x6c3   : > { %v2306_v42 = vpop.f32.mrf.mxu1  ;;  %v10229_v8 = vpop.f32.mrf.mxu0 }
 0x6c5   : > { %v8805_v5 = vpop.f32.mrf.mxu1  ;;  %v8810_v37 = vpop.f32.mrf.mxu0 }
 0x6c7   : > { %v2355_v12 = vpop.f32.mrf.mxu0 }
 0x6c9   : > { %v8811_v48 = vpop.f32.mrf.mxu0 }
 0x6f4   : > { %v10233_v14 = vpop.f32.mrf.mxu1 }
 0x6f5   : > { %v10235_v0 = vpop.f32.mrf.mxu0 }
 0x6f6   : > { %v8816_v58 = vpop.f32.mrf.mxu1 }
 0x6f7   : > { %v8822_v18 = vpop.f32.mrf.mxu0 }
 0x6f8   : > { %v2404_v59 = vpop.f32.mrf.mxu1 }
 0x6f9   : > { %v2453_v45 = vpop.f32.mrf.mxu0 }
 0x6fa   : > { %v8817_v47 = vpop.f32.mrf.mxu1 }
 0x6fb   : > { %v8823_v20 = vpop.f32.mrf.mxu0 }
 0x6fc   : > { %v2500_v22 = vpop.f32.mrf.mxu1 }
 0x6fd   : > { %v10240_v57 = vadd.f32 %v2500_v22, %v9593_v4  ;;  %v2550_v17 = vpop.f32.mrf.mxu0 }
 0x6fe   : > { %v2551_v36 = vadd.f32 %v2550_v17, %v9593_v4  ;;  %v8828_v52 = vpop.f32.mrf.mxu1 }
 0x6ff   : > { %v8834_v16 = vpop.f32.mrf.mxu0  ;;  %v2856_v13 = vsel %vm1102_vm6, %v10240_v57, -inf }
 0x700   : > { %v2859_v49 = vsel %vm1102_vm6, %v2551_v36, -inf  ;;  %2857 = vmax.xlane.f32.xlu0 %v2856_v13  ;;  %v2503_v9 = vpop.f32.mrf.mxu1 }
 0x701   : > { %2860 = vmax.xlane.f32.xlu1 %v2859_v49  ;;  %v2553_v53 = vpop.f32.mrf.mxu0 }
 0x702   : > { %v8829_v40 = vpop.f32.mrf.mxu1 }
 0x703   : > { %v8835_v42 = vpop.f32.mrf.mxu0 }
 0x704   : > { %v2600_v5 = vpop.f32.mrf.mxu1 }
 0x705   : > { %v2601_v37 = vadd.f32 %v2600_v5, %v9593_v4  ;;  %v2650_v12 = vpop.f32.mrf.mxu0 }
 0x706   : > { %v8840_v48 = vpop.f32.mrf.mxu1  ;;  %v2651_v58 = vadd.f32 %v2650_v12, %v9593_v4 }
 0x707   : > { %v8846_v18 = vpop.f32.mrf.mxu0  ;;  %v2862_v59 = vsel %vm1102_vm6, %v2601_v37, -inf }
 0x708   : > { %2863 = vmax.xlane.f32.xlu0 %v2862_v59  ;;  %v2603_v45 = vpop.f32.mrf.mxu1  ;;  %v2865_v17 = vsel %vm1102_vm6, %v2651_v58, -inf }
 0x709   : > { %v2653_v47 = vpop.f32.mrf.mxu0 }
 0x70a   : > { %v8841_v20 = vpop.f32.mrf.mxu1 }
 0x70b   : > { %v8847_v22 = vpop.f32.mrf.mxu0 }
 0x70c   : > { %2866 = vmax.xlane.f32.xlu0 %v2865_v17  ;;  %v2700_v52 = vpop.f32.mrf.mxu1 }
 0x70d   : > { %v2750_v16 = vpop.f32.mrf.mxu0  ;;  %v2701_v13 = vadd.f32 %v2700_v52, %v9593_v4 }
 0x70e   : > { %v2751_v49 = vadd.f32 %v2750_v16, %v9593_v4  ;;  %v8852_v9 = vpop.f32.mrf.mxu1 }
 0x70f   : > { %v8858_v53 = vpop.f32.mrf.mxu0  ;;  %v2868_v40 = vsel %vm1102_vm6, %v2701_v13, -inf }
 0x710   : > { %v2871_v42 = vsel %vm1102_vm6, %v2751_v49, -inf  ;;  %2869 = vmax.xlane.f32.xlu1 %v2868_v40  ;;  %v2703_v5 = vpop.f32.mrf.mxu1 }
 0x711   : > { %v2753_v12 = vpop.f32.mrf.mxu0  ;;  %2872 = vmax.xlane.f32.xlu0 %v2871_v42  ;;  %v10268_v5 = vpop.permute.xlu1 %3048 }
 0x712   : > { %v8853_v48 = vpop.f32.mrf.mxu1 }
 0x713   : > { %v8859_v18 = vpop.f32.mrf.mxu0 }
 0x714   : > { %v2800_v59 = vpop.f32.mrf.mxu1 }
 0x715   : > { %v10255_v45 = vadd.f32 %v2800_v59, %v9593_v4  ;;  %v2850_v47 = vpop.f32.mrf.mxu0  ;;  %v10270_v12 = vpop.permute.xlu1 %3096 }
 0x716   : > { %v10258_v20 = vadd.f32 %v2850_v47, %v9593_v4  ;;  %v8864_v22 = vpop.f32.mrf.mxu1 }
 0x717   : > { %v8870_v17 = vpop.f32.mrf.mxu0  ;;  %v2874_v52 = vsel %vm1102_vm6, %v10255_v45, -inf }
 0x718   : > { %v2877_v16 = vsel %vm1102_vm6, %v10258_v20, -inf  ;;  %2875 = vmax.xlane.f32.xlu1 %v2874_v52  ;;  %v2803_v9 = vpop.f32.mrf.mxu1 }
 0x719   : > { %v2853_v53 = vpop.f32.mrf.mxu0  ;;  %2878 = vmax.xlane.f32.xlu0 %v2877_v16 }
 0x71a   : > { %v8865_v40 = vpop.f32.mrf.mxu1 }
 0x71b   : > { %v8871_v42 = vpop.f32.mrf.mxu0 }
 0x729   : > { %3192 = vrot.lane.b32.xlu1 %v9918_v21, %s9500_s2 }
 0x72f   : > { %3144 = vrot.lane.b32.xlu0 %v9903_v38, %s9500_s2 }
 0x789   : > { %v2858_v48 = vpop.xlane.xlu0 %2857 }
 0x78a   : > { %v2861_v18 = vpop.xlane.xlu1 %2860  ;;  %v2880_v59 = vsub.f32 %v10240_v57, %v2858_v48 }
 0x78b   : > { %v2881_v47 = vsub.f32 %v2551_v36, %v2861_v18 }
 0x78c   : > { %v2888_v22 = vmul.f32 1.442695, %v2880_v59 }
 0x78d   : > { %v2890_v17 = vmul.f32 1.442695, %v2881_v47 }
 0x78e   : > { %9359 = vpow2.f32 %v2888_v22 }
 0x78f   : > { %9361 = vpow2.f32 %v2890_v17 }
 0x791   : > { %v2864_v52 = vpop.xlane.xlu0 %2863 }
 0x792   : > { %v2882_v16 = vsub.f32 %v2601_v37, %v2864_v52 }
 0x794   : > { %v2892_v9 = vmul.f32 1.442695, %v2882_v16 }
 0x795   : > { %v2867_v53 = vpop.xlane.xlu0 %2866 }
 0x796   : > { %9363 = vpow2.f32 %v2892_v9  ;;  %v2883_v40 = vsub.f32 %v2651_v58, %v2867_v53 }
 0x798   : > { %v2894_v42 = vmul.f32 1.442695, %v2883_v40 }
 0x799   : > { %v2870_v31 = vpop.xlane.xlu1 %2869 }
 0x79a   : > { %9365 = vpow2.f32 %v2894_v42  ;;  %v2884_v63 = vsub.f32 %v2701_v13, %v2870_v31  ;;  %v2873_v15 = vpop.xlane.xlu0 %2872 }
 0x79b   : > { %v10273_v26 = vpop.eup %9359  ;;  %v2885_v27 = vsub.f32 %v2751_v49, %v2873_v15 }
 0x79c   : > { %v10275_v57 = vpop.eup %9361  ;;  %v2896_v36 = vmul.f32 1.442695, %v2884_v63  ;;  %v2904_v48 = vsel %vm1102_vm6, %v10273_v26, 0.0 }
 0x79d   : > { %v2898_v18 = vmul.f32 1.442695, %v2885_v27  ;;  %v2907_v37 = vsel %vm1102_vm6, %v10275_v57, 0.0  ;;  %2905 = vadd.xlane.f32.xlu1 %v2904_v48 }
 0x79e   : > { %9367 = vpow2.f32 %v2896_v36  ;;  %2908 = vadd.xlane.f32.xlu0 %v2907_v37 }
 0x79f   : > { %9369 = vpow2.f32 %v2898_v18 }
 0x7a1   : > { %v2876_v47 = vpop.xlane.xlu1 %2875 }
 0x7a2   : > { %v2879_v22 = vpop.xlane.xlu0 %2878  ;;  %v2886_v17 = vsub.f32 %v10255_v45, %v2876_v47 }
 0x7a3   : > { %v10281_v58 = vpop.eup %9363  ;;  %v2887_v52 = vsub.f32 %v10258_v20, %v2879_v22 }
 0x7a4   : > { %v2910_v31 = vsel %vm1102_vm6, %v10281_v58, 0.0  ;;  %v2900_v16 = vmul.f32 1.442695, %v2886_v17 }
 0x7a5   : > { %2911 = vadd.xlane.f32.xlu1 %v2910_v31  ;;  %v2902_v9 = vmul.f32 1.442695, %v2887_v52  ;;  %v3054_v31 = vsel %vm1202_vm5, %v10268_v5, 0 }
 0x7a6   : > { %9371 = vpow2.f32 %v2900_v16 }
 0x7a7   : > { %v10285_v15 = vpop.eup %9365  ;;  %9373 = vpow2.f32 %v2902_v9 }
 0x7a8   : > { %v2913_v63 = vsel %vm1102_vm6, %v10285_v15, 0.0 }
 0x7a9   : > { %2914 = vadd.xlane.f32.xlu0 %v2913_v63  ;;  %v3102_v63 = vsel %vm1202_vm5, %v10270_v12, 0 }
 0x7ab   : > { %v10289_v27 = vpop.eup %9367 }
 0x7ac   : > { %v10291_v13 = vpop.eup %9369  ;;  %v2916_v49 = vsel %vm1102_vm6, %v10289_v27, 0.0 }
 0x7ad   : > { %2917 = vadd.xlane.f32.xlu1 %v2916_v49  ;;  %v2919_v59 = vsel %vm1102_vm6, %v10291_v13, 0.0 }
 0x7ae   : > { %2920 = vadd.xlane.f32.xlu0 %v2919_v59 }
 0x7b3   : > { %v10303_v53 = vpop.eup %9371 }
 0x7b4   : > { %v10305_v40 = vpop.eup %9373  ;;  %v2922_v42 = vsel %vm1102_vm6, %v10303_v53, 0.0 }
 0x7b5   : > { %v2925_v36 = vsel %vm1102_vm6, %v10305_v40, 0.0 }
 0x7be   : > { %3288 = vrot.lane.b32.xlu1 %v9930_v30, %s9500_s2 }
 0x7c4   : > { %3240 = vrot.lane.b32.xlu0 %v9946_v44, %s9500_s2 }
 0x7e2   : > { %2923 = vadd.xlane.f32.xlu1 %v2922_v42 }
 0x7e3   : > { %2926 = vadd.xlane.f32.xlu0 %v2925_v36 }
 0x7f3   : > { %3388 = vrot.lane.b32.xlu1 %v9683_v46, %s9501_s17 }
 0x7f7   : > { %3386 = vrot.lane.b32.xlu1 %v9683_v46, %s9502_s21  ;;  %v3145_v46 = vpop.permute.xlu0 %3144 }
 0x7f8   : > { %v3150_v12 = vsel %vm1202_vm5, %v3145_v46, 0 }
 0x7f9   : > { %3338 = vrot.lane.b32.xlu0 %v9674_v41, %s9501_s17 }
 0x7fb   : > { %3488 = vrot.lane.b32.xlu1 %v9699_v56, %s9501_s17 }
 0x7fd   : > { %3336 = vrot.lane.b32.xlu0 %v9674_v41, %s9502_s21  ;;  %v3193_v41 = vpop.permute.xlu1 %3192 }
 0x7ff   : > { %3486 = vrot.lane.b32.xlu1 %v9699_v56, %s9502_s21 }
 0x801   : > { %3438 = vrot.lane.b32.xlu0 %v9690_v51, %s9501_s17 }
 0x803   : > { %3588 = vrot.lane.b32.xlu1 %v9712_v2, %s9501_s17 }
 0x805   : > { %3436 = vrot.lane.b32.xlu0 %v9690_v51, %s9502_s21 }
 0x807   : > { %3586 = vrot.lane.b32.xlu1 %v9712_v2, %s9502_s21 }
 0x809   : > { %3538 = vrot.lane.b32.xlu0 %v9703_v60, %s9501_s17 }
 0x80b   : > { %3688 = vrot.lane.b32.xlu1 %v9723_v11, %s9501_s17 }
 0x80d   : > { %3536 = vrot.lane.b32.xlu0 %v9703_v60, %s9502_s21 }
 0x80f   : > { %3686 = vrot.lane.b32.xlu1 %v9723_v11, %s9502_s21 }
 0x811   : > { %3638 = vrot.lane.b32.xlu0 %v9716_v7, %s9501_s17 }
 0x813   : > { %3832 = vrot.lane.b32.xlu1 %v9780_v33, %s9502_s21 }
 0x815   : > { %3636 = vrot.lane.b32.xlu0 %v9716_v7, %s9502_s21 }
 0x826   : > { %v2906_v51 = vpop.xlane.xlu1 %2905 }
 0x827   : > { %9375 = vrcp.f32 %v2906_v51  ;;  %v2909_v56 = vpop.xlane.xlu0 %2908 }
 0x828   : > { %9377 = vrcp.f32 %v2909_v56 }
 0x82e   : > { %v2912_v2 = vpop.xlane.xlu1 %2911 }
 0x82f   : > { %9379 = vrcp.f32 %v2912_v2 }
 0x832   : > { %v2915_v60 = vpop.xlane.xlu0 %2914 }
 0x833   : > { %9381 = vrcp.f32 %v2915_v60 }
 0x834   : > { %v9376_v11 = vpop.eup %9375 }
 0x835   : > { %v9378_v45 = vpop.eup %9377  ;;  %v2936_v20 = vmul.f32 %v9376_v11, %v10273_v26 }
 0x836   : > { %v2918_v48 = vpop.xlane.xlu1 %2917  ;;  %v2937_v33 = vmul.f32 %v9378_v45, %v10275_v57 }
 0x837   : > { %9383 = vrcp.f32 %v2918_v48  ;;  %v2921_v18 = vpop.xlane.xlu0 %2920  ;;  %v2944_v7 = vpack.c.bf16 %v2936_v20, %v2936_v20 }
 0x838   : > { %9385 = vrcp.f32 %v2921_v18  ;;  %v2945_v37 = vpack.c.bf16 %v2937_v33, %v2937_v33 }
 0x839   : > { %8875 = vmatmul.mubr.msk.bf16.vlgmr.msra.gmra.mxu1 %vm1102_vm6, %v2944_v7 }
 0x83a   : > { %8881 = vmatmul.mubr.msk.bf16.vlgmr.msra.gmra.mxu0 %vm1102_vm6, %v2945_v37  ;;  %8885 = vmatpush3.bf16.msra.mxu1 %v3054_v31  ;;  %v3289_v36 = vpop.permute.xlu1 %3288 }
 0x83b   : > { %8891 = vmatpush3.bf16.msra.mxu0 %v3102_v63  ;;  %8886 = vmatprep.mubr.msk.bf16.mxu1 %vm9495_vm3, %v9494_v34  ;;  %v3241_v16 = vpop.permute.xlu0 %3240 }
 0x83c   : > { %v9380_v26 = vpop.eup %9379  ;;  %8896 = vmatprep.subr.bf16.mxu1 %v9494_v34  ;;  %8892 = vmatprep.mubr.msk.bf16.mxu0 %vm9495_vm3, %v9494_v34  ;;  %v3246_v42 = vsel %vm1202_vm5, %v3241_v16, 0 }
 0x83d   : > { %v2938_v5 = vmul.f32 %v9380_v26, %v10281_v58  ;;  %8902 = vmatprep.subr.bf16.mxu0 %v9494_v34  ;;  %v3198_v58 = vsel %vm1202_vm5, %v3193_v41, 0  ;;  %v3294_v41 = vsel %vm1202_vm5, %v3289_v36, 0 }
 0x83f   : > { %v2946_v57 = vpack.c.bf16 %v2938_v5, %v2938_v5 }
 0x840   : > { %v9382_v49 = vpop.eup %9381 }
 0x841   : > { %8887 = vmatmul.mubr.msk.bf16.vlgmr.msra.gmra.mxu1 %vm1102_vm6, %v2946_v57  ;;  %v2939_v59 = vmul.f32 %v9382_v49, %v10285_v15 }
 0x842   : > { %8897 = vmatpush3.bf16.msra.mxu1 %v3150_v12  ;;  %8898 = vmatprep.mubr.msk.bf16.mxu1 %vm9495_vm3, %v9494_v34 }
 0x843   : > { %v2947_v47 = vpack.c.bf16 %v2939_v59, %v2939_v59  ;;  %8908 = vmatprep.subr.bf16.mxu1 %v9494_v34 }
 0x844   : > { %v9384_v22 = vpop.eup %9383 }
 0x845   : > { %v9386_v17 = vpop.eup %9385  ;;  %8893 = vmatmul.mubr.msk.bf16.vlgmr.msra.gmra.mxu0 %vm1102_vm6, %v2947_v47  ;;  %v2940_v52 = vmul.f32 %v9384_v22, %v10289_v27 }
 0x846   : > { %8903 = vmatpush3.bf16.msra.mxu0 %v3198_v58  ;;  %8904 = vmatprep.mubr.msk.bf16.mxu0 %vm9495_vm3, %v9494_v34  ;;  %v2941_v9 = vmul.f32 %v9386_v17, %v10291_v13 }
 0x847   : > { %v2948_v15 = vpack.c.bf16 %v2940_v52, %v2940_v52  ;;  %8914 = vmatprep.subr.bf16.mxu0 %v9494_v34 }
 0x848   : > { %v2949_v27 = vpack.c.bf16 %v2941_v9, %v2941_v9 }
 0x849   : > { %8899 = vmatmul.mubr.msk.bf16.vlgmr.msra.gmra.mxu1 %vm1102_vm6, %v2948_v15 }
 0x84a   : > { %8909 = vmatpush3.bf16.msra.mxu1 %v3246_v42  ;;  %8910 = vmatprep.mubr.msk.bf16.mxu1 %vm9495_vm3, %v9494_v34 }
 0x84b   : > { %8920 = vmatprep.subr.bf16.mxu1 %v9494_v34 }
 0x84d   : > { %8905 = vmatmul.mubr.msk.bf16.vlgmr.msra.gmra.mxu0 %vm1102_vm6, %v2949_v27 }
 0x84e   : > { %8915 = vmatpush3.bf16.msra.mxu0 %v3294_v41  ;;  %8916 = vmatprep.mubr.msk.bf16.mxu0 %vm9495_vm3, %v9494_v34 }
 0x84f   : > { %8926 = vmatprep.subr.bf16.mxu0 %v9494_v34 }
 0x86b   : > { %v2924_v13 = vpop.xlane.xlu1 %2923 }
 0x86c   : > { %9387 = vrcp.f32 %v2924_v13  ;;  %v2927_v46 = vpop.xlane.xlu0 %2926 }
 0x86d   : > { %9389 = vrcp.f32 %v2927_v46 }
 0x86f   : > { %v3389_v51 = vpop.permute.xlu1 %3388 }
 0x870   : > { %v3339_v56 = vpop.permute.xlu0 %3338  ;;  %v3394_v26 = vsel %vm712_vm4, %v3389_v51, 0 }
 0x871   : > { %v3344_v63 = vsel %vm712_vm4, %v3339_v56, 0 }
 0x873   : > { %v3387_v2 = vpop.permute.xlu1 %3386 }
 0x874   : > { %v3337_v60 = vpop.permute.xlu0 %3336 }
 0x877   : > { %v3489_v11 = vpop.permute.xlu1 %3488 }
 0x878   : > { %v3439_v33 = vpop.permute.xlu0 %3438  ;;  %v3494_v57 = vsel %vm712_vm4, %v3489_v11, 0 }
 0x879   : > { %v9388_v45 = vpop.eup %9387  ;;  %v3444_v5 = vsel %vm712_vm4, %v3439_v33, 0 }
 0x87a   : > { %v9390_v20 = vpop.eup %9389  ;;  %v2942_v48 = vmul.f32 %v9388_v45, %v10303_v53 }
 0x87b   : > { %v2943_v18 = vmul.f32 %v9390_v20, %v10305_v40  ;;  %v3487_v37 = vpop.permute.xlu1 %3486 }
 0x87c   : > { %v2950_v7 = vpack.c.bf16 %v2942_v48, %v2942_v48  ;;  %v3437_v53 = vpop.permute.xlu0 %3436 }
 0x87d   : > { %v2951_v31 = vpack.c.bf16 %v2943_v18, %v2943_v18 }
 0x87e   : > { %8911 = vmatmul.mubr.msk.bf16.vlgmr.msra.gmra.mxu1 %vm1102_vm6, %v2950_v7 }
 0x87f   : > { %8917 = vmatmul.mubr.msk.bf16.vlgmr.msra.gmra.mxu0 %vm1102_vm6, %v2951_v31  ;;  %8921 = vmatpush3.bf16.xpose.msra.mxu1 %v3344_v63  ;;  %v3589_v40 = vpop.permute.xlu1 %3588 }
 0x880   : > { %8927 = vmatpush3.bf16.xpose.msra.mxu0 %v3394_v26  ;;  %8922 = vmatprep.mubr.msk.bf16.mxu1 %vm9495_vm3, %v9494_v34  ;;  %v3539_v49 = vpop.permute.xlu0 %3538  ;;  %v3594_v22 = vsel %vm712_vm4, %v3589_v40, 0 }
 0x881   : > { %8928 = vmatprep.mubr.msk.bf16.mxu0 %vm9495_vm3, %v9494_v34  ;;  %8932 = vmatprep.subr.bf16.mxu1 %v9494_v34  ;;  %v3544_v47 = vsel %vm712_vm4, %v3539_v49, 0 }
 0x882   : > { %8938 = vmatprep.subr.bf16.mxu0 %v9494_v34 }
 0x883   : > { %v3587_v12 = vpop.permute.xlu1 %3586 }
 0x884   : > { %v3537_v59 = vpop.permute.xlu0 %3536 }
 0x886   : > { %8923 = vmatmul.mubr.msk.bf16.vlgmr.msra.gmra.mxu1 %vm712_vm4, %v3337_v60 }
 0x887   : > { %8929 = vmatmul.mubr.msk.bf16.vlgmr.msra.gmra.mxu0 %vm712_vm4, %v3387_v2  ;;  %8933 = vmatpush3.bf16.xpose.msra.mxu1 %v3444_v5  ;;  %v3689_v17 = vpop.permute.xlu1 %3688 }
 0x888   : > { %8939 = vmatpush3.bf16.xpose.msra.mxu0 %v3494_v57  ;;  %8934 = vmatprep.mubr.msk.bf16.mxu1 %vm9495_vm3, %v9494_v34  ;;  %v3639_v58 = vpop.permute.xlu0 %3638  ;;  %v3694_v15 = vsel %vm712_vm4, %v3689_v17, 0 }
 0x889   : > { %8940 = vmatprep.mubr.msk.bf16.mxu0 %vm9495_vm3, %v9494_v34  ;;  %8944 = vmatprep.subr.bf16.mxu1 %v9494_v34  ;;  %v3644_v16 = vsel %vm712_vm4, %v3639_v58, 0 }
 0x88a   : > { %8950 = vmatprep.subr.bf16.mxu0 %v9494_v34 }
 0x88b   : > { %v3687_v52 = vpop.permute.xlu1 %3686 }
 0x88c   : > { %v3637_v42 = vpop.permute.xlu0 %3636 }
 0x88e   : > { %8935 = vmatmul.mubr.msk.bf16.vlgmr.msra.gmra.mxu1 %vm712_vm4, %v3437_v53 }
 0x88f   : > { %8941 = vmatmul.mubr.msk.bf16.vlgmr.msra.gmra.mxu0 %vm712_vm4, %v3487_v37  ;;  %8945 = vmatpush3.bf16.xpose.msra.mxu1 %v3544_v47  ;;  %v3833_v9 = vpop.permute.xlu1 %3832 }
 0x890   : > { %8951 = vmatpush3.bf16.xpose.msra.mxu0 %v3594_v22  ;;  %8946 = vmatprep.mubr.msk.bf16.mxu1 %vm9495_vm3, %v9494_v34  ;;  %v3838_v36 = vsel %vm1202_vm5, %v3833_v9, 0 }
 0x891   : > { %8952 = vmatprep.mubr.msk.bf16.mxu0 %vm9495_vm3, %v9494_v34  ;;  %8956 = vmatprep.subr.bf16.mxu1 %v9494_v34 }
 0x892   : > { %8962 = vmatprep.subr.bf16.mxu0 %v9494_v34 }
 0x896   : > { %8947 = vmatmul.mubr.msk.bf16.vlgmr.msra.gmra.mxu1 %vm712_vm4, %v3537_v59 }
 0x897   : > { %8953 = vmatmul.mubr.msk.bf16.vlgmr.msra.gmra.mxu0 %vm712_vm4, %v3587_v12  ;;  %8957 = vmatpush3.bf16.xpose.msra.mxu1 %v3644_v16 }
 0x898   : > { %8963 = vmatpush3.bf16.xpose.msra.mxu0 %v3694_v15  ;;  %8958 = vmatprep.mubr.msk.bf16.mxu1 %vm9495_vm3, %v9494_v34 }
 0x899   : > { %8964 = vmatprep.mubr.msk.bf16.mxu0 %vm9495_vm3, %v9494_v34  ;;  %8968 = vmatprep.subr.bf16.mxu1 %v9494_v34 }
 0x89a   : > { %8974 = vmatprep.subr.bf16.mxu0 %v9494_v34 }
 0x89e   : > { %8959 = vmatmul.mubr.msk.bf16.vlgmr.msra.gmra.mxu1 %vm712_vm4, %v3637_v42 }
 0x89f   : > { %8965 = vmatmul.mubr.msk.bf16.vlgmr.msra.gmra.mxu0 %vm712_vm4, %v3687_v52  ;;  %8969 = vmatpush3.bf16.msra.mxu1 %v3838_v36 }
 0x8a0   : > { %8970 = vmatprep.mubr.msk.bf16.mxu1 %vm9495_vm3, %v9494_v34  ;;  %8976 = vmatprep.mubr.msk.bf16.mxu0 %vm9495_vm3, %v9494_v34 }
 0x8a1   : > { %8980 = vmatprep.subr.bf16.mxu1 %v9494_v34 }
 0x8f9   : > { %v10433_v27 = vpop.f32.mrf.mxu1 }
 0x8fa   : > { %v10435_v41 = vpop.f32.mrf.mxu0 }
 0x8fb   : > { %v9101_v13 = vpack.i.bf16 %v10435_v41, %v10433_v27  ;;  %v8876_v46 = vpop.f32.mrf.mxu1 }
 0x8fc   : > { %v8882_v51 = vpop.f32.mrf.mxu0 }
 0x8fd   : > { %v2997_v56 = vpop.f32.mrf.mxu1 }
 0x8fe   : > { %v3045_v2 = vpop.f32.mrf.mxu0 }
 0x8ff   : > { %v8877_v60 = vpop.f32.mrf.mxu1 }
 0x900   : > { %v8883_v11 = vpop.f32.mrf.mxu0 }
 0x901   : > { %v10439_v45 = vpop.f32.mrf.mxu1 }
 0x903   : > { %v8888_v20 = vpop.f32.mrf.mxu1 }
 0x905   : > { %v3093_v48 = vpop.f32.mrf.mxu1  ;;  %v10441_v33 = vpop.f32.mrf.mxu0 }
 0x906   : > { %v9106_v18 = vpack.i.bf16 %v10441_v33, %v10439_v45 }
 0x907   : > { %v8889_v7 = vpop.f32.mrf.mxu1  ;;  %v8894_v37 = vpop.f32.mrf.mxu0 }
 0x909   : > { %v3141_v31 = vpop.f32.mrf.mxu0  ;;  %v10445_v63 = vpop.f32.mrf.mxu1 }
 0x90b   : > { %v8895_v26 = vpop.f32.mrf.mxu0  ;;  %v8900_v53 = vpop.f32.mrf.mxu1 }
 0x90d   : > { %v3189_v40 = vpop.f32.mrf.mxu1  ;;  %v10447_v5 = vpop.f32.mrf.mxu0 }
 0x90e   : > { %v9131_v57 = vpack.i.bf16 %v10447_v5, %v10445_v63 }
 0x90f   : > { %v8901_v49 = vpop.f32.mrf.mxu1  ;;  %v8906_v12 = vpop.f32.mrf.mxu0 }
 0x911   : > { %v3237_v59 = vpop.f32.mrf.mxu0 }
 0x913   : > { %v8907_v47 = vpop.f32.mrf.mxu0 }
 0x93e   : > { %v10451_v22 = vpop.f32.mrf.mxu1 }
 0x93f   : > { %v10453_v17 = vpop.f32.mrf.mxu0 }
 0x940   : > { %v9136_v58 = vpack.i.bf16 %v10453_v17, %v10451_v22  ;;  %v8912_v52 = vpop.f32.mrf.mxu1 }
 0x941   : > { %v8918_v16 = vpop.f32.mrf.mxu0 }
 0x942   : > { %v3285_v15 = vpop.f32.mrf.mxu1 }
 0x943   : > { %v3333_v9 = vpop.f32.mrf.mxu0 }
 0x944   : > { %v8913_v42 = vpop.f32.mrf.mxu1 }
 0x945   : > { %v8919_v36 = vpop.f32.mrf.mxu0 }
 0x946   : > { %v3380_v46 = vpop.f32.mrf.mxu1 }
 0x947   : > { %v3381_v51 = vadd.f32 %v3380_v46, %v9593_v4  ;;  %v3430_v56 = vpop.f32.mrf.mxu0 }
 0x948   : > { %v3431_v2 = vadd.f32 %v3430_v56, %v9593_v4  ;;  %v8924_v60 = vpop.f32.mrf.mxu1 }
 0x949   : > { %v8930_v11 = vpop.f32.mrf.mxu0  ;;  %v3736_v20 = vsel %vm1102_vm6, %v3381_v51, -inf }
 0x94a   : > { %v3739_v48 = vsel %vm1102_vm6, %v3431_v2, -inf  ;;  %3737 = vmax.xlane.f32.xlu0 %v3736_v20  ;;  %v3383_v7 = vpop.f32.mrf.mxu1 }
 0x94b   : > { %3740 = vmax.xlane.f32.xlu1 %v3739_v48  ;;  %v3433_v37 = vpop.f32.mrf.mxu0 }
 0x94c   : > { %v8925_v31 = vpop.f32.mrf.mxu1 }
 0x94d   : > { %v8931_v26 = vpop.f32.mrf.mxu0 }
 0x94e   : > { %v3480_v53 = vpop.f32.mrf.mxu1 }
 0x94f   : > { %v3481_v40 = vadd.f32 %v3480_v53, %v9593_v4  ;;  %v3530_v49 = vpop.f32.mrf.mxu0 }
 0x950   : > { %v8936_v12 = vpop.f32.mrf.mxu1  ;;  %v3531_v59 = vadd.f32 %v3530_v49, %v9593_v4 }
 0x951   : > { %v8942_v47 = vpop.f32.mrf.mxu0  ;;  %v3742_v52 = vsel %vm1102_vm6, %v3481_v40, -inf }
 0x952   : > { %3743 = vmax.xlane.f32.xlu0 %v3742_v52  ;;  %v3483_v16 = vpop.f32.mrf.mxu1  ;;  %v3745_v36 = vsel %vm1102_vm6, %v3531_v59, -inf }
 0x953   : > { %v3533_v15 = vpop.f32.mrf.mxu0 }
 0x954   : > { %v8937_v9 = vpop.f32.mrf.mxu1 }
 0x955   : > { %v8943_v42 = vpop.f32.mrf.mxu0 }
 0x956   : > { %3746 = vmax.xlane.f32.xlu0 %v3745_v36  ;;  %v3580_v46 = vpop.f32.mrf.mxu1 }
 0x957   : > { %v3630_v56 = vpop.f32.mrf.mxu0  ;;  %v10466_v60 = vadd.f32 %v3580_v46, %v9593_v4 }
 0x958   : > { %v10469_v11 = vadd.f32 %v3630_v56, %v9593_v4  ;;  %v8948_v20 = vpop.f32.mrf.mxu1 }
 0x959   : > { %v8954_v48 = vpop.f32.mrf.mxu0  ;;  %v3748_v7 = vsel %vm1102_vm6, %v10466_v60, -inf }
 0x95a   : > { %v3751_v37 = vsel %vm1102_vm6, %v10469_v11, -inf  ;;  %3749 = vmax.xlane.f32.xlu1 %v3748_v7  ;;  %v3583_v31 = vpop.f32.mrf.mxu1 }
 0x95b   : > { %v3633_v26 = vpop.f32.mrf.mxu0  ;;  %3752 = vmax.xlane.f32.xlu0 %v3751_v37 }
 0x95c   : > { %v8949_v53 = vpop.f32.mrf.mxu1 }
 0x95d   : > { %v8955_v49 = vpop.f32.mrf.mxu0 }
 0x95e   : > { %v3680_v12 = vpop.f32.mrf.mxu1 }
 0x95f   : > { %v3681_v47 = vadd.f32 %v3680_v12, %v9593_v4  ;;  %v3730_v52 = vpop.f32.mrf.mxu0 }
 0x960   : > { %v3731_v16 = vadd.f32 %v3730_v52, %v9593_v4  ;;  %v8960_v15 = vpop.f32.mrf.mxu1 }
 0x961   : > { %v8966_v9 = vpop.f32.mrf.mxu0  ;;  %v3754_v42 = vsel %vm1102_vm6, %v3681_v47, -inf }
 0x962   : > { %v3757_v36 = vsel %vm1102_vm6, %v3731_v16, -inf  ;;  %3755 = vmax.xlane.f32.xlu1 %v3754_v42  ;;  %v3683_v46 = vpop.f32.mrf.mxu1 }
 0x963   : > { %v3733_v56 = vpop.f32.mrf.mxu0  ;;  %3758 = vmax.xlane.f32.xlu0 %v3757_v36 }
 0x964   : > { %v8961_v20 = vpop.f32.mrf.mxu1 }
 0x965   : > { %v8967_v48 = vpop.f32.mrf.mxu0 }
 0x973   : > { %3928 = vrot.lane.b32.xlu1 %v9873_v54, %s9502_s21 }
 0x977   : > { %3976 = vrot.lane.b32.xlu1 %v9888_v6, %s9502_s21 }
 0x979   : > { %3880 = vrot.lane.b32.xlu0 %v9758_v28, %s9502_s21 }
 0x9d3   : > { %v3738_v4 = vpop.xlane.xlu0 %3737 }
 0x9d4   : > { %v3741_v7 = vpop.xlane.xlu1 %3740  ;;  %v3760_v37 = vsub.f32 %v3381_v51, %v3738_v4 }
 0x9d5   : > { %v3761_v31 = vsub.f32 %v3431_v2, %v3741_v7 }
 0x9d6   : > { %v3768_v26 = vmul.f32 1.442695, %v3760_v37 }
 0x9d7   : > { %v3770_v53 = vmul.f32 1.442695, %v3761_v31 }
 0x9d8   : > { %9391 = vpow2.f32 %v3768_v26 }
 0x9d9   : > { %9393 = vpow2.f32 %v3770_v53 }
 0x9db   : > { %v3744_v49 = vpop.xlane.xlu0 %3743 }
 0x9dc   : > { %v3762_v12 = vsub.f32 %v3481_v40, %v3744_v49 }
 0x9de   : > { %v3772_v52 = vmul.f32 1.442695, %v3762_v12 }
 0x9df   : > { %v3747_v15 = vpop.xlane.xlu0 %3746 }
 0x9e0   : > { %9395 = vpow2.f32 %v3772_v52  ;;  %v3763_v54 = vsub.f32 %v3531_v59, %v3747_v15 }
 0x9e2   : > { %v3774_v9 = vmul.f32 1.442695, %v3763_v54 }
 0x9e3   : > { %v3750_v4 = vpop.xlane.xlu1 %3749 }
 0x9e4   : > { %9397 = vpow2.f32 %v3774_v9  ;;  %v3753_v2 = vpop.xlane.xlu0 %3752  ;;  %v3764_v7 = vsub.f32 %v10466_v60, %v3750_v4 }
 0x9e5   : > { %v10485_v6 = vpop.eup %9391  ;;  %v3765_v31 = vsub.f32 %v10469_v11, %v3753_v2 }
 0x9e6   : > { %v10487_v42 = vpop.eup %9393  ;;  %v3784_v28 = vsel %vm1102_vm6, %v10485_v6, 0.0  ;;  %v3776_v26 = vmul.f32 1.442695, %v3764_v7 }
 0x9e7   : > { %v3787_v51 = vsel %vm1102_vm6, %v10487_v42, 0.0  ;;  %3785 = vadd.xlane.f32.xlu1 %v3784_v28  ;;  %v3778_v49 = vmul.f32 1.442695, %v3765_v31  ;;  %v11660_v28 = vpack.i.bf16 %v10223_v29, %v10221_v23 }
 0x9e8   : > { %3788 = vadd.xlane.f32.xlu0 %v3787_v51  ;;  %9399 = vpow2.f32 %v3776_v26  ;;  %v11661_v51 = vpack.i.bf16 %v10215_v19, %v10217_v24 }
 0x9e9   : > { %9401 = vpow2.f32 %v3778_v49 }
 0x9eb   : > { %v3756_v37 = vpop.xlane.xlu1 %3755 }
 0x9ec   : > { %v3759_v40 = vpop.xlane.xlu0 %3758  ;;  %v3766_v53 = vsub.f32 %v3681_v47, %v3756_v37 }
 0x9ed   : > { %v10493_v36 = vpop.eup %9395  ;;  %v3767_v52 = vsub.f32 %v3731_v16, %v3759_v40 }
 0x9ee   : > { %v3790_v59 = vsel %vm1102_vm6, %v10493_v36, 0.0  ;;  %v3780_v12 = vmul.f32 1.442695, %v3766_v53 }
 0x9ef   : > { %3791 = vadd.xlane.f32.xlu1 %v3790_v59  ;;  %v3782_v15 = vmul.f32 1.442695, %v3767_v52 }
 0x9f0   : > { %v3881_v46 = vpop.permute.xlu0 %3880  ;;  %9403 = vpow2.f32 %v3780_v12 }
 0x9f1   : > { %v10497_v56 = vpop.eup %9397  ;;  %v3886_v20 = vsel %vm1202_vm5, %v3881_v46, 0  ;;  %9405 = vpow2.f32 %v3782_v15 }
 0x9f2   : > { %8975 = vmatpush3.bf16.msra.mxu0 %v3886_v20  ;;  %v3793_v48 = vsel %vm1102_vm6, %v10497_v56, 0.0 }
 0x9f3   : > { %3794 = vadd.xlane.f32.xlu0 %v3793_v48  ;;  %8986 = vmatprep.subr.bf16.mxu0 %v9494_v34 }
 0xa00   : > { %4072 = vrot.lane.b32.xlu1 %v9918_v21, %s9502_s21  ;;  %v10509_v21 = vpop.eup %9399 }
 0xa01   : > { %v10511_v54 = vpop.eup %9401 }
 0xa02   : > { %v10515_v60 = vpop.eup %9403  ;;  %v3799_v47 = vsel %vm1102_vm6, %v10511_v54, 0.0 }
 0xa03   : > { %v3802_v11 = vsel %vm1102_vm6, %v10515_v60, 0.0  ;;  %v10521_v16 = vpop.eup %9405 }
 0xa04   : > { %v3805_v9 = vsel %vm1102_vm6, %v10521_v16, 0.0 }
 0xa09   : > { %4024 = vrot.lane.b32.xlu0 %v9903_v38, %s9502_s21  ;;  %v3796_v38 = vsel %vm1102_vm6, %v10509_v21, 0.0 }
 0xa24   : > { %3797 = vadd.xlane.f32.xlu1 %v3796_v38 }
 0xa28   : > { %3803 = vadd.xlane.f32.xlu1 %v3802_v11  ;;  %3800 = vadd.xlane.f32.xlu0 %v3799_v47 }
 0xa2c   : > { %3806 = vadd.xlane.f32.xlu0 %v3805_v9 }
 0xa39   : > { %4168 = vrot.lane.b32.xlu1 %v9930_v30, %s9502_s21  ;;  %v3929_v30 = vpop.permute.xlu1 %3928 }
 0xa3a   : > { %v3934_v27 = vsel %vm1202_vm5, %v3929_v30, 0 }
 0xa3d   : > { %9097 = vrot.lane.b32.xlu1 %v11660_v28, %s9501_s17  ;;  %v3977_v23 = vpop.permute.xlu1 %3976 }
 0xa3e   : > { %v3982_v41 = vsel %vm1202_vm5, %v3977_v23, 0 }
 0xa41   : > { %9107 = vrot.lane.b32.xlu1 %v9106_v18, %s9499_s1 }
 0xa42   : > { %4120 = vrot.lane.b32.xlu0 %v9946_v44, %s9502_s21 }
 0xa46   : > { %9092 = vrot.lane.b32.xlu0 %v11661_v51, %s9501_s17 }
 0xa4a   : > { %9102 = vrot.lane.b32.xlu0 %v9101_v13, %s9499_s1 }
 0xa70   : > { %v3786_v29 = vpop.xlane.xlu1 %3785 }
 0xa71   : > { %9407 = vrcp.f32 %v3786_v29  ;;  %v3789_v2 = vpop.xlane.xlu0 %3788 }
 0xa72   : > { %9409 = vrcp.f32 %v3789_v2 }
 0xa78   : > { %v3792_v45 = vpop.xlane.xlu1 %3791 }
 0xa79   : > { %9411 = vrcp.f32 %v3792_v45  ;;  %v9163_v45 = vld [vmem:[%s9598_s30 + $0x18] sm:$0xff]  }
 0xa7c   : > { %v3795_v33 = vpop.xlane.xlu0 %3794  ;;  %v4073_v7 = vpop.permute.xlu1 %4072 }
 0xa7d   : > { %9413 = vrcp.f32 %v3795_v33  ;;  %v9164_v33 = vld [vmem:[%s9598_s30 + $0x10] sm:$0xff]  }
 0xa7e   : > { %v9408_v44 = vpop.eup %9407 }
 0xa7f   : > { %v9410_v18 = vpop.eup %9409  ;;  %v3816_v19 = vmul.f32 %v9408_v44, %v10485_v6  ;;  %v9165_v44 = vld [vmem:[%s9598_s30 + $0x8] sm:$0xff]  }
 0xa80   : > { %v3817_v24 = vmul.f32 %v9410_v18, %v10487_v42  ;;  %v4025_v42 = vpop.permute.xlu0 %4024 }
 0xa81   : > { %v3824_v40 = vpack.c.bf16 %v3816_v19, %v3816_v19  ;;  %v4030_v4 = vsel %vm1202_vm5, %v4025_v42, 0 }
 0xa82   : > { %v3825_v59 = vpack.c.bf16 %v3817_v24, %v3817_v24 }
 0xa83   : > { %8971 = vmatmul.mubr.msk.bf16.vlgmr.msra.gmra.mxu1 %vm1102_vm6, %v3824_v40  ;;  %v9166_v40 = vld [vmem:[%s9598_s30] sm:$0xff]  }
 0xa84   : > { %8977 = vmatmul.mubr.msk.bf16.vlgmr.msra.gmra.mxu0 %vm1102_vm6, %v3825_v59  ;;  %8981 = vmatpush3.bf16.msra.mxu1 %v3934_v27 }
 0xa85   : > { %8987 = vmatpush3.bf16.msra.mxu0 %v3982_v41  ;;  %8982 = vmatprep.mubr.msk.bf16.mxu1 %vm9495_vm3, %v9494_v34 }
 0xa86   : > { %v9412_v13 = vpop.eup %9411  ;;  %8992 = vmatprep.subr.bf16.mxu1 %v9494_v34  ;;  %8988 = vmatprep.mubr.msk.bf16.mxu0 %vm9495_vm3, %v9494_v34 }
 0xa87   : > { %v3818_v6 = vmul.f32 %v9412_v13, %v10493_v36  ;;  %8998 = vmatprep.subr.bf16.mxu0 %v9494_v34  ;;  %v4078_v36 = vsel %vm1202_vm5, %v4073_v7, 0 }
 0xa89   : > { %v3826_v46 = vpack.c.bf16 %v3818_v6, %v3818_v6  ;;  %v11663_v6 = vpack.i.bf16 %v10229_v8, %v10227_v10  ;;  %v11664_v10 = vpack.i.bf16 %v10235_v0, %v10233_v14 }
 0xa8a   : > { %v9414_v20 = vpop.eup %9413 }
 0xa8b   : > { %v3819_v48 = vmul.f32 %v9414_v20, %v10497_v56  ;;  %8983 = vmatmul.mubr.msk.bf16.vlgmr.msra.gmra.mxu1 %vm1102_vm6, %v3826_v46 }
 0xa8c   : > { %8993 = vmatpush3.bf16.msra.mxu1 %v4030_v4  ;;  %8994 = vmatprep.mubr.msk.bf16.mxu1 %vm9495_vm3, %v9494_v34 }
 0xa8d   : > { %v3827_v37 = vpack.c.bf16 %v3819_v48, %v3819_v48  ;;  %9004 = vmatprep.subr.bf16.mxu1 %v9494_v34 }
 0xa8f   : > { %8989 = vmatmul.mubr.msk.bf16.vlgmr.msra.gmra.mxu0 %vm1102_vm6, %v3827_v37 }
 0xa90   : > { %8999 = vmatpush3.bf16.msra.mxu0 %v4078_v36  ;;  %9000 = vmatprep.mubr.msk.bf16.mxu0 %vm9495_vm3, %v9494_v34 }
 0xa91   : > { %9010 = vmatprep.subr.bf16.mxu0 %v9494_v34 }
 0xaad   : > { %v3798_v56 = vpop.xlane.xlu1 %3797 }
 0xaae   : > { %9415 = vrcp.f32 %v3798_v56 }
 0xab1   : > { %v3804_v31 = vpop.xlane.xlu1 %3803  ;;  %v3801_v26 = vpop.xlane.xlu0 %3800 }
 0xab2   : > { %9417 = vrcp.f32 %v3804_v31 }
 0xab3   : > { %9419 = vrcp.f32 %v3801_v26 }
 0xab5   : > { %v3807_v53 = vpop.xlane.xlu0 %3806  ;;  %v4169_v51 = vpop.permute.xlu1 %4168 }
 0xab6   : > { %9421 = vrcp.f32 %v3807_v53  ;;  %v4174_v23 = vsel %vm1202_vm5, %v4169_v51, 0 }
 0xab9   : > { %v4121_v52 = vpop.permute.xlu0 %4120 }
 0xaba   : > { %v4126_v47 = vsel %vm1202_vm5, %v4121_v52, 0 }
 0xabb   : > { %v9416_v49 = vpop.eup %9415 }
 0xabc   : > { %v3820_v12 = vmul.f32 %v9416_v49, %v10509_v21 }
 0xabe   : > { %v3828_v15 = vpack.c.bf16 %v3820_v12, %v3820_v12 }
 0xabf   : > { %v9418_v38 = vpop.eup %9417 }
 0xac0   : > { %v9420_v11 = vpop.eup %9419  ;;  %8995 = vmatmul.mubr.msk.bf16.vlgmr.msra.gmra.mxu1 %vm1102_vm6, %v3828_v15  ;;  %v3822_v28 = vmul.f32 %v9418_v38, %v10515_v60  ;;  %v11662_v60 = vmov 0  }
 0xac1   : > { %v3821_v9 = vmul.f32 %v9420_v11, %v10511_v54  ;;  %9005 = vmatpush3.bf16.msra.mxu1 %v4126_v47  ;;  %9006 = vmatprep.mubr.msk.bf16.mxu1 %vm9495_vm3, %v9494_v34 }
 0xac2   : > { %v3830_v29 = vpack.c.bf16 %v3822_v28, %v3822_v28  ;;  %9016 = vmatprep.subr.bf16.mxu1 %v9163_v45 }
 0xac3   : > { %v3829_v21 = vpack.c.bf16 %v3821_v9, %v3821_v9  ;;  %v9422_v30 = vpop.eup %9421 }
 0xac4   : > { %v3823_v54 = vmul.f32 %v9422_v30, %v10521_v16 }
 0xac5   : > { %9001 = vmatmul.mubr.msk.bf16.vlgmr.msra.gmra.mxu0 %vm1102_vm6, %v3829_v21 }
 0xac6   : > { %9011 = vmatpush3.bf16.msra.mxu0 %v4174_v23  ;;  %9012 = vmatprep.mubr.msk.bf16.mxu0 %vm9495_vm3, %v9494_v34  ;;  %v3831_v2 = vpack.c.bf16 %v3823_v54, %v3823_v54  ;;  %v9098_v23 = vpop.permute.xlu1 %9097 }
 0xac8   : > { %9007 = vmatmul.mubr.msk.bf16.vlgmr.msra.gmra.mxu1 %vm1102_vm6, %v3830_v29 }
 0xac9   : > { %9017 = vmatpush3.bf16.msra.mxu1 %v9163_v45 }
 0xaca   : > { %9018 = vmatprep.subr.bf16.mxu1 %v9164_v33 }
 0xacd   : > { %9013 = vmatmul.mubr.msk.bf16.vlgmr.msra.gmra.mxu0 %vm1102_vm6, %v3831_v2  ;;  %9019 = vmatpush3.bf16.msra.mxu1 %v9164_v33 }
 0xace   : > { %5108 = vmatprep.mubr.bf16.mxu0 %v11662_v60  ;;  %9020 = vmatprep.subr.bf16.mxu1 %v9165_v44 }
 0xad1   : > { %9021 = vmatpush3.bf16.msra.mxu1 %v9165_v44 }
 0xad2   : > { %9022 = vmatprep.subr.bf16.mxu1 %v9166_v40 }
 0xad5   : > { %9023 = vmatpush3.bf16.msra.mxu1 %v9166_v40  ;;  %v9100_v40 = vunpack.i.h.bf16 %v9098_v23 }
 0xb43   : > { %v3874_v18 = vpop.f32.mrf.mxu1 }
 0xb44   : > { %v3922_v19 = vpop.f32.mrf.mxu0 }
 0xb45   : > { %v9111_v34 = vpack.i.bf16 %v3922_v19, %v3874_v18  ;;  %v8972_v16 = vpop.f32.mrf.mxu1 }
 0xb46   : > { %v8978_v24 = vpop.f32.mrf.mxu0 }
 0xb47   : > { %9112 = vrot.lane.b32.xlu0 %v9111_v34, %s9497_s25  ;;  %v3877_v59 = vpop.f32.mrf.mxu1  ;;  %v9108_v24 = vpop.permute.xlu1 %9107 }
 0xb48   : > { %v3925_v27 = vpop.f32.mrf.mxu0  ;;  %v9099_v59 = vunpack.i.l.bf16 %v9098_v23  ;;  %v10646_v23 = vld [vmem:[%s9618_s3] sm:$0x3f] }
 0xb49   : > { %v8973_v41 = vpop.f32.mrf.mxu1  ;;  %v9109_v27 = vunpack.i.l.bf16 %v9108_v24 }
 0xb4a   : > { %v8979_v13 = vpop.f32.mrf.mxu0 }
 0xb4b   : > { %9122 = vrot.lane.b32.xlu0 %v11663_v6, %s9501_s17  ;;  %v3970_v42 = vpop.f32.mrf.mxu1  ;;  %v4314_v13 = vsel %vm712_vm4, %v10005_v39, %v9099_v59  ;;  %v9457_v59 = vld [vmem:[#allocation2 + $0x8] sm:$0xff] }
 0xb4d   : > { %v8984_v46 = vpop.f32.mrf.mxu1 }
 0xb4e   : > { %v4323_v46 = vsel %vm4320_vm7, %v4314_v13, %v9109_v27  ;;  %v9458_v27 = vld [vmem:[#allocation2 + $0x18] sm:$0xff] }
 0xb4f   : > { %9132 = vrot.lane.b32.xlu0 %v9131_v57, %s9499_s1  ;;  %v3973_v20 = vpop.f32.mrf.mxu1  ;;  %v4018_v48 = vpop.f32.mrf.mxu0 }
 0xb50   : > { %v9116_v4 = vpack.i.bf16 %v4018_v48, %v3970_v42 }
 0xb51   : > { %v8985_v7 = vpop.f32.mrf.mxu1  ;;  %v8990_v37 = vpop.f32.mrf.mxu0 }
 0xb52   : > { %9117 = vrot.lane.b32.xlu1 %v9116_v4, %s9497_s25 }
 0xb53   : > { %v4021_v36 = vpop.f32.mrf.mxu0 }
 0xb55   : > { %v8991_v56 = vpop.f32.mrf.mxu0 }
 0xb56   : > { %9127 = vrot.lane.b32.xlu1 %v11664_v10, %s9501_s17 }
 0xb5a   : > { %9137 = vrot.lane.b32.xlu1 %v9136_v58, %s9499_s1  ;;  %v9093_v58 = vpop.permute.xlu0 %9092 }
 0xb5b   : > { %v9095_v28 = vunpack.i.h.bf16 %v9093_v58  ;;  %v9094_v51 = vunpack.i.l.bf16 %v9093_v58 }
 0xb5d   : > { %v4313_v54 = vsel %vm712_vm4, %v10003_v32, %v9095_v28  ;;  %v4312_v2 = vsel %vm712_vm4, %v10001_v25, %v9094_v51  ;;  %v9110_v32 = vunpack.i.h.bf16 %v9108_v24  ;;  %v4315_v25 = vsel %vm712_vm4, %v10007_v50, %v9100_v40 }
 0xb5e   : > { %v9103_v9 = vpop.permute.xlu0 %9102 }
 0xb5f   : > { %v9105_v21 = vunpack.i.h.bf16 %v9103_v9  ;;  %v9104_v30 = vunpack.i.l.bf16 %v9103_v9  ;;  %v4324_v20 = vsel %vm4320_vm7, %v4315_v25, %v9110_v32 }
 0xb61   : > { %v4321_v44 = vsel %vm4320_vm7, %v4312_v2, %v9104_v30  ;;  %v4322_v18 = vsel %vm4320_vm7, %v4313_v54, %v9105_v21 }
 0xb80   : > { %v4066_v8 = vpop.f32.mrf.mxu1 }
 0xb82   : > { %v8996_v63 = vpop.f32.mrf.mxu1 }
 0xb84   : > { %v4069_v5 = vpop.f32.mrf.mxu1 }
 0xb85   : > { %v4114_v57 = vpop.f32.mrf.mxu0 }
 0xb86   : > { %v9141_v31 = vpack.i.bf16 %v4114_v57, %v4066_v8  ;;  %v8997_v26 = vpop.f32.mrf.mxu1 }
 0xb87   : > { %v9002_v53 = vpop.f32.mrf.mxu0 }
 0xb88   : > { %9142 = vrot.lane.b32.xlu0 %v9141_v31, %s9497_s25  ;;  %v4162_v49 = vpop.f32.mrf.mxu1 }
 0xb89   : > { %v4117_v12 = vpop.f32.mrf.mxu0 }
 0xb8a   : > { %v9008_v52 = vpop.f32.mrf.mxu1 }
 0xb8b   : > { %v9003_v15 = vpop.f32.mrf.mxu0 }
 0xb8c   : > { %v4165_v14 = vpop.f32.mrf.mxu1 }
 0xb8d   : > { %v4210_v0 = vpop.f32.mrf.mxu0 }
 0xb8e   : > { %v9146_v38 = vpack.i.bf16 %v4210_v0, %v4162_v49  ;;  %v9009_v11 = vpop.f32.mrf.mxu1 }
 0xb8f   : > { %v9014_v47 = vpop.f32.mrf.mxu0 }
 0xb90   : > { %9147 = vrot.lane.b32.xlu1 %v9146_v38, %s9497_s25 }
 0xb91   : > { %v4213_v22 = vpop.f32.mrf.mxu0 }
 0xb93   : > { %v9015_v17 = vpop.f32.mrf.mxu0 }
 0xbb9   : > { %v9113_v29 = vpop.permute.xlu0 %9112 }
 0xbba   : > { %v9115_v45 = vunpack.i.h.bf16 %v9113_v29  ;;  %v9114_v33 = vunpack.i.l.bf16 %v9113_v29 }
 0xbbc   : > { %v4330_v19 = vsel %vm4329_vm8, %v4321_v44, %v9114_v33  ;;  %v4331_v34 = vsel %vm4329_vm8, %v4322_v18, %v9115_v45  ;;  %v9455_v33 = vld [vmem:[#allocation2] sm:$0xff] }
 0xbbd   : > { %v4338_v16 = vpack.c.bf16 %v4331_v34, %v4330_v19  ;;  %v9123_v37 = vpop.permute.xlu0 %9122  ;;  %v9456_v19 = vld [vmem:[#allocation2 + $0x10] sm:$0xff] }
 0xbbe   : > { %v9125_v56 = vunpack.i.h.bf16 %v9123_v37  ;;  %v9124_v50 = vunpack.i.l.bf16 %v9123_v37 }
 0xbbf   : > { %9024 = vmatprep.mubr.msk.bf16.mxu1 %vm607_vm2, %v4338_v16 }
 0xbc0   : > { %v4317_v5 = vsel %vm712_vm4, %v10009_v62, %v9125_v56  ;;  %v4316_v57 = vsel %vm712_vm4, %v10013_v55, %v9124_v50  ;;  %v9460_v56 = vld [vmem:[#allocation2 + $0x30] sm:$0xff] }
 0xbc1   : > { %v9133_v36 = vpop.permute.xlu0 %9132 }
 0xbc2   : > { %v9135_v8 = vunpack.i.h.bf16 %v9133_v36  ;;  %v9134_v39 = vunpack.i.l.bf16 %v9133_v36 }
 0xbc4   : > { %v9118_v41 = vpop.permute.xlu1 %9117  ;;  %v4325_v53 = vsel %vm4320_vm7, %v4316_v57, %v9134_v39  ;;  %v4326_v49 = vsel %vm4320_vm7, %v4317_v5, %v9135_v8  ;;  %v9462_v57 = vld [vmem:[#allocation2 + $0x38] sm:$0xff] }
 0xbc5   : > { %v9120_v6 = vunpack.i.h.bf16 %v9118_v41  ;;  %v9119_v42 = vunpack.i.l.bf16 %v9118_v41 }
 0xbc7   : > { %v4333_v48 = vsel %vm4329_vm8, %v4324_v20, %v9120_v6  ;;  %v4332_v4 = vsel %vm4329_vm8, %v4323_v46, %v9119_v42 }
 0xbc8   : > { %v4339_v7 = vpack.c.bf16 %v4333_v48, %v4332_v4  ;;  %v9128_v10 = vpop.permute.xlu1 %9127 }
 0xbc9   : > { %v9130_v0 = vunpack.i.h.bf16 %v9128_v10  ;;  %v9129_v38 = vunpack.i.l.bf16 %v9128_v10 }
 0xbca   : > { %9025 = vmatmul.mubr.msk.bf16.vlgmr.msra.gmra.mxu1 %vm607_vm2, %v4339_v7  ;;  %v9459_v7 = vld [vmem:[#allocation2 + $0x20] sm:$0xff] }
 0xbcb   : > { %v4319_v47 = vsel %vm712_vm4, %v10011_v3, %v9130_v0  ;;  %v4318_v22 = vsel %vm712_vm4, %v10020_v61, %v9129_v38  ;;  %v4353_v3 = vrot.slane %v10646_v23, %v9664_v35 }
 0xbcc   : > { %v9138_v12 = vpop.permute.xlu1 %9137 }
 0xbcd   : > { %v9140_v11 = vunpack.i.h.bf16 %v9138_v12  ;;  %v9139_v62 = vunpack.i.l.bf16 %v9138_v12 }
 0xbcf   : > { %v4327_v9 = vsel %vm4320_vm7, %v4318_v22, %v9139_v62  ;;  %v4328_v28 = vsel %vm4320_vm7, %v4319_v47, %v9140_v11 }
 0xbfa   : > { %v9143_v63 = vpop.permute.xlu0 %9142 }
 0xbfb   : > { %v9145_v31 = vunpack.i.h.bf16 %v9143_v63  ;;  %v9144_v26 = vunpack.i.l.bf16 %v9143_v63  ;;  %v9461_v63 = vld [vmem:[#allocation2 + $0x28] sm:$0xff] }
 0xbfd   : > { %v4334_v52 = vsel %vm4329_vm8, %v4325_v53, %v9144_v26  ;;  %v4335_v15 = vsel %vm4329_vm8, %v4326_v49, %v9145_v31 }
 0xbfe   : > { %v4340_v14 = vpack.c.bf16 %v4335_v15, %v4334_v52 }
 0xc00   : > { %9028 = vmatprep.mubr.msk.bf16.mxu1 %vm607_vm2, %v4340_v14 }
 0xc02   : > { %v9148_v55 = vpop.permute.xlu1 %9147 }
 0xc03   : > { %v9150_v17 = vunpack.i.h.bf16 %v9148_v55  ;;  %v9149_v58 = vunpack.i.l.bf16 %v9148_v55 }
 0xc05   : > { %v4337_v51 = vsel %vm4329_vm8, %v4328_v28, %v9150_v17  ;;  %v4336_v21 = vsel %vm4329_vm8, %v4327_v9, %v9149_v58 }
 0xc06   : > { %v4341_v30 = vpack.c.bf16 %v4337_v51, %v4336_v21 }
 0xc08   : > { %9029 = vmatmul.mubr.msk.bf16.gmra.mxu1 %vm607_vm2, %v4341_v30 }
 0xc09   : > { %5181 = vmatprep.mubr.bf16.mxu1 %v11662_v60 }
 0xc8a   : > { %v9026_v61 = vpop.f32.mrf.mxu1 }
 0xc8b   : > { %v4433_v54 = vadd.f32 %v9026_v61, %v4353_v3 }
 0xc8c   : > { %v4424_v29 = vpop.f32.mrf.mxu1 }
 0xc8d   : > { %v4425_v2 = vadd.f32 %v4424_v29, %v4353_v3  ;;  %v4457_v34 = vadd.f32 %v9456_v19, %v4433_v54  ;;  %v4644_v29 = vld [vmem:[%s9603_s18 + $0x180] sm:$0xff] }
 0xc8e   : > { %v9027_v45 = vpop.f32.mrf.mxu1  ;;  %v4652_v54 = vld [vmem:[%s9603_s18 + $0x1c0] sm:$0xff] }
 0xc8f   : > { %v4455_v44 = vadd.f32 %v9455_v33, %v4425_v2  ;;  %v4436_v16 = vadd.f32 %v9027_v45, %v4353_v3  ;;  %v4469_v13 = vsel %vm607_vm2, %v4457_v34, 0.0  ;;  %v4645_v2 = vld [vmem:[%s9603_s18 + $0x188] sm:$0xff]  ;;  %v7975_v45 = vcombine.high %v4644_v29, %v4652_v54 }
 0xc90   : > { %v4427_v18 = vpop.f32.mrf.mxu1  ;;  %v4653_v33 = vld [vmem:[%s9603_s18 + $0x1c8] sm:$0xff] }
 0xc91   : > { %v4428_v24 = vadd.f32 %v4427_v18, %v4353_v3  ;;  %v4463_v40 = vsel %vm607_vm2, %v4455_v44, 0.0  ;;  %v4458_v41 = vadd.f32 %v9458_v27, %v4436_v16  ;;  %v7976_v18 = vcombine.low %v4645_v2, %v4653_v33  ;;  %5084 = vmatprep.subr.bf16.mxu0 %v7975_v45  ;;  %v4636_v16 = vld [vmem:[%s9603_s18 + $0x140] sm:$0xff] }
 0xc92   : > { %4464 = vadd.xlane.f32.xlu0 %v4463_v40  ;;  %v7977_v19 = vcombine.high %v4645_v2, %v4653_v33 }
 0xc93   : > { %v4456_v32 = vadd.f32 %v9457_v59, %v4428_v24  ;;  %v4472_v6 = vsel %vm607_vm2, %v4458_v41, 0.0  ;;  %v4629_v24 = vld [vmem:[%s9603_s18 + $0x108] sm:$0xff] }
 0xc94   : > { %5157 = vmatprep.subr.bf16.mxu1 %v7977_v19  ;;  %v4637_v59 = vld [vmem:[%s9603_s18 + $0x148] sm:$0xff] }
 0xc95   : > { %v4466_v25 = vsel %vm607_vm2, %v4456_v32, 0.0  ;;  %5158 = vmatpush1.bf16.msra.mxu1 %v7976_v18  ;;  %v7960_v27 = vcombine.low %v4629_v24, %v4637_v59  ;;  %v10750_v18 = vld [vmem:[%s9603_s18 + $0x1e0] sm:$0xff] }
 0xc96   : > { %4467 = vadd.xlane.f32.xlu1 %v4466_v25  ;;  %4470 = vadd.xlane.f32.xlu0 %v4469_v13  ;;  %v4612_v25 = vld [vmem:[%s9603_s18 + $0x80] sm:$0xff] }
 0xc97   : > { %v4620_v13 = vld [vmem:[%s9603_s18 + $0xc0] sm:$0xff] }
 0xc9a   : > { %4473 = vadd.xlane.f32.xlu0 %v4472_v6  ;;  %v4613_v6 = vld [vmem:[%s9603_s18 + $0x88] sm:$0xff] }
 0xcc8   : > { %v9030_v42 = vpop.f32.mrf.mxu1 }
 0xcc9   : > { %v4449_v20 = vadd.f32 %v9030_v42, %v4353_v3  ;;  %v7943_v42 = vcombine.high %v4612_v25, %v4620_v13 }
 0xcca   : > { %v4440_v46 = vpop.f32.mrf.mxu1 }
 0xccb   : > { %v4441_v48 = vadd.f32 %v4440_v46, %v4353_v3  ;;  %v10656_v50 = vadd.f32 %v9460_v56, %v4449_v20  ;;  %v4621_v46 = vld [vmem:[%s9603_s18 + $0xc8] sm:$0xff]  ;;  %v7942_v20 = vcombine.low %v4612_v25, %v4620_v13 }
 0xccc   : > { %v9031_v4 = vpop.f32.mrf.mxu1  ;;  %v4597_v56 = vld [vmem:[%s9603_s18 + $0x8] sm:$0xff] }
 0xccd   : > { %v10654_v37 = vadd.f32 %v9459_v7, %v4441_v48  ;;  %v4452_v10 = vadd.f32 %v9031_v4, %v4353_v3  ;;  %v4481_v26 = vsel %vm607_vm2, %v10656_v50, 0.0  ;;  %v7944_v48 = vcombine.low %v4613_v6, %v4621_v46  ;;  %v4596_v7 = vld [vmem:[%s9603_s18] sm:$0xff] }
 0xcce   : > { %v4443_v36 = vpop.f32.mrf.mxu1  ;;  %v7945_v4 = vcombine.high %v4613_v6, %v4621_v46 }
 0xccf   : > { %v4444_v8 = vadd.f32 %v4443_v36, %v4353_v3  ;;  %v4475_v39 = vsel %vm607_vm2, %v10654_v37, 0.0  ;;  %v10662_v31 = vadd.f32 %v9462_v57, %v4452_v10  ;;  %v4604_v36 = vld [vmem:[%s9603_s18 + $0x40] sm:$0xff] }
 0xcd0   : > { %4476 = vadd.xlane.f32.xlu1 %v4475_v39  ;;  %v7927_v10 = vcombine.high %v4596_v7, %v4604_v36  ;;  %v7926_v39 = vcombine.low %v4596_v7, %v4604_v36  ;;  %v10764_v7 = vrot.slane %v10646_v23, %v9677_v43  ;;  %v10767_v36 = vsub.s32 2, %v9580_v1 }
 0xcd1   : > { %v10660_v5 = vadd.f32 %v9461_v63, %v4444_v8  ;;  %v4484_v49 = vsel %vm607_vm2, %v10662_v31, 0.0  ;;  %v4605_v8 = vld [vmem:[%s9603_s18 + $0x48] sm:$0xff] }
 0xcd2   : > { %v7928_v63 = vcombine.low %v4597_v56, %v4605_v8  ;;  %v7929_v57 = vcombine.high %v4597_v56, %v4605_v8  ;;  %v10772_v8 = vrot.slane %v10646_v23, %v10767_v36 }
 0xcd3   : > { %v4478_v53 = vsel %vm607_vm2, %v10660_v5, 0.0 }
 0xcd4   : > { %4482 = vadd.xlane.f32.xlu1 %v4481_v26  ;;  %4479 = vadd.xlane.f32.xlu0 %v4478_v53 }
 0xcd8   : > { %4485 = vadd.xlane.f32.xlu0 %v4484_v49 }
 0xd1b   : > { %v4465_v12 = vpop.xlane.xlu0 %4464 }
 0xd1c   : > { %v4488_v52 = vmul.f32 0.015625, %v4465_v12 }
 0xd1e   : > { %v10670_v15 = vsub.f32 %v4455_v44, %v4488_v52  ;;  %v7974_v44 = vcombine.low %v4644_v29, %v4652_v54  ;;  %v4655_v54 = vld [vmem:[%s9603_s18 + $0x1d8] sm:$0xff] }
 0xd1f   : > { %v4468_v14 = vpop.xlane.xlu1 %4467  ;;  %v4471_v0 = vpop.xlane.xlu0 %4470 }
 0xd20   : > { %v4489_v38 = vmul.f32 0.015625, %v4468_v14  ;;  %v4490_v11 = vmul.f32 0.015625, %v4471_v0  ;;  %v4504_v62 = vmul.f32 %v10670_v15, %v10670_v15  ;;  %5085 = vmatpush1.bf16.msra.mxu0 %v7974_v44  ;;  %v10747_v44 = vld [vmem:[%s9603_s18 + $0x1a0] sm:$0xff] }
 0xd21   : > { %v7982_v19 = vcombine.low %v10747_v44, %v10750_v18 }
 0xd22   : > { %v10674_v55 = vsub.f32 %v4456_v32, %v4489_v38  ;;  %v10676_v47 = vsub.f32 %v4457_v34, %v4490_v11  ;;  %v4512_v22 = vsel %vm607_vm2, %v4504_v62, 0.0  ;;  %v4628_v34 = vld [vmem:[%s9603_s18 + $0x100] sm:$0xff] }
 0xd23   : > { %4513 = vadd.xlane.f32.xlu1 %v4512_v22  ;;  %v4474_v17 = vpop.xlane.xlu0 %4473  ;;  %v7959_v40 = vcombine.high %v4628_v34, %v4636_v16  ;;  %v7958_v32 = vcombine.low %v4628_v34, %v4636_v16  ;;  %v10755_v34 = vld [vmem:[%s9603_s18 + $0x1a8] sm:$0xff] }
 0xd24   : > { %v4491_v58 = vmul.f32 0.015625, %v4474_v17  ;;  %v4505_v9 = vmul.f32 %v10674_v55, %v10674_v55  ;;  %v4506_v28 = vmul.f32 %v10676_v47, %v10676_v47  ;;  %v10758_v16 = vld [vmem:[%s9603_s18 + $0x1e8] sm:$0xff] }
 0xd25   : > { %5086 = vmatprep.subr.bf16.mxu0 %v7959_v40 }
 0xd26   : > { %v10683_v51 = vsub.f32 %v4458_v41, %v4491_v58  ;;  %v4515_v21 = vsel %vm607_vm2, %v4505_v9, 0.0  ;;  %v4518_v30 = vsel %vm607_vm2, %v4506_v28, 0.0  ;;  %v7961_v41 = vcombine.high %v4629_v24, %v4637_v59  ;;  %5087 = vmatpush1.bf16.msra.mxu0 %v7958_v32 }
 0xd27   : > { %4516 = vadd.xlane.f32.xlu0 %v4515_v21  ;;  %4519 = vadd.xlane.f32.xlu1 %v4518_v30  ;;  %v7984_v24 = vcombine.low %v10755_v34, %v10758_v16 }
 0xd28   : > { %v4507_v3 = vmul.f32 %v10683_v51, %v10683_v51  ;;  %5159 = vmatprep.subr.bf16.mxu1 %v7961_v41  ;;  %5088 = vmatprep.subr.bf16.mxu0 %v7943_v42 }
 0xd29   : > { %5160 = vmatpush1.bf16.msra.mxu1 %v7960_v27 }
 0xd2a   : > { %v4521_v61 = vsel %vm607_vm2, %v4507_v3, 0.0  ;;  %5161 = vmatprep.subr.bf16.mxu1 %v7945_v4  ;;  %5089 = vmatpush1.bf16.msra.mxu0 %v7942_v20  ;;  %v10731_v3 = vld [vmem:[%s9603_s18 + $0x190] sm:$0xff] }
 0xd2b   : > { %4522 = vadd.xlane.f32.xlu0 %v4521_v61  ;;  %5090 = vmatprep.subr.bf16.mxu0 %v7927_v10  ;;  %v10737_v61 = vld [vmem:[%s9603_s18 + $0x198] sm:$0xff] }
 0xd2c   : > { %v7980_v45 = vcombine.low %v10737_v61, %v4655_v54  ;;  %v7981_v33 = vcombine.high %v10737_v61, %v4655_v54 }
 0xd2d   : > { %5162 = vmatpush1.bf16.msra.mxu1 %v7944_v48 }
 0xd2e   : > { %5163 = vmatprep.subr.bf16.mxu1 %v7929_v57  ;;  %5091 = vmatpush1.bf16.msra.mxu0 %v7926_v39 }
 0xd31   : > { %5164 = vmatpush1.bf16.msra.mxu1 %v7928_v63 }
 0xd32   : > { %5303 = vmatprep.subr.bf16.mxu1 %v7981_v33  ;;  %v4606_v33 = vld [vmem:[%s9603_s18 + $0x50] sm:$0xff] }
 0xd59   : > { %v4477_v26 = vpop.xlane.xlu1 %4476 }
 0xd5a   : > { %v4492_v53 = vmul.f32 0.015625, %v4477_v26 }
 0xd5c   : > { %v10707_v49 = vsub.f32 %v10654_v37, %v4492_v53 }
 0xd5d   : > { %v4483_v12 = vpop.xlane.xlu1 %4482  ;;  %v4480_v52 = vpop.xlane.xlu0 %4479 }
 0xd5e   : > { %v4494_v14 = vmul.f32 0.015625, %v4483_v12  ;;  %v4493_v0 = vmul.f32 0.015625, %v4480_v52  ;;  %v4508_v38 = vmul.f32 %v10707_v49, %v10707_v49  ;;  %v4630_v52 = vld [vmem:[%s9603_s18 + $0x110] sm:$0xff] }
 0xd60   : > { %v10712_v11 = vsub.f32 %v10656_v50, %v4494_v14  ;;  %v10715_v62 = vsub.f32 %v10660_v5, %v4493_v0  ;;  %v4524_v22 = vsel %vm607_vm2, %v4508_v38, 0.0  ;;  %v4631_v0 = vld [vmem:[%s9603_s18 + $0x118] sm:$0xff] }
 0xd61   : > { %4525 = vadd.xlane.f32.xlu1 %v4524_v22  ;;  %v4486_v37 = vpop.xlane.xlu0 %4485  ;;  %v4639_v38 = vld [vmem:[%s9603_s18 + $0x158] sm:$0xff] }
 0xd62   : > { %v4495_v17 = vmul.f32 0.015625, %v4486_v37  ;;  %v4510_v58 = vmul.f32 %v10712_v11, %v10712_v11  ;;  %v4509_v9 = vmul.f32 %v10715_v62, %v10715_v62 }
 0xd64   : > { %v10723_v50 = vsub.f32 %v10662_v31, %v4495_v17  ;;  %v4530_v5 = vsel %vm607_vm2, %v4510_v58, 0.0  ;;  %v4527_v28 = vsel %vm607_vm2, %v4509_v9, 0.0  ;;  %v10734_v31 = vld [vmem:[%s9603_s18 + $0x1d0] sm:$0xff]  ;;  %v7965_v17 = vcombine.high %v4631_v0, %v4639_v38 }
 0xd65   : > { %4531 = vadd.xlane.f32.xlu1 %v4530_v5  ;;  %4528 = vadd.xlane.f32.xlu0 %v4527_v28  ;;  %v7979_v29 = vcombine.high %v10731_v3, %v10734_v31  ;;  %v7978_v2 = vcombine.low %v10731_v3, %v10734_v31  ;;  %v4614_v58 = vld [vmem:[%s9603_s18 + $0x90] sm:$0xff]  ;;  %v4615_v5 = vld [vmem:[%s9603_s18 + $0x98] sm:$0xff]  ;;  %v7964_v3 = vcombine.low %v4631_v0, %v4639_v38 }
 0xd66   : > { %v4511_v21 = vmul.f32 %v10723_v50, %v10723_v50  ;;  %v4623_v28 = vld [vmem:[%s9603_s18 + $0xd8] sm:$0xff] }
 0xd67   : > { %5230 = vmatprep.subr.bf16.mxu0 %v7979_v29  ;;  %v7949_v61 = vcombine.high %v4615_v5, %v4623_v28  ;;  %v4598_v29 = vld [vmem:[%s9603_s18 + $0x10] sm:$0xff] }
 0xd68   : > { %v4533_v30 = vsel %vm607_vm2, %v4511_v21, 0.0 }
 0xd69   : > { %4534 = vadd.xlane.f32.xlu0 %v4533_v30 }
 0xdac   : > { %v4514_v40 = vpop.xlane.xlu1 %4513 }
 0xdad   : > { %v4536_v59 = vmul.f32 0.015625, %v4514_v40  ;;  %v4599_v40 = vld [vmem:[%s9603_s18 + $0x18] sm:$0xff] }
 0xdaf   : > { %v4544_v32 = vadd.f32 1e-05, %v4536_v59  ;;  %v4607_v59 = vld [vmem:[%s9603_s18 + $0x58] sm:$0xff] }
 0xdb0   : > { %v4520_v27 = vpop.xlane.xlu1 %4519  ;;  %v4517_v41 = vpop.xlane.xlu0 %4516 }
 0xdb1   : > { %9423 = vrsqrt.f32 %v4544_v32  ;;  %v4538_v25 = vmul.f32 0.015625, %v4520_v27  ;;  %v4537_v13 = vmul.f32 0.015625, %v4517_v41  ;;  %v7931_v27 = vcombine.high %v4598_v29, %v4606_v33 }
 0xdb2   : > { %v7933_v41 = vcombine.high %v4599_v40, %v4607_v59 }
 0xdb3   : > { %v4545_v6 = vadd.f32 1e-05, %v4537_v13  ;;  %v4546_v42 = vadd.f32 1e-05, %v4538_v25  ;;  %v7930_v25 = vcombine.low %v4598_v29, %v4606_v33  ;;  %v7932_v13 = vcombine.low %v4599_v40, %v4607_v59  ;;  %v4624_v40 = vld [vmem:[%s9603_s18 + $0xe0] sm:$0xff]  ;;  %v4617_v59 = vld [vmem:[%s9603_s18 + $0xa8] sm:$0xff] }
 0xdb4   : > { %v4523_v46 = vpop.xlane.xlu0 %4522 }
 0xdb5   : > { %v4539_v20 = vmul.f32 0.015625, %v4523_v46  ;;  %9425 = vrsqrt.f32 %v4545_v6  ;;  %v7983_v6 = vcombine.high %v10747_v44, %v10750_v18  ;;  %v4608_v44 = vld [vmem:[%s9603_s18 + $0x60] sm:$0xff]  ;;  %v4601_v18 = vld [vmem:[%s9603_s18 + $0x28] sm:$0xff] }
 0xdb6   : > { %9427 = vrsqrt.f32 %v4546_v42  ;;  %v7985_v42 = vcombine.high %v10755_v34, %v10758_v16 }
 0xdb7   : > { %v4547_v48 = vadd.f32 1e-05, %v4539_v20 }
 0xdb9   : > { %9429 = vrsqrt.f32 %v4547_v48 }
 0xdbe   : > { %v9424_v4 = vpop.eup %9423 }
 0xdbf   : > { %v4560_v56 = vmul.f32 %v9424_v4, %v10670_v15 }
 0xdc1   : > { %v4572_v39 = vmul.f32 %v10764_v7, %v4560_v56 }
 0xdc2   : > { %v9426_v10 = vpop.eup %9425 }
 0xdc3   : > { %v4561_v63 = vmul.f32 %v9426_v10, %v10674_v55  ;;  %v9428_v57 = vpop.eup %9427  ;;  %v10780_v15 = vadd.f32 %v10772_v8, %v4572_v39  ;;  %v4638_v55 = vld [vmem:[%s9603_s18 + $0x150] sm:$0xff] }
 0xdc4   : > { %v4562_v23 = vmul.f32 %v9428_v57, %v10676_v47  ;;  %v7963_v37 = vcombine.high %v4630_v52, %v4638_v55  ;;  %v4622_v47 = vld [vmem:[%s9603_s18 + $0xd0] sm:$0xff]  ;;  %v7962_v30 = vcombine.low %v4630_v52, %v4638_v55 }
 0xdc5   : > { %v4573_v53 = vmul.f32 %v10764_v7, %v4561_v63  ;;  %v7947_v31 = vcombine.high %v4614_v58, %v4622_v47 }
 0xdc6   : > { %v9430_v26 = vpop.eup %9429  ;;  %v4574_v9 = vmul.f32 %v10764_v7, %v4562_v23 }
 0xdc7   : > { %v4563_v12 = vmul.f32 %v9430_v26, %v10683_v51  ;;  %v10784_v14 = vadd.f32 %v10772_v8, %v4573_v53 }
 0xdc8   : > { %v10810_v54 = vadd.f32 %v10772_v8, %v4574_v9 }
 0xdc9   : > { %v10791_v22 = vpack.c.bf16 %v10784_v14, %v10780_v15  ;;  %v4575_v51 = vmul.f32 %v10764_v7, %v4563_v12 }
 0xdca   : > { %11666 = vst [vmem:[#allocation5_spill] sm:$0xff] %v10810_v54 }
 0xdcb   : > { %7990 = vmatmul.mubr.msk.bf16.vlgmr.msra.gmra.mxu0 %vm607_vm2, %v10791_v22  ;;  %7994 = vmatmul.mubr.msk.bf16.vlgmr.msra.gmra.mxu1 %vm607_vm2, %v10791_v22  ;;  %v10806_v21 = vadd.f32 %v10772_v8, %v4575_v51 }
 0xdcc   : > { %5118 = vmatprep.mubr.bf16.mxu0 %v11662_v60  ;;  %5191 = vmatprep.mubr.bf16.mxu1 %v11662_v60 }
 0xdcd   : > { %11665 = vst [vmem:[#allocation4_spill] sm:$0xff] %v10806_v21  ;;  %5231 = vmatpush1.bf16.msra.mxu0 %v7978_v2  ;;  %5304 = vmatpush1.bf16.msra.mxu1 %v7980_v45  ;;  %v10817_v32 = vpack.c.bf16 %v10806_v21, %v10810_v54  ;;  %v7946_v2 = vcombine.low %v4614_v58, %v4622_v47 }
 0xdce   : > { %5232 = vmatprep.subr.bf16.mxu0 %v7963_v37  ;;  %5305 = vmatprep.subr.bf16.mxu1 %v7965_v17  ;;  %v7948_v45 = vcombine.low %v4615_v5, %v4623_v28 }
 0xdd1   : > { %5233 = vmatpush1.bf16.msra.mxu0 %v7962_v30  ;;  %5306 = vmatpush1.bf16.msra.mxu1 %v7964_v3  ;;  %v4632_v30 = vld [vmem:[%s9603_s18 + $0x120] sm:$0xff] }
 0xdd2   : > { %5234 = vmatprep.subr.bf16.mxu0 %v7947_v31  ;;  %5307 = vmatprep.subr.bf16.mxu1 %v7949_v61  ;;  %v4640_v3 = vld [vmem:[%s9603_s18 + $0x160] sm:$0xff]  ;;  %v4633_v31 = vld [vmem:[%s9603_s18 + $0x128] sm:$0xff] }
 0xdd3   : > { %7991 = vmatmul.mubr.msk.bf16.gmra.mxu0 %vm607_vm2, %v10817_v32  ;;  %7995 = vmatmul.mubr.msk.bf16.gmra.mxu1 %vm607_vm2, %v10817_v32  ;;  %v4641_v61 = vld [vmem:[%s9603_s18 + $0x168] sm:$0xff]  ;;  %v7967_v29 = vcombine.high %v4632_v30, %v4640_v3 }
 0xdd4   : > { %5128 = vmatprep.mubr.bf16.mxu0 %v11662_v60  ;;  %5201 = vmatprep.mubr.bf16.mxu1 %v11662_v60  ;;  %v7969_v33 = vcombine.high %v4633_v31, %v4641_v61 }
 0xdd5   : > { %5235 = vmatpush1.bf16.msra.mxu0 %v7946_v2  ;;  %5308 = vmatpush1.bf16.msra.mxu1 %v7948_v45  ;;  %v4625_v2 = vld [vmem:[%s9603_s18 + $0xe8] sm:$0xff]  ;;  %v7966_v45 = vcombine.low %v4632_v30, %v4640_v3  ;;  %v4610_v30 = vld [vmem:[%s9603_s18 + $0x70] sm:$0xff]  ;;  %v4603_v3 = vld [vmem:[%s9603_s18 + $0x38] sm:$0xff] }
 0xdd6   : > { %5236 = vmatprep.subr.bf16.mxu0 %v7931_v27  ;;  %5309 = vmatprep.subr.bf16.mxu1 %v7933_v41  ;;  %v7968_v27 = vcombine.low %v4633_v31, %v4641_v61  ;;  %v7952_v16 = vcombine.low %v4617_v59, %v4625_v2  ;;  %v4611_v31 = vld [vmem:[%s9603_s18 + $0x78] sm:$0xff] }
 0xdd9   : > { %5237 = vmatpush1.bf16.msra.mxu0 %v7930_v25  ;;  %5310 = vmatpush1.bf16.msra.mxu1 %v7932_v13  ;;  %v7953_v25 = vcombine.high %v4617_v59, %v4625_v2  ;;  %v4600_v13 = vld [vmem:[%s9603_s18 + $0x20] sm:$0xff]  ;;  %v7940_v59 = vcombine.low %v4603_v3, %v4611_v31  ;;  %v9167_v2 = vld [vmem:[%s9613_s16 + $0x78] sm:$0xff]  }
 0xdda   : > { %5376 = vmatprep.subr.bf16.mxu0 %v7983_v6  ;;  %5449 = vmatprep.subr.bf16.mxu1 %v7985_v42  ;;  %v4650_v42 = vld [vmem:[%s9603_s18 + $0x1b0] sm:$0xff] }
 0xdea   : > { %v4526_v46 = vpop.xlane.xlu1 %4525 }
 0xdeb   : > { %v4540_v20 = vmul.f32 0.015625, %v4526_v46  ;;  %v4658_v46 = vld [vmem:[%s9603_s18 + $0x1f0] sm:$0xff] }
 0xded   : > { %v4548_v48 = vadd.f32 1e-05, %v4540_v20  ;;  %v4651_v20 = vld [vmem:[%s9603_s18 + $0x1b8] sm:$0xff] }
 0xdee   : > { %v4532_v4 = vpop.xlane.xlu1 %4531  ;;  %v4529_v56 = vpop.xlane.xlu0 %4528 }
 0xdef   : > { %9431 = vrsqrt.f32 %v4548_v48  ;;  %v4542_v10 = vmul.f32 0.015625, %v4532_v4  ;;  %v4541_v39 = vmul.f32 0.015625, %v4529_v56  ;;  %v4659_v48 = vld [vmem:[%s9603_s18 + $0x1f8] sm:$0xff]  ;;  %v7934_v4 = vcombine.low %v4600_v13, %v4608_v44 }
 0xdf1   : > { %v4549_v63 = vadd.f32 1e-05, %v4541_v39  ;;  %v4550_v57 = vadd.f32 1e-05, %v4542_v10  ;;  %v7987_v10 = vcombine.high %v4650_v42, %v4658_v46  ;;  %v7989_v39 = vcombine.high %v4651_v20, %v4659_v48 }
 0xdf2   : > { %v4535_v26 = vpop.xlane.xlu0 %4534 }
 0xdf3   : > { %v4543_v53 = vmul.f32 0.015625, %v4535_v26  ;;  %9433 = vrsqrt.f32 %v4549_v63  ;;  %v4634_v63 = vld [vmem:[%s9603_s18 + $0x130] sm:$0xff]  ;;  %v4635_v26 = vld [vmem:[%s9603_s18 + $0x138] sm:$0xff] }
 0xdf4   : > { %9435 = vrsqrt.f32 %v4550_v57  ;;  %v4642_v57 = vld [vmem:[%s9603_s18 + $0x170] sm:$0xff] }
 0xdf5   : > { %v4551_v12 = vadd.f32 1e-05, %v4543_v53  ;;  %v4643_v53 = vld [vmem:[%s9603_s18 + $0x178] sm:$0xff] }
 0xdf7   : > { %9437 = vrsqrt.f32 %v4551_v12  ;;  %v7986_v12 = vcombine.low %v4650_v42, %v4658_v46  ;;  %v9181_v42 = vld [vmem:[%s9613_s16 + $0x20] sm:$0xff]  }
 0xdf8   : > { %v9182_v46 = vld [vmem:[%s9613_s16 + $0xa0] sm:$0xff]  }
 0xdfc   : > { %v9432_v52 = vpop.eup %9431 }
 0xdfd   : > { %v4564_v23 = vmul.f32 %v9432_v52, %v10707_v49  ;;  %v7988_v52 = vcombine.low %v4651_v20, %v4659_v48  ;;  %v9183_v20 = vld [vmem:[%s9613_s16 + $0x58] sm:$0xff]  }
 0xdfe   : > { %v9184_v48 = vld [vmem:[%s9613_s16 + $0xd8] sm:$0xff]  }
 0xdff   : > { %v4576_v0 = vmul.f32 %v10764_v7, %v4564_v23  ;;  %v4618_v23 = vld [vmem:[%s9603_s18 + $0xb0] sm:$0xff] }
 0xe00   : > { %v9434_v55 = vpop.eup %9433 }
 0xe01   : > { %v4565_v38 = vmul.f32 %v9434_v55, %v10715_v62  ;;  %v9436_v51 = vpop.eup %9435  ;;  %v10835_v9 = vadd.f32 %v10772_v8, %v4576_v0  ;;  %v7971_v55 = vcombine.high %v4634_v63, %v4642_v57  ;;  %v7973_v0 = vcombine.high %v4635_v26, %v4643_v53 }
 0xe02   : > { %v4566_v47 = vmul.f32 %v9436_v51, %v10712_v11  ;;  %v4619_v51 = vld [vmem:[%s9603_s18 + $0xb8] sm:$0xff] }
 0xe03   : > { %v4577_v17 = vmul.f32 %v10764_v7, %v4565_v38  ;;  %11667 = vst [vmem:[#allocation6_spill] sm:$0xff] %v10835_v9  ;;  %v4626_v38 = vld [vmem:[%s9603_s18 + $0xf0] sm:$0xff] }
 0xe04   : > { %v9438_v37 = vpop.eup %9437  ;;  %v7954_v61 = vcombine.low %v4618_v23, %v4626_v38 }
 0xe05   : > { %v4567_v58 = vmul.f32 %v9438_v37, %v10723_v50  ;;  %v10839_v5 = vadd.f32 %v10772_v8, %v4577_v17  ;;  %v4578_v50 = vmul.f32 %v10764_v7, %v4566_v47  ;;  %v4627_v37 = vld [vmem:[%s9603_s18 + $0xf8] sm:$0xff]  ;;  %v7970_v17 = vcombine.low %v4634_v63, %v4642_v57  ;;  %v9190_v63 = vld [vmem:[%s9613_s16 + $0x90] sm:$0xff]   ;;  %v9191_v57 = vld [vmem:[%s9613_s16 + $0x48] sm:$0xff]  }
 0xe06   : > { %v7955_v47 = vcombine.high %v4618_v23, %v4626_v38  ;;  %v9198_v23 = vld [vmem:[%s9613_s16 + $0x80] sm:$0xff]   ;;  %v11008_v38 = vsub.s32 3, %v9580_v1 }
 0xe07   : > { %11668 = vst [vmem:[#allocation7_spill] sm:$0xff] %v10839_v5  ;;  %v10843_v49 = vpack.c.bf16 %v10839_v5, %v10835_v9  ;;  %v4579_v62 = vmul.f32 %v10764_v7, %v4567_v58  ;;  %v10857_v28 = vadd.f32 %v10772_v8, %v4578_v50  ;;  %v7972_v58 = vcombine.low %v4635_v26, %v4643_v53  ;;  %v4602_v50 = vld [vmem:[%s9603_s18 + $0x30] sm:$0xff]  ;;  %v9192_v26 = vld [vmem:[%s9613_s16 + $0xc8] sm:$0xff]  }
 0xe08   : > { %v9194_v53 = vld [vmem:[%s9613_s16 + $0x88] sm:$0xff]  }
 0xe09   : > { %7992 = vmatmul.mubr.msk.bf16.gmra.mxu0 %vm607_vm2, %v10843_v49  ;;  %7996 = vmatmul.mubr.msk.bf16.gmra.mxu1 %vm607_vm2, %v10843_v49  ;;  %v10854_v11 = vadd.f32 %v10772_v8, %v4579_v62  ;;  %11670 = vst [vmem:[#allocation9_spill] sm:$0xff] %v10857_v28  ;;  %v4616_v8 = vld [vmem:[%s9603_s18 + $0xa0] sm:$0xff]  ;;  %v7957_v62 = vcombine.high %v4619_v51, %v4627_v37 }
 0xe0a   : > { %5138 = vmatprep.mubr.bf16.mxu0 %v11662_v60  ;;  %5211 = vmatprep.mubr.bf16.mxu1 %v11662_v60  ;;  %v7951_v41 = vcombine.high %v4616_v8, %v4624_v40  ;;  %v7950_v34 = vcombine.low %v4616_v8, %v4624_v40  ;;  %v7956_v8 = vcombine.low %v4619_v51, %v4627_v37  ;;  %v11011_v51 = vld [vmem:[%s9608_s24] sm:$0xff] }
 0xe0b   : > { %11669 = vst [vmem:[#allocation8_spill] sm:$0xff] %v10854_v11  ;;  %v10861_v7 = vpack.c.bf16 %v10854_v11, %v10857_v28  ;;  %v7938_v40 = vcombine.low %v4602_v50, %v4610_v30 }
 0xe11   : > { %7993 = vmatmul.mubr.msk.bf16.gmra.mxu0 %vm607_vm2, %v10861_v7  ;;  %7997 = vmatmul.mubr.msk.bf16.gmra.mxu1 %vm607_vm2, %v10861_v7 }
 0xe12   : > { %5254 = vmatprep.mubr.bf16.mxu0 %v11662_v60  ;;  %5327 = vmatprep.mubr.bf16.mxu1 %v11662_v60 }
 0xe19   : > { %7998 = vmatmul.mubr.msk.bf16.vlgmr.msra.gmra.mxu0 %vm607_vm2, %v10791_v22  ;;  %8002 = vmatmul.mubr.msk.bf16.vlgmr.msra.gmra.mxu1 %vm607_vm2, %v10791_v22 }
 0xe1a   : > { %5377 = vmatpush1.bf16.msra.mxu0 %v7982_v19  ;;  %5450 = vmatpush1.bf16.msra.mxu1 %v7984_v24  ;;  %v4609_v19 = vld [vmem:[%s9603_s18 + $0x68] sm:$0xff]  ;;  %v7935_v24 = vcombine.high %v4600_v13, %v4608_v44  ;;  %v9172_v13 = vld [vmem:[%s9613_s16 + $0xf0] sm:$0xff]  }
 0xe1b   : > { %5264 = vmatprep.mubr.bf16.mxu0 %v11662_v60  ;;  %5337 = vmatprep.mubr.bf16.mxu1 %v11662_v60  ;;  %v7937_v6 = vcombine.high %v4601_v18, %v4609_v19  ;;  %v7936_v56 = vcombine.low %v4601_v18, %v4609_v19  ;;  %v9173_v44 = vld [vmem:[%s9613_s16 + $0x30] sm:$0xff]   ;;  %v9175_v19 = vld [vmem:[%s9613_s16 + $0x68] sm:$0xff]  }
 0xe1c   : > { %5378 = vmatprep.subr.bf16.mxu0 %v7967_v29  ;;  %5451 = vmatprep.subr.bf16.mxu1 %v7969_v33  ;;  %v7939_v29 = vcombine.high %v4602_v50, %v4610_v30  ;;  %v7941_v33 = vcombine.high %v4603_v3, %v4611_v31  ;;  %v9174_v18 = vld [vmem:[%s9613_s16 + $0xb0] sm:$0xff]  }
 0xe1e   : > { %5379 = vmatpush1.bf16.msra.mxu0 %v7966_v45  ;;  %5452 = vmatpush1.bf16.msra.mxu1 %v7968_v27  ;;  %v9168_v45 = vld [vmem:[%s9613_s16 + $0xf8] sm:$0xff]  }
 0xe1f   : > { %5380 = vmatprep.subr.bf16.mxu0 %v7951_v41  ;;  %5453 = vmatprep.subr.bf16.mxu1 %v7953_v25  ;;  %v9169_v27 = vld [vmem:[%s9613_s16 + $0x38] sm:$0xff]   ;;  %v9171_v25 = vld [vmem:[%s9613_s16 + $0x70] sm:$0xff]  }
 0xe20   : > { %v9170_v41 = vld [vmem:[%s9613_s16 + $0xb8] sm:$0xff]  }
 0xe21   : > { %7999 = vmatmul.mubr.msk.bf16.gmra.mxu0 %vm607_vm2, %v10817_v32  ;;  %8003 = vmatmul.mubr.msk.bf16.gmra.mxu1 %vm607_vm2, %v10817_v32 }
 0xe22   : > { %5274 = vmatprep.mubr.bf16.mxu0 %v11662_v60  ;;  %5347 = vmatprep.mubr.bf16.mxu1 %v11662_v60 }
 0xe23   : > { %5381 = vmatpush1.bf16.msra.mxu0 %v7950_v34  ;;  %5454 = vmatpush1.bf16.msra.mxu1 %v7952_v16  ;;  %v9176_v34 = vld [vmem:[%s9613_s16 + $0xe8] sm:$0xff]  }
 0xe24   : > { %5382 = vmatprep.subr.bf16.mxu0 %v7935_v24  ;;  %5455 = vmatprep.subr.bf16.mxu1 %v7937_v6  ;;  %v9177_v16 = vld [vmem:[%s9613_s16 + $0x28] sm:$0xff]   ;;  %v9179_v24 = vld [vmem:[%s9613_s16 + $0x60] sm:$0xff]  }
 0xe25   : > { %v9180_v6 = vld [vmem:[%s9613_s16 + $0xe0] sm:$0xff]  }
 0xe27   : > { %5383 = vmatpush1.bf16.msra.mxu0 %v7934_v4  ;;  %5456 = vmatpush1.bf16.msra.mxu1 %v7936_v56  ;;  %v9185_v4 = vld [vmem:[%s9613_s16 + $0x18] sm:$0xff]   ;;  %v9187_v56 = vld [vmem:[%s9613_s16 + $0x50] sm:$0xff]  }
 0xe28   : > { %5522 = vmatprep.subr.bf16.mxu0 %v7987_v10  ;;  %5595 = vmatprep.subr.bf16.mxu1 %v7989_v39  ;;  %v9188_v10 = vld [vmem:[%s9613_s16 + $0xd0] sm:$0xff]  }
 0xe29   : > { %8000 = vmatmul.mubr.msk.bf16.gmra.mxu0 %vm607_vm2, %v10843_v49  ;;  %8004 = vmatmul.mubr.msk.bf16.gmra.mxu1 %vm607_vm2, %v10843_v49  ;;  %v9189_v39 = vld [vmem:[%s9613_s16 + $0x10] sm:$0xff]  }
 0xe2a   : > { %5284 = vmatprep.mubr.bf16.mxu0 %v11662_v60  ;;  %5357 = vmatprep.mubr.bf16.mxu1 %v11662_v60 }
 0xe31   : > { %8001 = vmatmul.mubr.msk.bf16.gmra.mxu0 %vm607_vm2, %v10861_v7  ;;  %8005 = vmatmul.mubr.msk.bf16.gmra.mxu1 %vm607_vm2, %v10861_v7 }
 0xe32   : > { %5400 = vmatprep.mubr.bf16.mxu0 %v11662_v60  ;;  %5473 = vmatprep.mubr.bf16.mxu1 %v11662_v60 }
 0xe39   : > { %8006 = vmatmul.mubr.msk.bf16.vlgmr.msra.gmra.mxu0 %vm607_vm2, %v10791_v22  ;;  %8010 = vmatmul.mubr.msk.bf16.vlgmr.msra.gmra.mxu1 %vm607_vm2, %v10791_v22 }
 0xe3a   : > { %5523 = vmatpush1.bf16.msra.mxu0 %v7986_v12  ;;  %5596 = vmatpush1.bf16.msra.mxu1 %v7988_v52  ;;  %v9196_v12 = vld [vmem:[%s9613_s16 + $0xc0] sm:$0xff]  }
 0xe3b   : > { %5410 = vmatprep.mubr.bf16.mxu0 %v11662_v60  ;;  %5483 = vmatprep.mubr.bf16.mxu1 %v11662_v60  ;;  %v9197_v52 = vld [vmem:[%s9613_s16] sm:$0xff]  }
 0xe3c   : > { %5524 = vmatprep.subr.bf16.mxu0 %v7971_v55  ;;  %5597 = vmatprep.subr.bf16.mxu1 %v7973_v0  ;;  %v9199_v55 = vld [vmem:[%s9613_s16 + $0x178] sm:$0xff]  }
 0xe3d   : > { %v9200_v0 = vld [vmem:[%s9613_s16 + $0x1f8] sm:$0xff]  }
 0xe3e   : > { %5525 = vmatpush1.bf16.msra.mxu0 %v7970_v17  ;;  %5598 = vmatpush1.bf16.msra.mxu1 %v7972_v58  ;;  %v11019_v58 = vrot.slane %v11011_v51, %v11008_v38 }
 0xe3f   : > { %5526 = vmatprep.subr.bf16.mxu0 %v7955_v47  ;;  %5599 = vmatprep.subr.bf16.mxu1 %v7957_v62  ;;  %v11023_v47 = vrot.slane %v11011_v51, %v9664_v35  ;;  %v11027_v62 = vrot.slane %v11011_v51, %v10767_v36 }
 0xe41   : > { %8007 = vmatmul.mubr.msk.bf16.gmra.mxu0 %vm607_vm2, %v10817_v32  ;;  %8011 = vmatmul.mubr.msk.bf16.gmra.mxu1 %vm607_vm2, %v10817_v32 }
 0xe42   : > { %5420 = vmatprep.mubr.bf16.mxu0 %v11662_v60  ;;  %5493 = vmatprep.mubr.bf16.mxu1 %v11662_v60 }
 0xe43   : > { %5527 = vmatpush1.bf16.msra.mxu0 %v7954_v61  ;;  %5600 = vmatpush1.bf16.msra.mxu1 %v7956_v8 }
 0xe44   : > { %5528 = vmatprep.subr.bf16.mxu0 %v7939_v29  ;;  %5601 = vmatprep.subr.bf16.mxu1 %v7941_v33 }
 0xe47   : > { %5529 = vmatpush1.bf16.msra.mxu0 %v7938_v40  ;;  %5602 = vmatpush1.bf16.msra.mxu1 %v7940_v59 }
 0xe48   : > { %8304 = vmatprep.subr.bf16.mxu0 %v9167_v2  ;;  %8344 = vmatprep.subr.bf16.mxu1 %v9168_v45 }
 0xe49   : > { %8008 = vmatmul.mubr.msk.bf16.gmra.mxu0 %vm607_vm2, %v10843_v49  ;;  %8012 = vmatmul.mubr.msk.bf16.gmra.mxu1 %vm607_vm2, %v10843_v49 }
 0xe4a   : > { %5430 = vmatprep.mubr.bf16.mxu0 %v11662_v60  ;;  %5503 = vmatprep.mubr.bf16.mxu1 %v11662_v60 }
 0xe51   : > { %8009 = vmatmul.mubr.msk.bf16.gmra.mxu0 %vm607_vm2, %v10861_v7  ;;  %8013 = vmatmul.mubr.msk.bf16.gmra.mxu1 %vm607_vm2, %v10861_v7 }
 0xe52   : > { %5546 = vmatprep.mubr.bf16.mxu0 %v11662_v60  ;;  %5619 = vmatprep.mubr.bf16.mxu1 %v11662_v60 }
 0xe59   : > { %8014 = vmatmul.mubr.msk.bf16.vlgmr.msra.gmra.mxu0 %vm607_vm2, %v10791_v22  ;;  %8018 = vmatmul.mubr.msk.bf16.vlgmr.msra.gmra.mxu1 %vm607_vm2, %v10791_v22  ;;  %v9178_v22 = vld [vmem:[%s9613_s16 + $0xa8] sm:$0xff]  }
 0xe5a   : > { %5556 = vmatprep.mubr.bf16.mxu0 %v11662_v60  ;;  %5629 = vmatprep.mubr.bf16.mxu1 %v11662_v60 }
 0xe5b   : > { %8305 = vmatpush3.bf16.msra.mxu0 %v9169_v27  ;;  %8345 = vmatpush3.bf16.msra.mxu1 %v9170_v41 }
 0xe5c   : > { %8306 = vmatprep.subr.bf16.mxu0 %v9171_v25  ;;  %8346 = vmatprep.subr.bf16.mxu1 %v9172_v13 }
 0xe5f   : > { %8307 = vmatpush3.bf16.msra.mxu0 %v9173_v44  ;;  %8347 = vmatpush3.bf16.msra.mxu1 %v9174_v18 }
 0xe60   : > { %8308 = vmatprep.subr.bf16.mxu0 %v9175_v19  ;;  %8348 = vmatprep.subr.bf16.mxu1 %v9176_v34 }
 0xe61   : > { %8015 = vmatmul.mubr.msk.bf16.gmra.mxu0 %vm607_vm2, %v10817_v32  ;;  %8019 = vmatmul.mubr.msk.bf16.gmra.mxu1 %vm607_vm2, %v10817_v32  ;;  %v9186_v32 = vld [vmem:[%s9613_s16 + $0x98] sm:$0xff]  }
 0xe62   : > { %5566 = vmatprep.mubr.bf16.mxu0 %v11662_v60  ;;  %5639 = vmatprep.mubr.bf16.mxu1 %v11662_v60 }
 0xe63   : > { %8309 = vmatpush3.bf16.msra.mxu0 %v9177_v16  ;;  %8349 = vmatpush3.bf16.msra.mxu1 %v9178_v22 }
 0xe64   : > { %8310 = vmatprep.subr.bf16.mxu0 %v9179_v24  ;;  %8350 = vmatprep.subr.bf16.mxu1 %v9180_v6 }
 0xe67   : > { %8311 = vmatpush3.bf16.msra.mxu0 %v9181_v42  ;;  %8351 = vmatpush3.bf16.msra.mxu1 %v9182_v46 }
 0xe68   : > { %8312 = vmatprep.subr.bf16.mxu0 %v9183_v20  ;;  %8352 = vmatprep.subr.bf16.mxu1 %v9184_v48 }
 0xe69   : > { %8016 = vmatmul.mubr.msk.bf16.gmra.mxu0 %vm607_vm2, %v10843_v49  ;;  %8020 = vmatmul.mubr.msk.bf16.gmra.mxu1 %vm607_vm2, %v10843_v49  ;;  %v9193_v49 = vld [vmem:[%s9613_s16 + $0x8] sm:$0xff]  }
 0xe6a   : > { %5576 = vmatprep.mubr.bf16.mxu0 %v11662_v60  ;;  %5649 = vmatprep.mubr.bf16.mxu1 %v11662_v60  ;;  %v9195_v60 = vld [vmem:[%s9613_s16 + $0x40] sm:$0xff]  }
 0xe6b   : > { %8313 = vmatpush3.bf16.msra.mxu0 %v9185_v4  ;;  %8353 = vmatpush3.bf16.msra.mxu1 %v9186_v32  ;;  %v9201_v4 = vld [vmem:[%s9613_s16 + $0x138] sm:$0xff]  }
 0xe6c   : > { %8314 = vmatprep.subr.bf16.mxu0 %v9187_v56  ;;  %8354 = vmatprep.subr.bf16.mxu1 %v9188_v10  ;;  %v9202_v32 = vld [vmem:[%s9613_s16 + $0x1b8] sm:$0xff]  }
 0xe6f   : > { %8315 = vmatpush3.bf16.msra.mxu0 %v9189_v39  ;;  %8355 = vmatpush3.bf16.msra.mxu1 %v9190_v63 }
 0xe70   : > { %8316 = vmatprep.subr.bf16.mxu0 %v9191_v57  ;;  %8356 = vmatprep.subr.bf16.mxu1 %v9192_v26  ;;  %v9203_v26 = vld [vmem:[%s9613_s16 + $0x170] sm:$0xff]  }
 0xe71   : > { %8017 = vmatmul.mubr.msk.bf16.gmra.mxu0 %vm607_vm2, %v10861_v7  ;;  %8021 = vmatmul.mubr.msk.bf16.gmra.mxu1 %vm607_vm2, %v10861_v7  ;;  %v11015_v7 = vrot.slane %v11011_v51, %v9677_v43 }
 0xe73   : > { %8317 = vmatpush3.bf16.msra.mxu0 %v9193_v49  ;;  %8357 = vmatpush3.bf16.msra.mxu1 %v9194_v53  ;;  %v9204_v49 = vld [vmem:[%s9613_s16 + $0x1f0] sm:$0xff]  }
 0xe74   : > { %8318 = vmatprep.subr.bf16.mxu0 %v9195_v60  ;;  %8358 = vmatprep.subr.bf16.mxu1 %v9196_v12 }
 0xe77   : > { %8319 = vmatpush3.bf16.msra.mxu0 %v9197_v52  ;;  %8359 = vmatpush3.bf16.msra.mxu1 %v9198_v23 }
 0xe78   : > { %8384 = vmatprep.subr.bf16.mxu0 %v9199_v55  ;;  %8424 = vmatprep.subr.bf16.mxu1 %v9200_v0 }
 0xe8b   : > { %v5110_v37 = vpop.f32.mrf.mxu0  ;;  %v5183_v17 = vpop.f32.mrf.mxu1 }
 0xe8c   : > { %v5111_v40 = vadd.f32 %v5110_v37, %v11023_v47  ;;  %v5184_v59 = vadd.f32 %v5183_v17, %v11027_v62 }
 0xe8d   : > { %v5112_v50 = vpop.f32.mrf.mxu0  ;;  %v5185_v30 = vpop.f32.mrf.mxu1 }
 0xe8e   : > { %v5113_v61 = vadd.f32 %v5112_v50, %v11015_v7  ;;  %v5186_v8 = vadd.f32 %v5185_v30, %v11019_v58  ;;  %v5660_v24 = vmax.f32 %v5111_v40, 0.0  ;;  %v5662_v6 = vmax.f32 %v5184_v59, 0.0  ;;  %v9205_v50 = vld [vmem:[%s9613_s16 + $0x130] sm:$0xff]  }
 0xe8f   : > { %v5114_v3 = vpop.f32.mrf.mxu0  ;;  %v5187_v31 = vpop.f32.mrf.mxu1  ;;  %v9206_v30 = vld [vmem:[%s9613_s16 + $0x1b0] sm:$0xff]  }
 0xe90   : > { %v5115_v29 = vadd.f32 %v5114_v3, %v11023_v47  ;;  %v5188_v33 = vadd.f32 %v5187_v31, %v11027_v62  ;;  %v5661_v19 = vmax.f32 %v5113_v61, 0.0  ;;  %v5663_v34 = vmax.f32 %v5186_v8, 0.0  ;;  %v9207_v61 = vld [vmem:[%s9613_s16 + $0x168] sm:$0xff]  }
 0xe91   : > { %v5116_v2 = vpop.f32.mrf.mxu0  ;;  %v5189_v45 = vpop.f32.mrf.mxu1  ;;  %v9208_v8 = vld [vmem:[%s9613_s16 + $0x1e8] sm:$0xff]  }
 0xe92   : > { %v5117_v27 = vadd.f32 %v5116_v2, %v11015_v7  ;;  %v5190_v41 = vadd.f32 %v5189_v45, %v11019_v58  ;;  %v5676_v25 = vmax.f32 %v5115_v29, 0.0  ;;  %v5678_v13 = vmax.f32 %v5188_v33, 0.0 }
 0xe93   : > { %v5120_v44 = vpop.f32.mrf.mxu0  ;;  %v5193_v18 = vpop.f32.mrf.mxu1 }
 0xe94   : > { %v5677_v16 = vmax.f32 %v5117_v27, 0.0  ;;  %v5679_v22 = vmax.f32 %v5190_v41, 0.0  ;;  %v5788_v56 = vpack.c.bf16 %v5676_v25, %v5660_v24  ;;  %v5790_v10 = vpack.c.bf16 %v5678_v13, %v5662_v6  ;;  %v9209_v25 = vld [vmem:[%s9613_s16 + $0x128] sm:$0xff]   ;;  %v9215_v24 = vld [vmem:[%s9613_s16 + $0x158] sm:$0xff]  }
 0xe95   : > { %v5122_v42 = vpop.f32.mrf.mxu0  ;;  %v5195_v46 = vpop.f32.mrf.mxu1  ;;  %v5121_v52 = vadd.f32 %v5120_v44, %v11023_v47  ;;  %v5194_v23 = vadd.f32 %v5193_v18, %v11027_v62  ;;  %v9210_v13 = vld [vmem:[%s9613_s16 + $0x1a8] sm:$0xff]   ;;  %v9216_v6 = vld [vmem:[%s9613_s16 + $0x1d8] sm:$0xff]  }
 0xe96   : > { %v5789_v20 = vpack.c.bf16 %v5677_v16, %v5661_v19  ;;  %v5791_v48 = vpack.c.bf16 %v5679_v22, %v5663_v34  ;;  %v5123_v39 = vadd.f32 %v5122_v42, %v11015_v7  ;;  %v5196_v53 = vadd.f32 %v5195_v46, %v11019_v58  ;;  %v9211_v19 = vld [vmem:[%s9613_s16 + $0x160] sm:$0xff]   ;;  %v9217_v42 = vld [vmem:[%s9613_s16 + $0x118] sm:$0xff]  }
 0xe97   : > { %v5124_v63 = vpop.f32.mrf.mxu0  ;;  %v5197_v57 = vpop.f32.mrf.mxu1  ;;  %v5692_v2 = vmax.f32 %v5121_v52, 0.0  ;;  %v5694_v45 = vmax.f32 %v5194_v23, 0.0  ;;  %v9212_v34 = vld [vmem:[%s9613_s16 + $0x1e0] sm:$0xff]   ;;  %v9218_v46 = vld [vmem:[%s9613_s16 + $0x198] sm:$0xff]  }
 0xe98   : > { %v5125_v60 = vadd.f32 %v5124_v63, %v11023_v47  ;;  %v5198_v12 = vadd.f32 %v5197_v57, %v11027_v62  ;;  %6912 = vmatprep.mubr.bf16.mxu0 %v5789_v20  ;;  %6977 = vmatprep.mubr.bf16.mxu1 %v5791_v48  ;;  %v5693_v29 = vmax.f32 %v5123_v39, 0.0  ;;  %v5695_v33 = vmax.f32 %v5196_v53, 0.0  ;;  %v9213_v16 = vld [vmem:[%s9613_s16 + $0x120] sm:$0xff]   ;;  %v9219_v20 = vld [vmem:[%s9613_s16 + $0x150] sm:$0xff]   ;;  %v9225_v39 = vld [vmem:[%s9613_s16 + $0x108] sm:$0xff]  }
 0xe99   : > { %v5126_v55 = vpop.f32.mrf.mxu0  ;;  %v5199_v0 = vpop.f32.mrf.mxu1  ;;  %6913 = vmatmul.mubr.bf16.vlgmr.msra.gmra.mxu0 %v5788_v56  ;;  %6978 = vmatmul.mubr.bf16.vlgmr.msra.gmra.mxu1 %v5790_v10  ;;  %v9214_v22 = vld [vmem:[%s9613_s16 + $0x1a0] sm:$0xff]   ;;  %v9220_v48 = vld [vmem:[%s9613_s16 + $0x1d0] sm:$0xff]   ;;  %v9223_v56 = vld [vmem:[%s9613_s16 + $0x148] sm:$0xff]  }
 0xe9a   : > { %v5127_v37 = vadd.f32 %v5126_v55, %v11015_v7  ;;  %v5200_v17 = vadd.f32 %v5199_v0, %v11019_v58  ;;  %8385 = vmatpush3.bf16.msra.mxu0 %v9201_v4  ;;  %8425 = vmatpush3.bf16.msra.mxu1 %v9202_v32  ;;  %v5708_v3 = vmax.f32 %v5125_v60, 0.0  ;;  %v5710_v31 = vmax.f32 %v5198_v12, 0.0  ;;  %v9221_v4 = vld [vmem:[%s9613_s16 + $0x110] sm:$0xff]   ;;  %v9224_v10 = vld [vmem:[%s9613_s16 + $0x1c8] sm:$0xff]   ;;  %v9227_v57 = vld [vmem:[%s9613_s16 + $0x140] sm:$0xff]  }
 0xe9b   : > { %8386 = vmatprep.subr.bf16.mxu0 %v9203_v26  ;;  %8426 = vmatprep.subr.bf16.mxu1 %v9204_v49  ;;  %v9222_v32 = vld [vmem:[%s9613_s16 + $0x190] sm:$0xff]   ;;  %v9226_v63 = vld [vmem:[%s9613_s16 + $0x188] sm:$0xff]   ;;  %v9228_v26 = vld [vmem:[%s9613_s16 + $0x1c0] sm:$0xff]  }
 0xe9c   : > { %v5709_v40 = vmax.f32 %v5127_v37, 0.0  ;;  %v5711_v59 = vmax.f32 %v5200_v17, 0.0  ;;  %v5804_v44 = vpack.c.bf16 %v5708_v3, %v5692_v2  ;;  %v5806_v18 = vpack.c.bf16 %v5710_v31, %v5694_v45  ;;  %v9229_v49 = vld [vmem:[%s9613_s16 + $0x100] sm:$0xff]   ;;  %v9231_v60 = vld [vmem:[%s9613_s16 + $0x278] sm:$0xff]  }
 0xe9d   : > { %v9230_v53 = vld [vmem:[%s9613_s16 + $0x180] sm:$0xff]   ;;  %v9232_v12 = vld [vmem:[%s9613_s16 + $0x2f8] sm:$0xff]  }
 0xe9e   : > { %v5805_v27 = vpack.c.bf16 %v5709_v40, %v5693_v29  ;;  %v5807_v41 = vpack.c.bf16 %v5711_v59, %v5695_v33  ;;  %8387 = vmatpush3.bf16.msra.mxu0 %v9205_v50  ;;  %8427 = vmatpush3.bf16.msra.mxu1 %v9206_v30 }
 0xe9f   : > { %8388 = vmatprep.subr.bf16.mxu0 %v9207_v61  ;;  %8428 = vmatprep.subr.bf16.mxu1 %v9208_v8 }
 0xea0   : > { %6920 = vmatprep.mubr.bf16.mxu0 %v5805_v27  ;;  %6985 = vmatprep.mubr.bf16.mxu1 %v5807_v41 }
 0xea1   : > { %6921 = vmatmul.mubr.bf16.gmra.mxu0 %v5804_v44  ;;  %6986 = vmatmul.mubr.bf16.gmra.mxu1 %v5806_v18 }
 0xea2   : > { %8389 = vmatpush3.bf16.msra.mxu0 %v9209_v25  ;;  %8429 = vmatpush3.bf16.msra.mxu1 %v9210_v13 }
 0xea3   : > { %8390 = vmatprep.subr.bf16.mxu0 %v9211_v19  ;;  %8430 = vmatprep.subr.bf16.mxu1 %v9212_v34 }
 0xea6   : > { %8391 = vmatpush3.bf16.msra.mxu0 %v9213_v16  ;;  %8431 = vmatpush3.bf16.msra.mxu1 %v9214_v22 }
 0xea7   : > { %8392 = vmatprep.subr.bf16.mxu0 %v9215_v24  ;;  %8432 = vmatprep.subr.bf16.mxu1 %v9216_v6 }
 0xeaa   : > { %8393 = vmatpush3.bf16.msra.mxu0 %v9217_v42  ;;  %8433 = vmatpush3.bf16.msra.mxu1 %v9218_v46  ;;  %v11086_v42 = vsub.s32 5, %v9580_v1 }
 0xeab   : > { %8394 = vmatprep.subr.bf16.mxu0 %v9219_v20  ;;  %8434 = vmatprep.subr.bf16.mxu1 %v9220_v48 }
 0xeac   : > { %11671 = vst [vmem:[#allocation10_spill] sm:$0xff] %v11086_v42 }
 0xeae   : > { %8395 = vmatpush3.bf16.msra.mxu0 %v9221_v4  ;;  %8435 = vmatpush3.bf16.msra.mxu1 %v9222_v32 }
 0xeaf   : > { %8396 = vmatprep.subr.bf16.mxu0 %v9223_v56  ;;  %8436 = vmatprep.subr.bf16.mxu1 %v9224_v10  ;;  %v4694_v56 = vsub.s32 7, %v9580_v1 }
 0xeb2   : > { %8397 = vmatpush3.bf16.msra.mxu0 %v9225_v39  ;;  %8437 = vmatpush3.bf16.msra.mxu1 %v9226_v63 }
 0xeb3   : > { %8398 = vmatprep.subr.bf16.mxu0 %v9227_v57  ;;  %8438 = vmatprep.subr.bf16.mxu1 %v9228_v26 }
 0xeb6   : > { %8399 = vmatpush3.bf16.msra.mxu0 %v9229_v49  ;;  %8439 = vmatpush3.bf16.msra.mxu1 %v9230_v53 }
 0xeb7   : > { %8464 = vmatprep.subr.bf16.mxu0 %v9231_v60  ;;  %8504 = vmatprep.subr.bf16.mxu1 %v9232_v12  ;;  %v11096_v60 = vsub.s32 4, %v9580_v1  ;;  %v4690_v12 = vsub.s32 6, %v9580_v1 }
 0xeb9   : > { %11672 = vst [vmem:[#allocation11_spill] sm:$0xff] %v11096_v60 }
 0xec9   : > { %v5130_v52 = vpop.f32.mrf.mxu0  ;;  %v5203_v23 = vpop.f32.mrf.mxu1 }
 0xeca   : > { %v5131_v61 = vadd.f32 %v5130_v52, %v11023_v47  ;;  %v5204_v8 = vadd.f32 %v5203_v23, %v11027_v62 }
 0xecb   : > { %v5132_v55 = vpop.f32.mrf.mxu0  ;;  %v5205_v0 = vpop.f32.mrf.mxu1 }
 0xecc   : > { %v5133_v50 = vadd.f32 %v5132_v55, %v11015_v7  ;;  %v5206_v30 = vadd.f32 %v5205_v0, %v11019_v58  ;;  %v5724_v19 = vmax.f32 %v5131_v61, 0.0  ;;  %v5726_v34 = vmax.f32 %v5204_v8, 0.0 }
 0xecd   : > { %v5134_v37 = vpop.f32.mrf.mxu0  ;;  %v5207_v17 = vpop.f32.mrf.mxu1  ;;  %v11117_v8 = vrot.slane %v11011_v51, %v4690_v12 }
 0xece   : > { %v5135_v3 = vadd.f32 %v5134_v37, %v11023_v47  ;;  %v5208_v31 = vadd.f32 %v5207_v17, %v11027_v62  ;;  %v5725_v25 = vmax.f32 %v5133_v50, 0.0  ;;  %v5727_v13 = vmax.f32 %v5206_v30, 0.0 }
 0xecf   : > { %v5136_v29 = vpop.f32.mrf.mxu0  ;;  %v5209_v33 = vpop.f32.mrf.mxu1 }
 0xed0   : > { %v5137_v40 = vadd.f32 %v5136_v29, %v11015_v7  ;;  %v5210_v59 = vadd.f32 %v5209_v33, %v11019_v58  ;;  %v5740_v2 = vmax.f32 %v5135_v3, 0.0  ;;  %v5742_v45 = vmax.f32 %v5208_v31, 0.0 }
 0xed1   : > { %v5140_v27 = vpop.f32.mrf.mxu0  ;;  %v5213_v41 = vpop.f32.mrf.mxu1 }
 0xed2   : > { %v5741_v44 = vmax.f32 %v5137_v40, 0.0  ;;  %v5743_v18 = vmax.f32 %v5210_v59, 0.0  ;;  %v5820_v46 = vpack.c.bf16 %v5740_v2, %v5724_v19  ;;  %v5822_v20 = vpack.c.bf16 %v5742_v45, %v5726_v34 }
 0xed3   : > { %v5142_v16 = vpop.f32.mrf.mxu0  ;;  %v5215_v22 = vpop.f32.mrf.mxu1  ;;  %v5141_v57 = vadd.f32 %v5140_v27, %v11023_v47  ;;  %v5214_v26 = vadd.f32 %v5213_v41, %v11027_v62 }
 0xed4   : > { %v5821_v24 = vpack.c.bf16 %v5741_v44, %v5725_v25  ;;  %v5823_v6 = vpack.c.bf16 %v5743_v18, %v5727_v13  ;;  %v5143_v48 = vadd.f32 %v5142_v16, %v11015_v7  ;;  %v5216_v10 = vadd.f32 %v5215_v22, %v11019_v58 }
 0xed5   : > { %v5144_v4 = vpop.f32.mrf.mxu0  ;;  %v5217_v32 = vpop.f32.mrf.mxu1  ;;  %v5758_v61 = vmax.f32 %v5214_v26, 0.0 }
 0xed6   : > { %v5145_v39 = vadd.f32 %v5144_v4, %v11023_v47  ;;  %v5218_v63 = vadd.f32 %v5217_v32, %v11027_v62  ;;  %6928 = vmatprep.mubr.bf16.mxu0 %v5821_v24  ;;  %6993 = vmatprep.mubr.bf16.mxu1 %v5823_v6  ;;  %v11103_v47 = vrot.slane %v11011_v51, %v11086_v42  ;;  %v5757_v50 = vmax.f32 %v5143_v48, 0.0 }
 0xed7   : > { %v5146_v49 = vpop.f32.mrf.mxu0  ;;  %v5219_v53 = vpop.f32.mrf.mxu1  ;;  %6929 = vmatmul.mubr.bf16.gmra.mxu0 %v5820_v46  ;;  %6994 = vmatmul.mubr.bf16.gmra.mxu1 %v5822_v20  ;;  %v11108_v62 = vrot.slane %v11011_v51, %v4694_v56  ;;  %v5759_v30 = vmax.f32 %v5216_v10, 0.0 }
 0xed8   : > { %v5147_v52 = vadd.f32 %v5146_v49, %v11015_v7  ;;  %v5220_v23 = vadd.f32 %v5219_v53, %v11019_v58  ;;  %v5772_v55 = vmax.f32 %v5145_v39, 0.0  ;;  %v5774_v0 = vmax.f32 %v5218_v63, 0.0 }
 0xed9   : > { %v5256_v37 = vpop.f32.mrf.mxu0  ;;  %v5329_v17 = vpop.f32.mrf.mxu1  ;;  %v5756_v7 = vmax.f32 %v5141_v57, 0.0  ;;  %v11112_v58 = vrot.slane %v11011_v51, %v11096_v60 }
 0xeda   : > { %v5773_v3 = vmax.f32 %v5147_v52, 0.0  ;;  %v5775_v31 = vmax.f32 %v5220_v23, 0.0  ;;  %v5838_v45 = vpack.c.bf16 %v5774_v0, %v5758_v61  ;;  %v5330_v19 = vadd.f32 %v5329_v17, %v11117_v8  ;;  %v9233_v23 = vld [vmem:[%s9613_s16 + $0x238] sm:$0xff]  }
 0xedb   : > { %v5258_v29 = vpop.f32.mrf.mxu0  ;;  %v5331_v33 = vpop.f32.mrf.mxu1  ;;  %v5836_v2 = vpack.c.bf16 %v5772_v55, %v5756_v7  ;;  %v5257_v51 = vadd.f32 %v5256_v37, %v11112_v58  ;;  %v9234_v55 = vld [vmem:[%s9613_s16 + $0x2b8] sm:$0xff]  }
 0xedc   : > { %v5837_v40 = vpack.c.bf16 %v5773_v3, %v5757_v50  ;;  %v5839_v59 = vpack.c.bf16 %v5775_v31, %v5759_v30  ;;  %v5259_v27 = vadd.f32 %v5258_v29, %v11103_v47  ;;  %v5332_v13 = vadd.f32 %v5331_v33, %v11108_v62  ;;  %v9235_v3 = vld [vmem:[%s9613_s16 + $0x270] sm:$0xff]  }
 0xedd   : > { %v5260_v41 = vpop.f32.mrf.mxu0  ;;  %v5333_v25 = vpop.f32.mrf.mxu1  ;;  %v5664_v63 = vmax.f32 %v5257_v51, 0.0  ;;  %v5666_v57 = vmax.f32 %v5330_v19, 0.0  ;;  %v9236_v31 = vld [vmem:[%s9613_s16 + $0x2f0] sm:$0xff]   ;;  %v9239_v19 = vld [vmem:[%s9613_s16 + $0x268] sm:$0xff]  }
 0xede   : > { %v5261_v44 = vadd.f32 %v5260_v41, %v11112_v58  ;;  %v5334_v18 = vadd.f32 %v5333_v25, %v11117_v8  ;;  %6936 = vmatprep.mubr.bf16.mxu0 %v5837_v40  ;;  %7001 = vmatprep.mubr.bf16.mxu1 %v5839_v59  ;;  %v5665_v4 = vmax.f32 %v5259_v27, 0.0  ;;  %v5667_v32 = vmax.f32 %v5332_v13, 0.0  ;;  %v9237_v41 = vld [vmem:[%s9613_s16 + $0x230] sm:$0xff]  }
 0xedf   : > { %v5262_v34 = vpop.f32.mrf.mxu0  ;;  %v5335_v16 = vpop.f32.mrf.mxu1  ;;  %6937 = vmatmul.mubr.bf16.gmra.mxu0 %v5836_v2  ;;  %7002 = vmatmul.mubr.bf16.gmra.mxu1 %v5838_v45  ;;  %v9238_v51 = vld [vmem:[%s9613_s16 + $0x2b0] sm:$0xff]  }
 0xee0   : > { %v5263_v22 = vadd.f32 %v5262_v34, %v11103_v47  ;;  %v5336_v24 = vadd.f32 %v5335_v16, %v11108_v62  ;;  %v5680_v6 = vmax.f32 %v5261_v44, 0.0  ;;  %v5682_v46 = vmax.f32 %v5334_v18, 0.0 }
 0xee1   : > { %v5266_v20 = vpop.f32.mrf.mxu0  ;;  %v5339_v48 = vpop.f32.mrf.mxu1 }
 0xee2   : > { %v5681_v10 = vmax.f32 %v5263_v22, 0.0  ;;  %v5683_v39 = vmax.f32 %v5336_v24, 0.0  ;;  %v5792_v0 = vpack.c.bf16 %v5680_v6, %v5664_v63  ;;  %v5794_v37 = vpack.c.bf16 %v5682_v46, %v5666_v57 }
 0xee3   : > { %v5268_v26 = vpop.f32.mrf.mxu0  ;;  %v5341_v49 = vpop.f32.mrf.mxu1  ;;  %v5267_v33 = vadd.f32 %v5266_v20, %v11112_v58  ;;  %v5340_v40 = vadd.f32 %v5339_v48, %v11117_v8 }
 0xee4   : > { %v5793_v53 = vpack.c.bf16 %v5681_v10, %v5665_v4  ;;  %v5795_v52 = vpack.c.bf16 %v5683_v39, %v5667_v32  ;;  %v5269_v17 = vadd.f32 %v5268_v26, %v11103_v47  ;;  %v5342_v7 = vadd.f32 %v5341_v49, %v11108_v62  ;;  %v9240_v10 = vld [vmem:[%s9613_s16 + $0x2e8] sm:$0xff]  }
 0xee5   : > { %v5270_v50 = vpop.f32.mrf.mxu0  ;;  %v5343_v30 = vpop.f32.mrf.mxu1  ;;  %v5696_v6 = vmax.f32 %v5267_v33, 0.0  ;;  %v5698_v46 = vmax.f32 %v5340_v40, 0.0  ;;  %v9241_v39 = vld [vmem:[%s9613_s16 + $0x228] sm:$0xff]  }
 0xee6   : > { %v5271_v61 = vadd.f32 %v5270_v50, %v11112_v58  ;;  %v5344_v29 = vadd.f32 %v5343_v30, %v11117_v8  ;;  %7042 = vmatprep.mubr.bf16.mxu0 %v5793_v53  ;;  %7107 = vmatprep.mubr.bf16.mxu1 %v5795_v52  ;;  %v5697_v34 = vmax.f32 %v5269_v17, 0.0  ;;  %v5699_v16 = vmax.f32 %v5342_v7, 0.0  ;;  %v9242_v52 = vld [vmem:[%s9613_s16 + $0x2a8] sm:$0xff]   ;;  %v9244_v17 = vld [vmem:[%s9613_s16 + $0x2e0] sm:$0xff]  }
 0xee7   : > { %v5272_v59 = vpop.f32.mrf.mxu0  ;;  %v5345_v2 = vpop.f32.mrf.mxu1  ;;  %7043 = vmatmul.mubr.bf16.vlgmr.msra.gmra.mxu0 %v5792_v0  ;;  %7108 = vmatmul.mubr.bf16.vlgmr.msra.gmra.mxu1 %v5794_v37 }
 0xee8   : > { %v5273_v45 = vadd.f32 %v5272_v59, %v11103_v47  ;;  %v5346_v27 = vadd.f32 %v5345_v2, %v11108_v62  ;;  %8465 = vmatpush3.bf16.msra.mxu0 %v9233_v23  ;;  %8505 = vmatpush3.bf16.msra.mxu1 %v9234_v55  ;;  %v5712_v25 = vmax.f32 %v5271_v61, 0.0  ;;  %v5714_v13 = vmax.f32 %v5344_v29, 0.0  ;;  %v9243_v23 = vld [vmem:[%s9613_s16 + $0x260] sm:$0xff]  }
 0xee9   : > { %v5276_v44 = vpop.f32.mrf.mxu0  ;;  %v5349_v18 = vpop.f32.mrf.mxu1  ;;  %8466 = vmatprep.subr.bf16.mxu0 %v9235_v3  ;;  %8506 = vmatprep.subr.bf16.mxu1 %v9236_v31  ;;  %v9245_v29 = vld [vmem:[%s9613_s16 + $0x220] sm:$0xff]  }
 0xeea   : > { %v5713_v22 = vmax.f32 %v5273_v45, 0.0  ;;  %v5715_v24 = vmax.f32 %v5346_v27, 0.0  ;;  %v5808_v63 = vpack.c.bf16 %v5712_v25, %v5696_v6  ;;  %v5810_v57 = vpack.c.bf16 %v5714_v13, %v5698_v46  ;;  %v9246_v45 = vld [vmem:[%s9613_s16 + $0x2a0] sm:$0xff]   ;;  %v9247_v27 = vld [vmem:[%s9613_s16 + $0x258] sm:$0xff]  }
 0xeeb   : > { %v5278_v20 = vpop.f32.mrf.mxu0  ;;  %v5351_v48 = vpop.f32.mrf.mxu1  ;;  %v5277_v50 = vadd.f32 %v5276_v44, %v11112_v58  ;;  %v5350_v30 = vadd.f32 %v5349_v18, %v11117_v8  ;;  %v9249_v6 = vld [vmem:[%s9613_s16 + $0x218] sm:$0xff]  }
 0xeec   : > { %v5809_v4 = vpack.c.bf16 %v5713_v22, %v5697_v34  ;;  %v5811_v32 = vpack.c.bf16 %v5715_v24, %v5699_v16  ;;  %8467 = vmatpush3.bf16.msra.mxu0 %v9237_v41  ;;  %v5279_v26 = vadd.f32 %v5278_v20, %v11103_v47  ;;  %8507 = vmatpush3.bf16.msra.mxu1 %v9238_v51  ;;  %v9248_v24 = vld [vmem:[%s9613_s16 + $0x2d8] sm:$0xff]  }
 0xeed   : > { %v5280_v49 = vpop.f32.mrf.mxu0  ;;  %v5353_v53 = vpop.f32.mrf.mxu1  ;;  %8468 = vmatprep.subr.bf16.mxu0 %v9239_v19  ;;  %v5352_v55 = vadd.f32 %v5351_v48, %v11108_v62  ;;  %8508 = vmatprep.subr.bf16.mxu1 %v9240_v10  ;;  %v5728_v18 = vmax.f32 %v5277_v50, 0.0  ;;  %v5730_v51 = vmax.f32 %v5350_v30, 0.0  ;;  %v9250_v10 = vld [vmem:[%s9613_s16 + $0x298] sm:$0xff]   ;;  %v9253_v50 = vld [vmem:[%s9613_s16 + $0x210] sm:$0xff]  }
 0xeee   : > { %v5281_v0 = vadd.f32 %v5280_v49, %v11112_v58  ;;  %v5354_v37 = vadd.f32 %v5353_v53, %v11117_v8  ;;  %7050 = vmatprep.mubr.bf16.mxu0 %v5809_v4  ;;  %7115 = vmatprep.mubr.bf16.mxu1 %v5811_v32  ;;  %v5729_v41 = vmax.f32 %v5279_v26, 0.0  ;;  %v9252_v49 = vld [vmem:[%s9613_s16 + $0x2d0] sm:$0xff]  }
 0xeef   : > { %v5282_v3 = vpop.f32.mrf.mxu0  ;;  %v5355_v31 = vpop.f32.mrf.mxu1  ;;  %7051 = vmatmul.mubr.bf16.gmra.mxu0 %v5808_v63  ;;  %7116 = vmatmul.mubr.bf16.gmra.mxu1 %v5810_v57  ;;  %v5731_v25 = vmax.f32 %v5352_v55, 0.0 }
 0xef0   : > { %v5283_v7 = vadd.f32 %v5282_v3, %v11103_v47  ;;  %v5356_v61 = vadd.f32 %v5355_v31, %v11108_v62  ;;  %8469 = vmatpush3.bf16.msra.mxu0 %v9241_v39  ;;  %v5744_v33 = vmax.f32 %v5281_v0, 0.0  ;;  %v5746_v40 = vmax.f32 %v5354_v37, 0.0  ;;  %8509 = vmatpush3.bf16.msra.mxu1 %v9242_v52  ;;  %v9251_v39 = vld [vmem:[%s9613_s16 + $0x250] sm:$0xff]  }
 0xef1   : > { %v5286_v59 = vpop.f32.mrf.mxu0  ;;  %v5359_v2 = vpop.f32.mrf.mxu1  ;;  %8470 = vmatprep.subr.bf16.mxu0 %v9243_v23  ;;  %8510 = vmatprep.subr.bf16.mxu1 %v9244_v17  ;;  %v11172_v17 = vld [vmem:[%s9608_s24 + $0x8] sm:$0xff] }
 0xef2   : > { %v5745_v13 = vmax.f32 %v5283_v7, 0.0  ;;  %v5747_v44 = vmax.f32 %v5356_v61, 0.0  ;;  %v5824_v46 = vpack.c.bf16 %v5744_v33, %v5728_v18  ;;  %v5826_v20 = vpack.c.bf16 %v5746_v40, %v5730_v51  ;;  %v9257_v18 = vld [vmem:[%s9613_s16 + $0x208] sm:$0xff]  }
 0xef3   : > { %v5288_v19 = vpop.f32.mrf.mxu0  ;;  %v5361_v34 = vpop.f32.mrf.mxu1  ;;  %v5287_v53 = vadd.f32 %v5286_v59, %v11112_v58  ;;  %v5360_v52 = vadd.f32 %v5359_v2, %v11117_v8  ;;  %v11177_v31 = vrot.slane %v11172_v17, %v9677_v43  ;;  %v11181_v7 = vrot.slane %v11172_v17, %v11008_v38 }
 0xef4   : > { %v5825_v16 = vpack.c.bf16 %v5745_v13, %v5729_v41  ;;  %v5827_v22 = vpack.c.bf16 %v5747_v44, %v5731_v25  ;;  %8471 = vmatpush3.bf16.msra.mxu0 %v9245_v29  ;;  %v5289_v48 = vadd.f32 %v5288_v19, %v11103_v47  ;;  %8511 = vmatpush3.bf16.msra.mxu1 %v9246_v45  ;;  %v9256_v44 = vld [vmem:[%s9613_s16 + $0x2c8] sm:$0xff]  }
 0xef5   : > { %v5290_v4 = vpop.f32.mrf.mxu0  ;;  %v5363_v32 = vpop.f32.mrf.mxu1  ;;  %8472 = vmatprep.subr.bf16.mxu0 %v9247_v27  ;;  %v5362_v63 = vadd.f32 %v5361_v34, %v11108_v62  ;;  %8512 = vmatprep.subr.bf16.mxu1 %v9248_v24  ;;  %v5760_v59 = vmax.f32 %v5287_v53, 0.0  ;;  %v5762_v2 = vmax.f32 %v5360_v52, 0.0  ;;  %v11187_v43 = vrot.slane %v11172_v17, %v9664_v35 }
 0xef6   : > { %v5291_v57 = vadd.f32 %v5290_v4, %v11112_v58  ;;  %v5364_v26 = vadd.f32 %v5363_v32, %v11117_v8  ;;  %7058 = vmatprep.mubr.bf16.mxu0 %v5825_v16  ;;  %7123 = vmatprep.mubr.bf16.mxu1 %v5827_v22  ;;  %v5761_v61 = vmax.f32 %v5289_v48, 0.0  ;;  %v11191_v45 = vrot.slane %v11172_v17, %v10767_v36  ;;  %v9258_v22 = vld [vmem:[%s9613_s16 + $0x288] sm:$0xff]   ;;  %v9259_v36 = vld [vmem:[%s9613_s16 + $0x240] sm:$0xff]  }
 0xef7   : > { %v5292_v23 = vpop.f32.mrf.mxu0  ;;  %v5365_v55 = vpop.f32.mrf.mxu1  ;;  %7059 = vmatmul.mubr.bf16.gmra.mxu0 %v5824_v46  ;;  %7124 = vmatmul.mubr.bf16.gmra.mxu1 %v5826_v20  ;;  %v5763_v29 = vmax.f32 %v5362_v63, 0.0  ;;  %v9260_v20 = vld [vmem:[%s9613_s16 + $0x2c0] sm:$0xff]  }
 0xef8   : > { %v5293_v0 = vadd.f32 %v5292_v23, %v11103_v47  ;;  %v5366_v37 = vadd.f32 %v5365_v55, %v11108_v62  ;;  %8473 = vmatpush3.bf16.msra.mxu0 %v9249_v6  ;;  %v5776_v30 = vmax.f32 %v5291_v57, 0.0  ;;  %v5778_v3 = vmax.f32 %v5364_v26, 0.0  ;;  %8513 = vmatpush3.bf16.msra.mxu1 %v9250_v10  ;;  %v9254_v47 = vld [vmem:[%s9613_s16 + $0x290] sm:$0xff]   ;;  %v9255_v62 = vld [vmem:[%s9613_s16 + $0x248] sm:$0xff]   ;;  %v9261_v57 = vld [vmem:[%s9613_s16 + $0x200] sm:$0xff]  }
 0xef9   : > { %v5402_v58 = vpop.f32.mrf.mxu0  ;;  %v5475_v8 = vpop.f32.mrf.mxu1  ;;  %8474 = vmatprep.subr.bf16.mxu0 %v9251_v39  ;;  %8514 = vmatprep.subr.bf16.mxu1 %v9252_v49  ;;  %v9262_v23 = vld [vmem:[%s9613_s16 + $0x280] sm:$0xff]   ;;  %v9263_v55 = vld [vmem:[%s9613_s16 + $0x378] sm:$0xff]  }
 0xefa   : > { %v5777_v33 = vmax.f32 %v5293_v0, 0.0  ;;  %v5779_v40 = vmax.f32 %v5366_v37, 0.0  ;;  %v5840_v51 = vpack.c.bf16 %v5776_v30, %v5760_v59  ;;  %v5842_v19 = vpack.c.bf16 %v5778_v3, %v5762_v2 }
 0xefb   : > { %v5404_v27 = vpop.f32.mrf.mxu0  ;;  %v5477_v41 = vpop.f32.mrf.mxu1  ;;  %v5403_v48 = vadd.f32 %v5402_v58, %v11187_v43  ;;  %v5476_v4 = vadd.f32 %v5475_v8, %v11191_v45 }
 0xefc   : > { %v5841_v25 = vpack.c.bf16 %v5777_v33, %v5761_v61  ;;  %v5843_v13 = vpack.c.bf16 %v5779_v40, %v5763_v29  ;;  %8475 = vmatpush3.bf16.msra.mxu0 %v9253_v50  ;;  %v5405_v34 = vadd.f32 %v5404_v27, %v11177_v31  ;;  %8515 = vmatpush3.bf16.msra.mxu1 %v9254_v47  ;;  %v9265_v33 = vld [vmem:[%s9613_s16 + $0x338] sm:$0xff]  }
 0xefd   : > { %v5406_v35 = vpop.f32.mrf.mxu0  ;;  %v5479_v16 = vpop.f32.mrf.mxu1  ;;  %8476 = vmatprep.subr.bf16.mxu0 %v9255_v62  ;;  %v5478_v24 = vadd.f32 %v5477_v41, %v11181_v7  ;;  %8516 = vmatprep.subr.bf16.mxu1 %v9256_v44  ;;  %v5668_v3 = vmax.f32 %v5403_v48, 0.0  ;;  %v5670_v58 = vmax.f32 %v5476_v4, 0.0  ;;  %v9264_v62 = vld [vmem:[%s9613_s16 + $0x3f8] sm:$0xff]  }
 0xefe   : > { %v5407_v6 = vadd.f32 %v5406_v35, %v11187_v43  ;;  %v5480_v46 = vadd.f32 %v5479_v16, %v11191_v45  ;;  %7066 = vmatprep.mubr.bf16.mxu0 %v5841_v25  ;;  %7131 = vmatprep.mubr.bf16.mxu1 %v5843_v13  ;;  %v5669_v0 = vmax.f32 %v5405_v34, 0.0  ;;  %v9266_v25 = vld [vmem:[%s9613_s16 + $0x3b8] sm:$0xff]   ;;  %v9267_v13 = vld [vmem:[%s9613_s16 + $0x370] sm:$0xff]  }
 0xeff   : > { %v5408_v32 = vpop.f32.mrf.mxu0  ;;  %v5481_v10 = vpop.f32.mrf.mxu1  ;;  %7067 = vmatmul.mubr.bf16.gmra.mxu0 %v5840_v51  ;;  %7132 = vmatmul.mubr.bf16.gmra.mxu1 %v5842_v19  ;;  %v5671_v37 = vmax.f32 %v5478_v24, 0.0  ;;  %v9268_v19 = vld [vmem:[%s9613_s16 + $0x3f0] sm:$0xff]  }
 0xf00   : > { %v5409_v39 = vadd.f32 %v5408_v32, %v11177_v31  ;;  %v5482_v63 = vadd.f32 %v5481_v10, %v11181_v7  ;;  %8477 = vmatpush3.bf16.msra.mxu0 %v9257_v18  ;;  %v5684_v26 = vmax.f32 %v5407_v6, 0.0  ;;  %v5686_v49 = vmax.f32 %v5480_v46, 0.0  ;;  %8517 = vmatpush3.bf16.msra.mxu1 %v9258_v22  ;;  %v9269_v6 = vld [vmem:[%s9613_s16 + $0x330] sm:$0xff]   ;;  %v9271_v10 = vld [vmem:[%s9613_s16 + $0x368] sm:$0xff]  }
 0xf01   : > { %v5412_v53 = vpop.f32.mrf.mxu0  ;;  %v5485_v52 = vpop.f32.mrf.mxu1  ;;  %8478 = vmatprep.subr.bf16.mxu0 %v9259_v36  ;;  %8518 = vmatprep.subr.bf16.mxu1 %v9260_v20  ;;  %v9270_v32 = vld [vmem:[%s9613_s16 + $0x3b0] sm:$0xff]  }
 0xf02   : > { %v5685_v50 = vmax.f32 %v5409_v39, 0.0  ;;  %v5687_v30 = vmax.f32 %v5482_v63, 0.0  ;;  %v5796_v40 = vpack.c.bf16 %v5684_v26, %v5668_v3  ;;  %v5798_v59 = vpack.c.bf16 %v5686_v49, %v5670_v58 }
 0xf03   : > { %v5414_v8 = vpop.f32.mrf.mxu0  ;;  %v5487_v47 = vpop.f32.mrf.mxu1  ;;  %v5413_v34 = vadd.f32 %v5412_v53, %v11187_v43  ;;  %v5486_v35 = vadd.f32 %v5485_v52, %v11191_v45 }
 0xf04   : > { %v5797_v61 = vpack.c.bf16 %v5685_v50, %v5669_v0  ;;  %v5799_v29 = vpack.c.bf16 %v5687_v30, %v5671_v37  ;;  %8479 = vmatpush3.bf16.msra.mxu0 %v9261_v57  ;;  %v5415_v2 = vadd.f32 %v5414_v8, %v11177_v31  ;;  %8519 = vmatpush3.bf16.msra.mxu1 %v9262_v23  ;;  %v9273_v50 = vld [vmem:[%s9613_s16 + $0x328] sm:$0xff]  }
 0xf05   : > { %v5416_v27 = vpop.f32.mrf.mxu0  ;;  %v5489_v41 = vpop.f32.mrf.mxu1  ;;  %8544 = vmatprep.subr.bf16.mxu0 %v9263_v55  ;;  %v5488_v44 = vadd.f32 %v5487_v47, %v11181_v7  ;;  %8584 = vmatprep.subr.bf16.mxu1 %v9264_v62  ;;  %v5700_v49 = vmax.f32 %v5413_v34, 0.0  ;;  %v5702_v53 = vmax.f32 %v5486_v35, 0.0  ;;  %v9272_v55 = vld [vmem:[%s9613_s16 + $0x3e8] sm:$0xff]  }
 0xf06   : > { %v5417_v18 = vadd.f32 %v5416_v27, %v11187_v43  ;;  %v5490_v51 = vadd.f32 %v5489_v41, %v11191_v45  ;;  %7172 = vmatprep.mubr.bf16.mxu0 %v5797_v61  ;;  %7237 = vmatprep.mubr.bf16.mxu1 %v5799_v29  ;;  %v5701_v39 = vmax.f32 %v5415_v2, 0.0  ;;  %v9274_v62 = vld [vmem:[%s9613_s16 + $0x3a8] sm:$0xff]   ;;  %v9275_v61 = vld [vmem:[%s9613_s16 + $0x360] sm:$0xff]  }
 0xf07   : > { %v5418_v16 = vpop.f32.mrf.mxu0  ;;  %v5491_v22 = vpop.f32.mrf.mxu1  ;;  %7173 = vmatmul.mubr.bf16.vlgmr.msra.gmra.mxu0 %v5796_v40  ;;  %7238 = vmatmul.mubr.bf16.vlgmr.msra.gmra.mxu1 %v5798_v59  ;;  %v5703_v63 = vmax.f32 %v5488_v44, 0.0  ;;  %v9276_v59 = vld [vmem:[%s9613_s16 + $0x3e0] sm:$0xff]  }
 0xf08   : > { %v5419_v36 = vadd.f32 %v5418_v16, %v11177_v31  ;;  %v5492_v24 = vadd.f32 %v5491_v22, %v11181_v7  ;;  %8545 = vmatpush3.bf16.msra.mxu0 %v9265_v33  ;;  %v5716_v46 = vmax.f32 %v5417_v18, 0.0  ;;  %v5718_v20 = vmax.f32 %v5490_v51, 0.0  ;;  %8585 = vmatpush3.bf16.msra.mxu1 %v9266_v25  ;;  %v9277_v18 = vld [vmem:[%s9613_s16 + $0x320] sm:$0xff]   ;;  %v9279_v22 = vld [vmem:[%s9613_s16 + $0x358] sm:$0xff]  }
 0xf09   : > { %v5422_v48 = vpop.f32.mrf.mxu0  ;;  %v5495_v4 = vpop.f32.mrf.mxu1  ;;  %8546 = vmatprep.subr.bf16.mxu0 %v9267_v13  ;;  %8586 = vmatprep.subr.bf16.mxu1 %v9268_v19  ;;  %v9278_v16 = vld [vmem:[%s9613_s16 + $0x3a0] sm:$0xff]  }
 0xf0a   : > { %v5717_v57 = vmax.f32 %v5419_v36, 0.0  ;;  %v5719_v26 = vmax.f32 %v5492_v24, 0.0  ;;  %v5812_v30 = vpack.c.bf16 %v5716_v46, %v5700_v49  ;;  %v5814_v3 = vpack.c.bf16 %v5718_v20, %v5702_v53 }
 0xf0b   : > { %v5424_v52 = vpop.f32.mrf.mxu0  ;;  %v5497_v23 = vpop.f32.mrf.mxu1  ;;  %v5423_v2 = vadd.f32 %v5422_v48, %v11187_v43  ;;  %v5496_v27 = vadd.f32 %v5495_v4, %v11191_v45 }
 0xf0c   : > { %v5813_v0 = vpack.c.bf16 %v5717_v57, %v5701_v39  ;;  %v5815_v37 = vpack.c.bf16 %v5719_v26, %v5703_v63  ;;  %8547 = vmatpush3.bf16.msra.mxu0 %v9269_v6  ;;  %v5425_v58 = vadd.f32 %v5424_v52, %v11177_v31  ;;  %8587 = vmatpush3.bf16.msra.mxu1 %v9270_v32  ;;  %v9281_v57 = vld [vmem:[%s9613_s16 + $0x318] sm:$0xff]  }
 0xf0d   : > { %v5426_v8 = vpop.f32.mrf.mxu0  ;;  %v5499_v47 = vpop.f32.mrf.mxu1  ;;  %8548 = vmatprep.subr.bf16.mxu0 %v9271_v10  ;;  %v5498_v29 = vadd.f32 %v5497_v23, %v11181_v7  ;;  %8588 = vmatprep.subr.bf16.mxu1 %v9272_v55  ;;  %v5732_v20 = vmax.f32 %v5423_v2, 0.0  ;;  %v5734_v48 = vmax.f32 %v5496_v27, 0.0  ;;  %v9280_v10 = vld [vmem:[%s9613_s16 + $0x3d8] sm:$0xff]   ;;  %v11262_v27 = vrot.slane %v11172_v17, %v4694_v56 }
 0xf0e   : > { %v5427_v33 = vadd.f32 %v5426_v8, %v11187_v43  ;;  %v5500_v40 = vadd.f32 %v5499_v47, %v11191_v45  ;;  %7180 = vmatprep.mubr.bf16.mxu0 %v5813_v0  ;;  %7245 = vmatprep.mubr.bf16.mxu1 %v5815_v37  ;;  %v5733_v36 = vmax.f32 %v5425_v58, 0.0  ;;  %v9282_v55 = vld [vmem:[%s9613_s16 + $0x398] sm:$0xff]   ;;  %v9283_v0 = vld [vmem:[%s9613_s16 + $0x350] sm:$0xff]   ;;  %v11273_v56 = vrot.slane %v11172_v17, %v4690_v12  ;;  %v9291_v12 = vld [vmem:[%s9613_s16 + $0x340] sm:$0xff]  }
 0xf0f   : > { %v5428_v41 = vpop.f32.mrf.mxu0  ;;  %v5501_v25 = vpop.f32.mrf.mxu1  ;;  %7181 = vmatmul.mubr.bf16.gmra.mxu0 %v5812_v30  ;;  %7246 = vmatmul.mubr.bf16.gmra.mxu1 %v5814_v3  ;;  %v5735_v24 = vmax.f32 %v5498_v29, 0.0  ;;  %v9284_v3 = vld [vmem:[%s9613_s16 + $0x3d0] sm:$0xff]  }
 0xf10   : > { %v5429_v13 = vadd.f32 %v5428_v41, %v11177_v31  ;;  %v5502_v44 = vadd.f32 %v5501_v25, %v11181_v7  ;;  %8549 = vmatpush3.bf16.msra.mxu0 %v9273_v50  ;;  %v5748_v51 = vmax.f32 %v5427_v33, 0.0  ;;  %v5750_v19 = vmax.f32 %v5500_v40, 0.0  ;;  %8589 = vmatpush3.bf16.msra.mxu1 %v9274_v62  ;;  %v9285_v33 = vld [vmem:[%s9613_s16 + $0x310] sm:$0xff]  }
 0xf11   : > { %v5432_v34 = vpop.f32.mrf.mxu0  ;;  %v5505_v35 = vpop.f32.mrf.mxu1  ;;  %8550 = vmatprep.subr.bf16.mxu0 %v9275_v61  ;;  %8590 = vmatprep.subr.bf16.mxu1 %v9276_v59 }
 0xf12   : > { %v5749_v6 = vmax.f32 %v5429_v13, 0.0  ;;  %v5751_v46 = vmax.f32 %v5502_v44, 0.0  ;;  %v5828_v26 = vpack.c.bf16 %v5748_v51, %v5732_v20  ;;  %v5830_v49 = vpack.c.bf16 %v5750_v19, %v5734_v48 }
 0xf13   : > { %v5434_v4 = vpop.f32.mrf.mxu0  ;;  %v5507_v32 = vpop.f32.mrf.mxu1  ;;  %v5433_v58 = vadd.f32 %v5432_v34, %v11187_v43  ;;  %v5506_v8 = vadd.f32 %v5505_v35, %v11191_v45  ;;  %v11268_v19 = vrot.slane %v11172_v17, %v11096_v60 }
 0xf14   : > { %v5829_v39 = vpack.c.bf16 %v5749_v6, %v5733_v36  ;;  %v5831_v63 = vpack.c.bf16 %v5751_v46, %v5735_v24  ;;  %8551 = vmatpush3.bf16.msra.mxu0 %v9277_v18  ;;  %v5435_v53 = vadd.f32 %v5434_v4, %v11177_v31  ;;  %8591 = vmatpush3.bf16.msra.mxu1 %v9278_v16  ;;  %v9288_v16 = vld [vmem:[%s9613_s16 + $0x3c8] sm:$0xff]  }
 0xf15   : > { %v5436_v52 = vpop.f32.mrf.mxu0  ;;  %v5509_v23 = vpop.f32.mrf.mxu1  ;;  %8552 = vmatprep.subr.bf16.mxu0 %v9279_v22  ;;  %v5508_v37 = vadd.f32 %v5507_v32, %v11181_v7  ;;  %8592 = vmatprep.subr.bf16.mxu1 %v9280_v10  ;;  %v5764_v18 = vmax.f32 %v5433_v58, 0.0  ;;  %v5766_v51 = vmax.f32 %v5506_v8, 0.0  ;;  %v9289_v24 = vld [vmem:[%s9613_s16 + $0x308] sm:$0xff]  }
 0xf16   : > { %v5437_v50 = vadd.f32 %v5436_v52, %v11187_v43  ;;  %v5510_v30 = vadd.f32 %v5509_v23, %v11191_v45  ;;  %7188 = vmatprep.mubr.bf16.mxu0 %v5829_v39  ;;  %7253 = vmatprep.mubr.bf16.mxu1 %v5831_v63  ;;  %v11257_v45 = vrot.slane %v11172_v17, %v11086_v42  ;;  %v5765_v41 = vmax.f32 %v5435_v53, 0.0  ;;  %v9290_v4 = vld [vmem:[%s9613_s16 + $0x388] sm:$0xff]   ;;  %v9292_v39 = vld [vmem:[%s9613_s16 + $0x3c0] sm:$0xff]  }
 0xf17   : > { %v5438_v47 = vpop.f32.mrf.mxu0  ;;  %v5511_v62 = vpop.f32.mrf.mxu1  ;;  %7189 = vmatmul.mubr.bf16.gmra.mxu0 %v5828_v26  ;;  %7254 = vmatmul.mubr.bf16.gmra.mxu1 %v5830_v49  ;;  %v5767_v25 = vmax.f32 %v5508_v37, 0.0  ;;  %v9293_v23 = vld [vmem:[%s9613_s16 + $0x300] sm:$0xff]  }
 0xf18   : > { %v5439_v61 = vadd.f32 %v5438_v47, %v11177_v31  ;;  %v5512_v29 = vadd.f32 %v5511_v62, %v11181_v7  ;;  %8553 = vmatpush3.bf16.msra.mxu0 %v9281_v57  ;;  %v5780_v40 = vmax.f32 %v5437_v50, 0.0  ;;  %v5782_v59 = vmax.f32 %v5510_v30, 0.0  ;;  %8593 = vmatpush3.bf16.msra.mxu1 %v9282_v55  ;;  %v9286_v31 = vld [vmem:[%s9613_s16 + $0x390] sm:$0xff]   ;;  %v9287_v7 = vld [vmem:[%s9613_s16 + $0x348] sm:$0xff]   ;;  %v9294_v30 = vld [vmem:[%s9613_s16 + $0x380] sm:$0xff]  }
 0xf19   : > { %v5548_v2 = vpop.f32.mrf.mxu0  ;;  %v5621_v43 = vpop.f32.mrf.mxu1  ;;  %8554 = vmatprep.subr.bf16.mxu0 %v9283_v0  ;;  %8594 = vmatprep.subr.bf16.mxu1 %v9284_v3 }
 0xf1a   : > { %v5781_v13 = vmax.f32 %v5439_v61, 0.0  ;;  %v5783_v44 = vmax.f32 %v5512_v29, 0.0  ;;  %v5844_v6 = vpack.c.bf16 %v5780_v40, %v5764_v18  ;;  %v5846_v46 = vpack.c.bf16 %v5782_v59, %v5766_v51 }
 0xf1b   : > { %v5550_v34 = vpop.f32.mrf.mxu0  ;;  %v5623_v35 = vpop.f32.mrf.mxu1  ;;  %v5549_v63 = vadd.f32 %v5548_v2, %v11268_v19  ;;  %v5622_v57 = vadd.f32 %v5621_v43, %v11273_v56 }
 0xf1c   : > { %v5845_v22 = vpack.c.bf16 %v5781_v13, %v5765_v41  ;;  %v5847_v36 = vpack.c.bf16 %v5783_v44, %v5767_v25  ;;  %8555 = vmatpush3.bf16.msra.mxu0 %v9285_v33  ;;  %v5551_v20 = vadd.f32 %v5550_v34, %v11257_v45  ;;  %8595 = vmatpush3.bf16.msra.mxu1 %v9286_v31 }
 0xf1d   : > { %v5552_v48 = vpop.f32.mrf.mxu0  ;;  %v5625_v1 = vpop.f32.mrf.mxu1  ;;  %8556 = vmatprep.subr.bf16.mxu0 %v9287_v7  ;;  %v5624_v17 = vadd.f32 %v5623_v35, %v11262_v27  ;;  %8596 = vmatprep.subr.bf16.mxu1 %v9288_v16  ;;  %v5672_v62 = vmax.f32 %v5549_v63, 0.0  ;;  %v5674_v61 = vmax.f32 %v5622_v57, 0.0 }
 0xf1e   : > { %v5553_v32 = vadd.f32 %v5552_v48, %v11268_v19  ;;  %v5626_v10 = vadd.f32 %v5625_v1, %v11273_v56  ;;  %7196 = vmatprep.mubr.bf16.mxu0 %v5845_v22  ;;  %7261 = vmatprep.mubr.bf16.mxu1 %v5847_v36  ;;  %v5673_v3 = vmax.f32 %v5551_v20, 0.0 }
 0xf1f   : > { %v5554_v26 = vpop.f32.mrf.mxu0  ;;  %v5627_v49 = vpop.f32.mrf.mxu1  ;;  %7197 = vmatmul.mubr.bf16.gmra.mxu0 %v5844_v6  ;;  %7262 = vmatmul.mubr.bf16.gmra.mxu1 %v5846_v46  ;;  %v5675_v58 = vmax.f32 %v5624_v17, 0.0 }
 0xf20   : > { %v5555_v53 = vadd.f32 %v5554_v26, %v11257_v45  ;;  %v5628_v52 = vadd.f32 %v5627_v49, %v11262_v27  ;;  %8557 = vmatpush3.bf16.msra.mxu0 %v9289_v24  ;;  %v5688_v55 = vmax.f32 %v5553_v32, 0.0  ;;  %v5690_v0 = vmax.f32 %v5626_v10, 0.0  ;;  %8597 = vmatpush3.bf16.msra.mxu1 %v9290_v4 }
 0xf21   : > { %v5558_v37 = vpop.f32.mrf.mxu0  ;;  %v5631_v50 = vpop.f32.mrf.mxu1  ;;  %8558 = vmatprep.subr.bf16.mxu0 %v9291_v12  ;;  %8598 = vmatprep.subr.bf16.mxu1 %v9292_v39 }
 0xf22   : > { %v5689_v8 = vmax.f32 %v5555_v53, 0.0  ;;  %v5691_v47 = vmax.f32 %v5628_v52, 0.0  ;;  %v5800_v2 = vpack.c.bf16 %v5688_v55, %v5672_v62  ;;  %v5802_v43 = vpack.c.bf16 %v5690_v0, %v5674_v61 }
 0xf23   : > { %v5560_v29 = vpop.f32.mrf.mxu0  ;;  %v5633_v33 = vpop.f32.mrf.mxu1  ;;  %v5559_v18 = vadd.f32 %v5558_v37, %v11268_v19  ;;  %v5632_v51 = vadd.f32 %v5631_v50, %v11273_v56 }
 0xf24   : > { %v5801_v40 = vpack.c.bf16 %v5689_v8, %v5673_v3  ;;  %v5803_v59 = vpack.c.bf16 %v5691_v47, %v5675_v58  ;;  %8559 = vmatpush3.bf16.msra.mxu0 %v9293_v23  ;;  %v5561_v31 = vadd.f32 %v5560_v29, %v11257_v45  ;;  %8599 = vmatpush3.bf16.msra.mxu1 %v9294_v30 }
 0xf25   : > { %v5562_v7 = vpop.f32.mrf.mxu0  ;;  %v5635_v41 = vpop.f32.mrf.mxu1  ;;  %v5634_v25 = vadd.f32 %v5633_v33, %v11262_v27  ;;  %v5704_v12 = vmax.f32 %v5559_v18, 0.0  ;;  %v5706_v17 = vmax.f32 %v5632_v51, 0.0 }
 0xf26   : > { %v5563_v13 = vadd.f32 %v5562_v7, %v11268_v19  ;;  %v5636_v44 = vadd.f32 %v5635_v41, %v11273_v56  ;;  %7302 = vmatprep.mubr.bf16.mxu0 %v5801_v40  ;;  %7367 = vmatprep.mubr.bf16.mxu1 %v5803_v59  ;;  %v5705_v20 = vmax.f32 %v5561_v31, 0.0 }
 0xf27   : > { %v5564_v34 = vpop.f32.mrf.mxu0  ;;  %v5637_v35 = vpop.f32.mrf.mxu1  ;;  %7303 = vmatmul.mubr.bf16.vlgmr.msra.gmra.mxu0 %v5800_v2  ;;  %7368 = vmatmul.mubr.bf16.vlgmr.msra.gmra.mxu1 %v5802_v43  ;;  %v5707_v48 = vmax.f32 %v5634_v25, 0.0 }
 0xf28   : > { %v5565_v16 = vadd.f32 %v5564_v34, %v11257_v45  ;;  %v5638_v22 = vadd.f32 %v5637_v35, %v11262_v27  ;;  %v5720_v36 = vmax.f32 %v5563_v13, 0.0  ;;  %v5722_v24 = vmax.f32 %v5636_v44, 0.0 }
 0xf29   : > { %v5568_v6 = vpop.f32.mrf.mxu0  ;;  %v5641_v46 = vpop.f32.mrf.mxu1 }
 0xf2a   : > { %v5721_v1 = vmax.f32 %v5565_v16, 0.0  ;;  %v5723_v4 = vmax.f32 %v5638_v22, 0.0  ;;  %v5816_v57 = vpack.c.bf16 %v5720_v36, %v5704_v12  ;;  %v5818_v26 = vpack.c.bf16 %v5722_v24, %v5706_v17 }
 0xf2b   : > { %v5570_v32 = vpop.f32.mrf.mxu0  ;;  %v5643_v10 = vpop.f32.mrf.mxu1  ;;  %v5569_v37 = vadd.f32 %v5568_v6, %v11268_v19  ;;  %v5642_v50 = vadd.f32 %v5641_v46, %v11273_v56 }
 0xf2c   : > { %v5817_v39 = vpack.c.bf16 %v5721_v1, %v5705_v20  ;;  %v5819_v63 = vpack.c.bf16 %v5723_v4, %v5707_v48  ;;  %v5571_v49 = vadd.f32 %v5570_v32, %v11257_v45  ;;  %v5644_v23 = vadd.f32 %v5643_v10, %v11262_v27 }
 0xf2d   : > { %v5572_v53 = vpop.f32.mrf.mxu0  ;;  %v5645_v52 = vpop.f32.mrf.mxu1  ;;  %v5736_v43 = vmax.f32 %v5569_v37, 0.0  ;;  %v5738_v31 = vmax.f32 %v5642_v50, 0.0 }
 0xf2e   : > { %v5573_v55 = vadd.f32 %v5572_v53, %v11268_v19  ;;  %v5646_v0 = vadd.f32 %v5645_v52, %v11273_v56  ;;  %7310 = vmatprep.mubr.bf16.mxu0 %v5817_v39  ;;  %7375 = vmatprep.mubr.bf16.mxu1 %v5819_v63  ;;  %v5737_v33 = vmax.f32 %v5571_v49, 0.0  ;;  %v5739_v40 = vmax.f32 %v5644_v23, 0.0 }
 0xf2f   : > { %v5574_v30 = vpop.f32.mrf.mxu0  ;;  %v5647_v3 = vpop.f32.mrf.mxu1  ;;  %7311 = vmatmul.mubr.bf16.gmra.mxu0 %v5816_v57  ;;  %7376 = vmatmul.mubr.bf16.gmra.mxu1 %v5818_v26 }
 0xf30   : > { %v5575_v58 = vadd.f32 %v5574_v30, %v11257_v45  ;;  %v5648_v8 = vadd.f32 %v5647_v3, %v11262_v27  ;;  %v5752_v47 = vmax.f32 %v5573_v55, 0.0  ;;  %v5754_v62 = vmax.f32 %v5646_v0, 0.0 }
 0xf31   : > { %v5578_v61 = vpop.f32.mrf.mxu0  ;;  %v5651_v29 = vpop.f32.mrf.mxu1 }
 0xf32   : > { %v5753_v59 = vmax.f32 %v5575_v58, 0.0  ;;  %v5755_v2 = vmax.f32 %v5648_v8, 0.0  ;;  %v5832_v44 = vpack.c.bf16 %v5752_v47, %v5736_v43  ;;  %v5834_v18 = vpack.c.bf16 %v5754_v62, %v5738_v31 }
 0xf33   : > { %v5580_v7 = vpop.f32.mrf.mxu0  ;;  %v5653_v41 = vpop.f32.mrf.mxu1  ;;  %v5579_v24 = vadd.f32 %v5578_v61, %v11268_v19  ;;  %v5652_v20 = vadd.f32 %v5651_v29, %v11273_v56 }
 0xf34   : > { %v5833_v25 = vpack.c.bf16 %v5753_v59, %v5737_v33  ;;  %v5835_v13 = vpack.c.bf16 %v5755_v2, %v5739_v40  ;;  %v5581_v51 = vadd.f32 %v5580_v7, %v11257_v45  ;;  %v5654_v16 = vadd.f32 %v5653_v41, %v11262_v27 }
 0xf35   : > { %v5582_v34 = vpop.f32.mrf.mxu0  ;;  %v5655_v35 = vpop.f32.mrf.mxu1  ;;  %v5768_v63 = vmax.f32 %v5579_v24, 0.0  ;;  %v5770_v57 = vmax.f32 %v5652_v20, 0.0 }
 0xf36   : > { %v5583_v22 = vadd.f32 %v5582_v34, %v11268_v19  ;;  %v5656_v36 = vadd.f32 %v5655_v35, %v11273_v56  ;;  %7318 = vmatprep.mubr.bf16.mxu0 %v5833_v25  ;;  %7383 = vmatprep.mubr.bf16.mxu1 %v5835_v13  ;;  %v5769_v4 = vmax.f32 %v5581_v51, 0.0  ;;  %v5771_v17 = vmax.f32 %v5654_v16, 0.0  ;;  %v11315_v56 = vld [vmem:[%s9618_s3] sm:$0x3f] }
 0xf37   : > { %v5584_v6 = vpop.f32.mrf.mxu0  ;;  %v5657_v46 = vpop.f32.mrf.mxu1  ;;  %7319 = vmatmul.mubr.bf16.gmra.mxu0 %v5832_v44  ;;  %7384 = vmatmul.mubr.bf16.gmra.mxu1 %v5834_v18  ;;  %11673 = vst [vmem:[#allocation12_spill] sm:$0xff] %v11315_v56  ;;  %v11319_v52 = vrot.slane %v11315_v56, %v11008_v38 }
 0xf38   : > { %v5585_v48 = vadd.f32 %v5584_v6, %v11257_v45  ;;  %v5658_v1 = vadd.f32 %v5657_v46, %v11262_v27  ;;  %v5784_v12 = vmax.f32 %v5583_v22, 0.0  ;;  %v5786_v32 = vmax.f32 %v5656_v36, 0.0 }
 0xf3a   : > { %v5785_v10 = vmax.f32 %v5585_v48, 0.0  ;;  %v5787_v39 = vmax.f32 %v5658_v1, 0.0  ;;  %v5848_v49 = vpack.c.bf16 %v5784_v12, %v5768_v63  ;;  %v5850_v53 = vpack.c.bf16 %v5786_v32, %v5770_v57 }
 0xf3c   : > { %v5849_v19 = vpack.c.bf16 %v5785_v10, %v5769_v4  ;;  %v5851_v26 = vpack.c.bf16 %v5787_v39, %v5771_v17 }
 0xf3e   : > { %7326 = vmatprep.mubr.bf16.mxu0 %v5849_v19  ;;  %7391 = vmatprep.mubr.bf16.mxu1 %v5851_v26 }
 0xf3f   : > { %7327 = vmatmul.mubr.bf16.gmra.mxu0 %v5848_v49  ;;  %7392 = vmatmul.mubr.bf16.gmra.mxu1 %v5850_v53 }
 0xf59   : > { %v8320_v45 = vpop.f32.mrf.mxu0  ;;  %v8360_v27 = vpop.f32.mrf.mxu1 }
 0xf5b   : > { %v8321_v23 = vpop.f32.mrf.mxu0  ;;  %v8361_v55 = vpop.f32.mrf.mxu1 }
 0xf5c   : > { %v8322_v0 = vadd.f32 %v8321_v23, %v8320_v45  ;;  %v8362_v37 = vadd.f32 %v8361_v55, %v8360_v27 }
 0xf5d   : > { %v8323_v50 = vpop.f32.mrf.mxu0  ;;  %v8363_v30 = vpop.f32.mrf.mxu1 }
 0xf5e   : > { %v6915_v3 = vadd.f32 %v8322_v0, %v11319_v52 }
 0xf5f   : > { %v8324_v58 = vpop.f32.mrf.mxu0  ;;  %v8364_v8 = vpop.f32.mrf.mxu1 }
 0xf60   : > { %v11322_v47 = vadd.f32 %v8362_v37, %v6915_v3  ;;  %v8325_v62 = vadd.f32 %v8324_v58, %v8323_v50  ;;  %v8365_v61 = vadd.f32 %v8364_v8, %v8363_v30 }
 0xf61   : > { %v8326_v29 = vpop.f32.mrf.mxu0  ;;  %v8366_v33 = vpop.f32.mrf.mxu1 }
 0xf62   : > { %v6918_v40 = vadd.f32 %v8325_v62, %v11319_v52 }
 0xf63   : > { %v8327_v38 = vpop.f32.mrf.mxu0  ;;  %v8367_v59 = vpop.f32.mrf.mxu1 }
 0xf64   : > { %v11325_v2 = vadd.f32 %v8365_v61, %v6918_v40  ;;  %v8328_v43 = vadd.f32 %v8327_v38, %v8326_v29  ;;  %v8368_v31 = vadd.f32 %v8367_v59, %v8366_v33 }
 0xf65   : > { %v8329_v7 = vpop.f32.mrf.mxu0  ;;  %v8369_v41 = vpop.f32.mrf.mxu1 }
 0xf66   : > { %v6923_v25 = vadd.f32 %v8328_v43, %v11319_v52 }
 0xf67   : > { %v8330_v13 = vpop.f32.mrf.mxu0  ;;  %v8370_v44 = vpop.f32.mrf.mxu1 }
 0xf68   : > { %v11328_v18 = vadd.f32 %v8368_v31, %v6923_v25  ;;  %v8331_v51 = vadd.f32 %v8330_v13, %v8329_v7  ;;  %v8371_v34 = vadd.f32 %v8370_v44, %v8369_v41 }
 0xf6a   : > { %v6926_v35 = vadd.f32 %v8331_v51, %v11319_v52 }
 0xf6c   : > { %v11331_v16 = vadd.f32 %v8371_v34, %v6926_v35 }
 0xf97   : > { %v8332_v22 = vpop.f32.mrf.mxu0  ;;  %v8372_v36 = vpop.f32.mrf.mxu1 }
 0xf99   : > { %v8333_v24 = vpop.f32.mrf.mxu0  ;;  %v8373_v6 = vpop.f32.mrf.mxu1 }
 0xf9a   : > { %v8334_v46 = vadd.f32 %v8333_v24, %v8332_v22  ;;  %v8374_v20 = vadd.f32 %v8373_v6, %v8372_v36 }
 0xf9b   : > { %v8335_v48 = vpop.f32.mrf.mxu0  ;;  %v8375_v1 = vpop.f32.mrf.mxu1 }
 0xf9c   : > { %v6931_v4 = vadd.f32 %v8334_v46, %v11319_v52 }
 0xf9d   : > { %v8336_v12 = vpop.f32.mrf.mxu0  ;;  %v8376_v17 = vpop.f32.mrf.mxu1 }
 0xf9e   : > { %v11334_v32 = vadd.f32 %v8374_v20, %v6931_v4  ;;  %v8337_v10 = vadd.f32 %v8336_v12, %v8335_v48  ;;  %v8377_v39 = vadd.f32 %v8376_v17, %v8375_v1 }
 0xf9f   : > { %v8338_v63 = vpop.f32.mrf.mxu0  ;;  %v8378_v57 = vpop.f32.mrf.mxu1 }
 0xfa0   : > { %v6934_v19 = vadd.f32 %v8337_v10, %v11319_v52 }
 0xfa1   : > { %v8339_v26 = vpop.f32.mrf.mxu0  ;;  %v8379_v49 = vpop.f32.mrf.mxu1 }
 0xfa2   : > { %v11337_v53 = vadd.f32 %v8377_v39, %v6934_v19  ;;  %v8340_v45 = vadd.f32 %v8339_v26, %v8338_v63  ;;  %v8380_v27 = vadd.f32 %v8379_v49, %v8378_v57 }
 0xfa3   : > { %v8341_v23 = vpop.f32.mrf.mxu0  ;;  %v8381_v55 = vpop.f32.mrf.mxu1 }
 0xfa4   : > { %v6939_v0 = vadd.f32 %v8340_v45, %v11319_v52 }
 0xfa5   : > { %v8342_v37 = vpop.f32.mrf.mxu0  ;;  %v8382_v50 = vpop.f32.mrf.mxu1 }
 0xfa6   : > { %v11340_v30 = vadd.f32 %v8380_v27, %v6939_v0  ;;  %v8343_v3 = vadd.f32 %v8342_v37, %v8341_v23  ;;  %v8383_v58 = vadd.f32 %v8382_v50, %v8381_v55 }
 0xfa7   : > { %v8400_v8 = vpop.f32.mrf.mxu0  ;;  %v11342_v62 = vpop.f32.mrf.mxu1 }
 0xfa8   : > { %11674 = vst [vmem:[#allocation13_spill] sm:$0xff] %v11340_v30  ;;  %v6942_v61 = vadd.f32 %v8343_v3, %v11319_v52 }
 0xfa9   : > { %v8401_v29 = vpop.f32.mrf.mxu0  ;;  %v8441_v33 = vpop.f32.mrf.mxu1 }
 0xfaa   : > { %v11345_v40 = vadd.f32 %v8383_v58, %v6942_v61 }
 0xfab   : > { %v8403_v38 = vpop.f32.mrf.mxu0  ;;  %v11347_v59 = vpop.f32.mrf.mxu1 }
 0xfac   : > { %11675 = vst [vmem:[#allocation14_spill] sm:$0xff] %v11345_v40 }
 0xfad   : > { %v8404_v43 = vpop.f32.mrf.mxu0  ;;  %v11349_v31 = vpop.f32.mrf.mxu1 }
 0xfaf   : > { %v8406_v7 = vpop.f32.mrf.mxu0  ;;  %v11351_v41 = vpop.f32.mrf.mxu1 }
 0xfb1   : > { %v8407_v25 = vpop.f32.mrf.mxu0  ;;  %v11353_v13 = vpop.f32.mrf.mxu1 }
 0xfb3   : > { %v11355_v44 = vpop.f32.mrf.mxu0  ;;  %v11357_v51 = vpop.f32.mrf.mxu1 }
 0xfb5   : > { %v8410_v52 = vpop.f32.mrf.mxu0  ;;  %v11359_v34 = vpop.f32.mrf.mxu1 }
 0xfb7   : > { %v11361_v35 = vpop.f32.mrf.mxu0  ;;  %v11363_v22 = vpop.f32.mrf.mxu1 }
 0xfb9   : > { %v11365_v36 = vpop.f32.mrf.mxu0  ;;  %v11367_v24 = vpop.f32.mrf.mxu1 }
 0xfbb   : > { %v11369_v6 = vpop.f32.mrf.mxu0  ;;  %v11371_v46 = vpop.f32.mrf.mxu1 }
 0xfbd   : > { %v11373_v20 = vpop.f32.mrf.mxu0  ;;  %v11375_v48 = vpop.f32.mrf.mxu1 }
 0xfbf   : > { %v11377_v1 = vpop.f32.mrf.mxu0  ;;  %v11379_v4 = vpop.f32.mrf.mxu1 }
 0xfc0   : > { %11676 = vst [vmem:[#allocation15_spill] sm:$0xff] %v11379_v4 }
 0xfc1   : > { %v11381_v12 = vpop.f32.mrf.mxu0  ;;  %v11383_v17 = vpop.f32.mrf.mxu1 }
 0xfc2   : > { %11677 = vst [vmem:[#allocation16_spill] sm:$0xff] %v11383_v17 }
 0xfc3   : > { %v11385_v10 = vpop.f32.mrf.mxu0  ;;  %v11387_v39 = vpop.f32.mrf.mxu1 }
 0xfc4   : > { %11678 = vst [vmem:[#allocation17_spill] sm:$0xff] %v11385_v10  ;;  %11679 = vst [vmem:[#allocation18_spill] sm:$0xff] %v11387_v39  ;;  %v8402_v39 = vadd.f32 %v8401_v29, %v8400_v8  ;;  %v8408_v8 = vadd.f32 %v8407_v25, %v8406_v7 }
 0xfc5   : > { %v11389_v63 = vpop.f32.mrf.mxu0  ;;  %v11391_v57 = vpop.f32.mrf.mxu1 }
 0xfc6   : > { %11680 = vst [vmem:[#allocation19_spill] sm:$0xff] %v11389_v63  ;;  %11681 = vst [vmem:[#allocation20_spill] sm:$0xff] %v11391_v57  ;;  %v7045_v54 = vadd.f32 %v8402_v39, %v11322_v47  ;;  %v8405_v63 = vadd.f32 %v8404_v43, %v8403_v38  ;;  %v8445_v47 = vadd.f32 %v11349_v31, %v11347_v59 }
 0xfc7   : > { %v8480_v19 = vpop.f32.mrf.mxu0  ;;  %v8520_v26 = vpop.f32.mrf.mxu1 }
 0xfc9   : > { %v8481_v49 = vpop.f32.mrf.mxu0  ;;  %v8521_v45 = vpop.f32.mrf.mxu1 }
 0xfca   : > { %v8482_v30 = vadd.f32 %v8481_v49, %v8480_v19 }
 0xfcb   : > { %v8483_v27 = vpop.f32.mrf.mxu0  ;;  %v8523_v23 = vpop.f32.mrf.mxu1 }
 0xfcd   : > { %v8484_v55 = vpop.f32.mrf.mxu0  ;;  %v8524_v0 = vpop.f32.mrf.mxu1 }
 0xfce   : > { %v8485_v43 = vadd.f32 %v8484_v55, %v8483_v27 }
 0xfcf   : > { %v8486_v37 = vpop.f32.mrf.mxu0  ;;  %v11393_v50 = vpop.f32.mrf.mxu1 }
 0xfd1   : > { %v8487_v3 = vpop.f32.mrf.mxu0  ;;  %v11395_v58 = vpop.f32.mrf.mxu1 }
 0xfd3   : > { %v8489_v61 = vpop.f32.mrf.mxu0  ;;  %v11397_v42 = vpop.f32.mrf.mxu1 }
 0xfd5   : > { %v8490_v56 = vpop.f32.mrf.mxu0  ;;  %v11399_v60 = vpop.f32.mrf.mxu1 }
 0xfd7   : > { %v11401_v11 = vpop.f32.mrf.mxu0  ;;  %v11403_v28 = vpop.f32.mrf.mxu1 }
 0xfd8   : > { %11682 = vst [vmem:[#allocation21_spill] sm:$0xff] %v11403_v28 }
 0xfd9   : > { %v11405_v5 = vpop.f32.mrf.mxu0  ;;  %v11407_v9 = vpop.f32.mrf.mxu1 }
 0xfda   : > { %11683 = vst [vmem:[#allocation22_spill] sm:$0xff] %v11407_v9  ;;  %v8442_v9 = vadd.f32 %v8441_v33, %v11342_v62  ;;  %v7053_v62 = vadd.f32 %v8408_v8, %v11328_v18  ;;  %v8411_v33 = vadd.f32 %v8410_v52, %v11355_v44  ;;  %v8414_v18 = vadd.f32 %v11365_v36, %v11361_v35 }
 0xfdb   : > { %v11409_v57 = vpop.f32.mrf.mxu0  ;;  %v11411_v21 = vpop.f32.mrf.mxu1  ;;  %v8525_v44 = vadd.f32 %v8524_v0, %v8523_v23  ;;  %v8528_v35 = vadd.f32 %v11395_v58, %v11393_v50 }
 0xfdc   : > { %11684 = vst [vmem:[#allocation23_spill] sm:$0xff] %v11409_v57  ;;  %11685 = vst [vmem:[#allocation24_spill] sm:$0xff] %v11411_v21  ;;  %v7110_v21 = vadd.f32 %v8442_v9, %v7045_v54  ;;  %v8522_v54 = vadd.f32 %v8521_v45, %v8520_v26  ;;  %v7056_v31 = vadd.f32 %v8411_v33, %v11331_v16 }
 0xfdd   : > { %v11413_v40 = vpop.f32.mrf.mxu0  ;;  %v11415_v17 = vpop.f32.mrf.mxu1  ;;  %v8491_v45 = vadd.f32 %v8490_v56, %v8489_v61  ;;  %v8417_v16 = vadd.f32 %v11373_v20, %v11369_v6  ;;  %v7061_v23 = vadd.f32 %v8414_v18, %v11334_v32  ;;  %v8494_v6 = vadd.f32 %v11405_v5, %v11401_v11 }
 0xfde   : > { %11686 = vst [vmem:[#allocation25_spill] sm:$0xff] %v11413_v40  ;;  %11687 = vst [vmem:[#allocation26_spill] sm:$0xff] %v11415_v17  ;;  %v7048_v17 = vadd.f32 %v8405_v63, %v11325_v2  ;;  %v7175_v38 = vadd.f32 %v8482_v30, %v7110_v21  ;;  %v8448_v2 = vadd.f32 %v11353_v13, %v11351_v41 }
 0xfdf   : > { %v11417_v4 = vpop.f32.mrf.mxu0  ;;  %v11420_v10 = vpop.f32.mrf.mxu1  ;;  %v8488_v63 = vadd.f32 %v8487_v3, %v8486_v37  ;;  %v8451_v41 = vadd.f32 %v11359_v34, %v11357_v51  ;;  %v7064_v33 = vadd.f32 %v8417_v16, %v11337_v53 }
 0xfe0   : > { %11688 = vst [vmem:[#allocation27_spill] sm:$0xff] %v11417_v4  ;;  %v7113_v25 = vadd.f32 %v8445_v47, %v7048_v17  ;;  %v7240_v49 = vadd.f32 %v8522_v54, %v7175_v38  ;;  %v7118_v30 = vadd.f32 %v8448_v2, %v7053_v62 }
 0xfe1   : > { %v11422_v28 = vpop.f32.mrf.mxu0  ;;  %v11425_v57 = vpop.f32.mrf.mxu1  ;;  %v7121_v38 = vadd.f32 %v8451_v41, %v7056_v31 }
 0xfe2   : > { %v7183_v13 = vadd.f32 %v8488_v63, %v7118_v30  ;;  %v11692_v30 = vld [vmem:[#allocation13_spill] sm:$0xff] }
 0xfe3   : > { %v11427_v29 = vpop.f32.mrf.mxu0  ;;  %v11430_v40 = vpop.f32.mrf.mxu1  ;;  %v7186_v61 = vadd.f32 %v8491_v45, %v7121_v38  ;;  %v11690_v53 = vld [vmem:[#allocation23_spill] sm:$0xff] }
 0xfe4   : > { %11689 = vst [vmem:[#allocation28_spill] sm:$0xff] %v11430_v40  ;;  %v7178_v40 = vadd.f32 %v8485_v43, %v7113_v25  ;;  %v7248_v34 = vadd.f32 %v8528_v35, %v7183_v13  ;;  %v11697_v13 = vld [vmem:[#allocation5_spill] sm:$0xff] }
 0xfe5   : > { %v11432_v4 = vpop.f32.mrf.mxu0  ;;  %v11436_v39 = vpop.f32.mrf.mxu1  ;;  %v11691_v63 = vld [vmem:[#allocation25_spill] sm:$0xff] }
 0xfe6   : > { %v7243_v37 = vadd.f32 %v8525_v44, %v7178_v40  ;;  %v8454_v40 = vadd.f32 %v11367_v24, %v11363_v22  ;;  %v8531_v22 = vadd.f32 %v11399_v60, %v11397_v42 }
 0xfe7   : > { %v8560_v7 = vpop.f32.mrf.mxu0  ;;  %v8600_v9 = vpop.f32.mrf.mxu1 }
 0xfe8   : > { %v7251_v2 = vadd.f32 %v8531_v22, %v7186_v61  ;;  %v11706_v22 = vld [vmem:[#allocation20_spill] sm:$0xff] }
 0xfe9   : > { %v8561_v19 = vpop.f32.mrf.mxu0  ;;  %v8601_v21 = vpop.f32.mrf.mxu1 }
 0xfea   : > { %v8562_v59 = vadd.f32 %v8561_v19, %v8560_v7  ;;  %v8602_v17 = vadd.f32 %v8601_v21, %v8600_v9  ;;  %v7126_v7 = vadd.f32 %v8454_v40, %v7061_v23  ;;  %v8457_v9 = vadd.f32 %v11375_v48, %v11371_v46  ;;  %v11695_v46 = vld [vmem:[#allocation21_spill] sm:$0xff]  ;;  %v11696_v48 = vld [vmem:[#allocation22_spill] sm:$0xff]  ;;  %v11701_v40 = vld [vmem:[#allocation24_spill] sm:$0xff] }
 0xfeb   : > { %v8563_v27 = vpop.f32.mrf.mxu0  ;;  %v8603_v26 = vpop.f32.mrf.mxu1  ;;  %v8497_v19 = vadd.f32 %v11691_v63, %v11690_v53 }
 0xfec   : > { %v7305_v52 = vadd.f32 %v8562_v59, %v7240_v49  ;;  %v7129_v21 = vadd.f32 %v8457_v9, %v7064_v33 }
 0xfed   : > { %v8564_v55 = vpop.f32.mrf.mxu0  ;;  %v8604_v47 = vpop.f32.mrf.mxu1 }
 0xfee   : > { %v7370_v3 = vadd.f32 %v8602_v17, %v7305_v52  ;;  %v8565_v8 = vadd.f32 %v8564_v55, %v8563_v27  ;;  %v8605_v43 = vadd.f32 %v8604_v47, %v8603_v26  ;;  %v11694_v27 = vld [vmem:[#allocation19_spill] sm:$0xff]  ;;  %v8534_v52 = vadd.f32 %v11696_v48, %v11695_v46  ;;  %v11708_v46 = vld [vmem:[#allocation28_spill] sm:$0xff] }
 0xfef   : > { %v8566_v36 = vpop.f32.mrf.mxu0  ;;  %v8606_v51 = vpop.f32.mrf.mxu1  ;;  %v11698_v55 = vld [vmem:[#allocation15_spill] sm:$0xff] }
 0xff0   : > { %v7308_v0 = vadd.f32 %v8565_v8, %v7243_v37  ;;  %v11453_v56 = vadd.f32 %v7370_v3, %v10780_v15  ;;  %v8420_v15 = vadd.f32 %v11381_v12, %v11377_v1  ;;  %v7191_v12 = vadd.f32 %v8494_v6, %v7126_v7  ;;  %v11699_v37 = vld [vmem:[#allocation16_spill] sm:$0xff]  ;;  %v11700_v47 = vld [vmem:[#allocation27_spill] sm:$0xff]  ;;  %v11703_v6 = vld [vmem:[#allocation14_spill] sm:$0xff] }
 0xff1   : > { %v8567_v62 = vpop.f32.mrf.mxu0  ;;  %v8607_v58 = vpop.f32.mrf.mxu1  ;;  %v8460_v3 = vadd.f32 %v11699_v37, %v11698_v55  ;;  %v7194_v8 = vadd.f32 %v8497_v19, %v7129_v21  ;;  %v8500_v38 = vadd.f32 %v11422_v28, %v11700_v47  ;;  %v11704_v28 = vld [vmem:[#allocation4_spill] sm:$0xff]  ;;  %v8540_v19 = vadd.f32 %v11425_v57, %v11420_v10 }
 0xff2   : > { %v7373_v20 = vadd.f32 %v8605_v43, %v7308_v0  ;;  %v8568_v50 = vadd.f32 %v8567_v62, %v8566_v36  ;;  %v7408_v32 = vsel %vm607_vm2, %v11453_v56, 0.0  ;;  %v8608_v54 = vadd.f32 %v8607_v58, %v8606_v51 }
 0xff3   : > { %v8569_v24 = vpop.f32.mrf.mxu0  ;;  %7409 = vadd.xlane.f32.xlu1 %v7408_v32  ;;  %v8609_v5 = vpop.f32.mrf.mxu1  ;;  %v7069_v31 = vadd.f32 %v8420_v15, %v11692_v30  ;;  %v7256_v35 = vadd.f32 %v8534_v52, %v7191_v12  ;;  %v11705_v15 = vld [vmem:[#allocation18_spill] sm:$0xff]  ;;  %v8543_v10 = vadd.f32 %v11436_v39, %v11708_v46 }
 0xff4   : > { %v7313_v25 = vadd.f32 %v8568_v50, %v7248_v34  ;;  %v11467_v11 = vadd.f32 %v7373_v20, %v10784_v14  ;;  %v11693_v14 = vld [vmem:[#allocation17_spill] sm:$0xff]  ;;  %v11702_v34 = vld [vmem:[#allocation26_spill] sm:$0xff] }
 0xff5   : > { %v8570_v1 = vpop.f32.mrf.mxu0  ;;  %v8610_v60 = vpop.f32.mrf.mxu1  ;;  %v8423_v18 = vadd.f32 %v11694_v27, %v11693_v14  ;;  %v7134_v51 = vadd.f32 %v8460_v3, %v7069_v31  ;;  %v8537_v61 = vadd.f32 %v11702_v34, %v11701_v40 }
 0xff6   : > { %v7378_v49 = vadd.f32 %v8608_v54, %v7313_v25  ;;  %v8571_v42 = vadd.f32 %v8570_v1, %v8569_v24  ;;  %v7411_v59 = vsel %vm607_vm2, %v11467_v11, 0.0  ;;  %v8611_v26 = vadd.f32 %v8610_v60, %v8609_v5 }
 0xff7   : > { %v8572_v44 = vpop.f32.mrf.mxu0  ;;  %7412 = vadd.xlane.f32.xlu0 %v7411_v59  ;;  %v8612_v41 = vpop.f32.mrf.mxu1  ;;  %v7072_v20 = vadd.f32 %v8423_v18, %v11703_v6  ;;  %v8463_v24 = vadd.f32 %v11706_v22, %v11705_v15  ;;  %v7259_v7 = vadd.f32 %v8537_v61, %v7194_v8  ;;  %v7199_v25 = vadd.f32 %v8500_v38, %v7134_v51  ;;  %v11707_v59 = vld [vmem:[#allocation6_spill] sm:$0xff] }
 0xff8   : > { %v7316_v17 = vadd.f32 %v8571_v42, %v7251_v2  ;;  %v11481_v45 = vadd.f32 %v7378_v49, %v11697_v13  ;;  %v8503_v5 = vadd.f32 %v11432_v4, %v11427_v29 }
 0xff9   : > { %v8573_v16 = vpop.f32.mrf.mxu0  ;;  %v8613_v0 = vpop.f32.mrf.mxu1  ;;  %v7137_v12 = vadd.f32 %v8463_v24, %v7072_v20  ;;  %v7264_v30 = vadd.f32 %v8540_v19, %v7199_v25 }
 0xffa   : > { %v7381_v36 = vadd.f32 %v8611_v26, %v7316_v17  ;;  %v8574_v23 = vadd.f32 %v8573_v16, %v8572_v44  ;;  %v7414_v43 = vsel %vm607_vm2, %v11481_v45, 0.0  ;;  %v8614_v58 = vadd.f32 %v8613_v0, %v8612_v41  ;;  %v11709_v17 = vld [vmem:[#allocation7_spill] sm:$0xff]  ;;  %v11710_v16 = vld [vmem:[#allocation9_spill] sm:$0xff] }
 0xffb   : > { %v8575_v62 = vpop.f32.mrf.mxu0  ;;  %7415 = vadd.xlane.f32.xlu1 %v7414_v43  ;;  %v8615_v32 = vpop.f32.mrf.mxu1  ;;  %v7202_v4 = vadd.f32 %v8503_v5, %v7137_v12 }
 0xffc   : > { %v7321_v50 = vadd.f32 %v8574_v23, %v7256_v35  ;;  %v11493_v33 = vadd.f32 %v7381_v36, %v11704_v28  ;;  %v11711_v23 = vld [vmem:[#allocation8_spill] sm:$0xff] }
 0xffd   : > { %v8576_v54 = vpop.f32.mrf.mxu0  ;;  %v8616_v53 = vpop.f32.mrf.mxu1  ;;  %v7267_v13 = vadd.f32 %v8543_v10, %v7202_v4 }
 0xffe   : > { %v7386_v9 = vadd.f32 %v8614_v58, %v7321_v50  ;;  %v8577_v2 = vadd.f32 %v8576_v54, %v8575_v62  ;;  %v7417_v63 = vsel %vm607_vm2, %v11493_v33, 0.0  ;;  %v8617_v42 = vadd.f32 %v8616_v53, %v8615_v32 }
 0xfff   : > { %v8578_v1 = vpop.f32.mrf.mxu0  ;;  %7418 = vadd.xlane.f32.xlu0 %v7417_v63  ;;  %v8618_v60 = vpop.f32.mrf.mxu1 }
0x1000   : > { %v7324_v49 = vadd.f32 %v8577_v2, %v7259_v7  ;;  %v7404_v21 = vadd.f32 %v7386_v9, %v11707_v59 }
0x1001   : > { %v8579_v31 = vpop.f32.mrf.mxu0  ;;  %v8619_v27 = vpop.f32.mrf.mxu1 }
0x1002   : > { %v7389_v29 = vadd.f32 %v8617_v42, %v7324_v49  ;;  %v8580_v14 = vadd.f32 %v8579_v31, %v8578_v1  ;;  %v7420_v18 = vsel %vm607_vm2, %v7404_v21, 0.0  ;;  %v8620_v48 = vadd.f32 %v8619_v27, %v8618_v60 }
0x1003   : > { %v8581_v44 = vpop.f32.mrf.mxu0  ;;  %7421 = vadd.xlane.f32.xlu1 %v7420_v18  ;;  %v8621_v52 = vpop.f32.mrf.mxu1 }
0x1004   : > { %v7329_v57 = vadd.f32 %v8580_v14, %v7264_v30  ;;  %v7405_v26 = vadd.f32 %v7389_v29, %v11709_v17 }
0x1005   : > { %v8582_v41 = vpop.f32.mrf.mxu0  ;;  %v8622_v3 = vpop.f32.mrf.mxu1 }
0x1006   : > { %v7394_v55 = vadd.f32 %v8620_v48, %v7329_v57  ;;  %v8583_v37 = vadd.f32 %v8582_v41, %v8581_v44  ;;  %v7423_v8 = vsel %vm607_vm2, %v7405_v26, 0.0  ;;  %v8623_v38 = vadd.f32 %v8622_v3, %v8621_v52  ;;  %v11712_v3 = vld [vmem:[#allocation11_spill] sm:$0xff] }
0x1007   : > { %7424 = vadd.xlane.f32.xlu0 %v7423_v8  ;;  %v11713_v8 = vld [vmem:[#allocation12_spill] sm:$0xff] }
0x1008   : > { %v7332_v47 = vadd.f32 %v8583_v37, %v7267_v13  ;;  %v7406_v35 = vadd.f32 %v7394_v55, %v11710_v16 }
0x100a   : > { %v7397_v36 = vadd.f32 %v8623_v38, %v7332_v47  ;;  %v7426_v39 = vsel %vm607_vm2, %v7406_v35, 0.0  ;;  %v7515_v47 = vrot.slane %v11713_v8, %v11712_v3 }
0x100b   : > { %7427 = vadd.xlane.f32.xlu1 %v7426_v39 }
0x100c   : > { %v7407_v0 = vadd.f32 %v7397_v36, %v11711_v23 }
0x100e   : > { %v7429_v43 = vsel %vm607_vm2, %v7407_v0, 0.0 }
0x100f   : > { %7430 = vadd.xlane.f32.xlu0 %v7429_v43 }
0x107c   : > { %v7410_v51 = vpop.xlane.xlu1 %7409 }
0x107d   : > { %v7432_v40 = vmul.f32 0.015625, %v7410_v51 }
0x107f   : > { %v11514_v34 = vsub.f32 %v11453_v56, %v7432_v40 }
0x1080   : > { %v7413_v61 = vpop.xlane.xlu0 %7412 }
0x1081   : > { %v7433_v62 = vmul.f32 0.015625, %v7413_v61  ;;  %v7448_v6 = vmul.f32 %v11514_v34, %v11514_v34 }
0x1083   : > { %v11519_v20 = vsub.f32 %v11467_v11, %v7433_v62  ;;  %v7456_v50 = vsel %vm607_vm2, %v7448_v6, 0.0 }
0x1084   : > { %v7416_v58 = vpop.xlane.xlu1 %7415  ;;  %7457 = vadd.xlane.f32.xlu1 %v7456_v50 }
0x1085   : > { %v7434_v32 = vmul.f32 0.015625, %v7416_v58  ;;  %v7449_v28 = vmul.f32 %v11519_v20, %v11519_v20 }
0x1087   : > { %v11525_v15 = vsub.f32 %v11481_v45, %v7434_v32  ;;  %v7459_v56 = vsel %vm607_vm2, %v7449_v28, 0.0 }
0x1088   : > { %v7419_v22 = vpop.xlane.xlu0 %7418  ;;  %7460 = vadd.xlane.f32.xlu0 %v7459_v56 }
0x1089   : > { %v7435_v24 = vmul.f32 0.015625, %v7419_v22  ;;  %v7450_v11 = vmul.f32 %v11525_v15, %v11525_v15 }
0x108b   : > { %v11531_v7 = vsub.f32 %v11493_v33, %v7435_v24  ;;  %v7462_v25 = vsel %vm607_vm2, %v7450_v11, 0.0 }
0x108c   : > { %v7422_v54 = vpop.xlane.xlu1 %7421  ;;  %7463 = vadd.xlane.f32.xlu1 %v7462_v25 }
0x108d   : > { %v7436_v5 = vmul.f32 0.015625, %v7422_v54  ;;  %v7451_v45 = vmul.f32 %v11531_v7, %v11531_v7 }
0x108f   : > { %v11536_v9 = vsub.f32 %v7404_v21, %v7436_v5  ;;  %v7465_v2 = vsel %vm607_vm2, %v7451_v45, 0.0 }
0x1090   : > { %v7425_v53 = vpop.xlane.xlu0 %7424  ;;  %7466 = vadd.xlane.f32.xlu0 %v7465_v2 }
0x1091   : > { %v7437_v63 = vmul.f32 0.015625, %v7425_v53  ;;  %v7452_v19 = vmul.f32 %v11536_v9, %v11536_v9 }
0x1093   : > { %v11541_v33 = vsub.f32 %v7405_v26, %v7437_v63  ;;  %v7468_v1 = vsel %vm607_vm2, %v7452_v19, 0.0 }
0x1094   : > { %7469 = vadd.xlane.f32.xlu1 %v7468_v1  ;;  %v7428_v12 = vpop.xlane.xlu1 %7427 }
0x1095   : > { %v7438_v49 = vmul.f32 0.015625, %v7428_v12  ;;  %v7453_v42 = vmul.f32 %v11541_v33, %v11541_v33 }
0x1097   : > { %v11546_v60 = vsub.f32 %v7406_v35, %v7438_v49  ;;  %v7471_v59 = vsel %vm607_vm2, %v7453_v42, 0.0  ;;  %v11714_v35 = vld [vmem:[#allocation10_spill] sm:$0xff] }
0x1098   : > { %7472 = vadd.xlane.f32.xlu0 %v7471_v59  ;;  %v7431_v21 = vpop.xlane.xlu0 %7430  ;;  %v7527_v36 = vrot.slane %v11713_v8, %v11714_v35 }
0x1099   : > { %v7439_v30 = vmul.f32 0.015625, %v7431_v21  ;;  %v7454_v31 = vmul.f32 %v11546_v60, %v11546_v60 }
0x109b   : > { %v11551_v4 = vsub.f32 %v7407_v0, %v7439_v30  ;;  %v7474_v29 = vsel %vm607_vm2, %v7454_v31, 0.0 }
0x109c   : > { %7475 = vadd.xlane.f32.xlu1 %v7474_v29 }
0x109d   : > { %v7455_v14 = vmul.f32 %v11551_v4, %v11551_v4 }
0x109f   : > { %v7477_v27 = vsel %vm607_vm2, %v7455_v14, 0.0 }
0x10a0   : > { %7478 = vadd.xlane.f32.xlu0 %v7477_v27 }
0x110d   : > { %v7458_v18 = vpop.xlane.xlu1 %7457 }
0x110e   : > { %v7480_v44 = vmul.f32 0.015625, %v7458_v18 }
0x1110   : > { %v7488_v46 = vadd.f32 1e-05, %v7480_v44 }
0x1111   : > { %v7461_v10 = vpop.xlane.xlu0 %7460 }
0x1112   : > { %9439 = vrsqrt.f32 %v7488_v46  ;;  %v7481_v57 = vmul.f32 0.015625, %v7461_v10 }
0x1114   : > { %v7489_v48 = vadd.f32 1e-05, %v7481_v57 }
0x1115   : > { %v7464_v52 = vpop.xlane.xlu1 %7463 }
0x1116   : > { %9441 = vrsqrt.f32 %v7489_v48  ;;  %v7482_v17 = vmul.f32 0.015625, %v7464_v52 }
0x1118   : > { %v7490_v26 = vadd.f32 1e-05, %v7482_v17 }
0x1119   : > { %v7467_v41 = vpop.xlane.xlu0 %7466 }
0x111a   : > { %9443 = vrsqrt.f32 %v7490_v26  ;;  %v7483_v13 = vmul.f32 0.015625, %v7467_v41 }
0x111c   : > { %v7491_v55 = vadd.f32 1e-05, %v7483_v13 }
0x111d   : > { %v7470_v37 = vpop.xlane.xlu1 %7469 }
0x111e   : > { %9445 = vrsqrt.f32 %v7491_v55  ;;  %v7484_v38 = vmul.f32 0.015625, %v7470_v37 }
0x111f   : > { %v9440_v16 = vpop.eup %9439 }
0x1120   : > { %v7504_v39 = vmul.f32 %v9440_v16, %v11514_v34  ;;  %v7492_v23 = vadd.f32 1e-05, %v7484_v38 }
0x1121   : > { %v7473_v0 = vpop.xlane.xlu0 %7472 }
0x1122   : > { %v7516_v43 = vmul.f32 %v7515_v47, %v7504_v39  ;;  %9447 = vrsqrt.f32 %v7492_v23  ;;  %v7485_v51 = vmul.f32 0.015625, %v7473_v0 }
0x1123   : > { %v9442_v40 = vpop.eup %9441 }
0x1124   : > { %v7528_v61 = vadd.f32 %v7527_v36, %v7516_v43  ;;  %v7505_v62 = vmul.f32 %v9442_v40, %v11519_v20  ;;  %v7493_v6 = vadd.f32 1e-05, %v7485_v51 }
0x1125   : > { %v7476_v50 = vpop.xlane.xlu1 %7475 }
0x1126   : > { %7536 = vst.msk [vmem:[#allocation2] sm:$0xff] %vm607_vm2, %v7528_v61  ;;  %v7517_v58 = vmul.f32 %v7515_v47, %v7505_v62  ;;  %9449 = vrsqrt.f32 %v7493_v6  ;;  %v7486_v32 = vmul.f32 0.015625, %v7476_v50 }
0x1127   : > { %v9444_v28 = vpop.eup %9443 }
0x1128   : > { %v7529_v56 = vadd.f32 %v7527_v36, %v7517_v58  ;;  %v7506_v34 = vmul.f32 %v9444_v28, %v11525_v15  ;;  %v7494_v22 = vadd.f32 1e-05, %v7486_v32 }
0x1129   : > { %v7479_v24 = vpop.xlane.xlu0 %7478 }
0x112a   : > { %7537 = vst.msk [vmem:[#allocation2 + $0x8] sm:$0xff] %vm607_vm2, %v7529_v56  ;;  %v7518_v11 = vmul.f32 %v7515_v47, %v7506_v34  ;;  %9451 = vrsqrt.f32 %v7494_v22  ;;  %v7487_v25 = vmul.f32 0.015625, %v7479_v24 }
0x112b   : > { %v9446_v54 = vpop.eup %9445 }
0x112c   : > { %v7530_v20 = vadd.f32 %v7527_v36, %v7518_v11  ;;  %v7507_v5 = vmul.f32 %v9446_v54, %v11531_v7  ;;  %v7495_v45 = vadd.f32 1e-05, %v7487_v25 }
0x112e   : > { %7538 = vst.msk [vmem:[#allocation2 + $0x10] sm:$0xff] %vm607_vm2, %v7530_v20  ;;  %v7519_v2 = vmul.f32 %v7515_v47, %v7507_v5  ;;  %9453 = vrsqrt.f32 %v7495_v45 }
0x112f   : > { %v9448_v53 = vpop.eup %9447 }
0x1130   : > { %v7531_v63 = vadd.f32 %v7527_v36, %v7519_v2  ;;  %v7508_v15 = vmul.f32 %v9448_v53, %v11536_v9 }
0x1132   : > { %7539 = vst.msk [vmem:[#allocation2 + $0x18] sm:$0xff] %vm607_vm2, %v7531_v63  ;;  %v7520_v19 = vmul.f32 %v7515_v47, %v7508_v15 }
0x1133   : > { %v9450_v1 = vpop.eup %9449 }
0x1134   : > { %v7532_v12 = vadd.f32 %v7527_v36, %v7520_v19  ;;  %v7509_v49 = vmul.f32 %v9450_v1, %v11541_v33 }
0x1136   : > { %7540 = vst.msk [vmem:[#allocation2 + $0x20] sm:$0xff] %vm607_vm2, %v7532_v12  ;;  %v7521_v42 = vmul.f32 %v7515_v47, %v7509_v49 }
0x1137   : > { %v9452_v7 = vpop.eup %9451 }
0x1138   : > { %v7533_v59 = vadd.f32 %v7527_v36, %v7521_v42  ;;  %v7510_v21 = vmul.f32 %v9452_v7, %v11546_v60 }
0x113a   : > { %7541 = vst.msk [vmem:[#allocation2 + $0x28] sm:$0xff] %vm607_vm2, %v7533_v59  ;;  %v7522_v30 = vmul.f32 %v7515_v47, %v7510_v21 }
0x113b   : > { %v9454_v31 = vpop.eup %9453 }
0x113c   : > { %v7534_v29 = vadd.f32 %v7527_v36, %v7522_v30  ;;  %v7511_v9 = vmul.f32 %v9454_v31, %v11551_v4 }
0x113e   : > { %7542 = vst.msk [vmem:[#allocation2 + $0x30] sm:$0xff] %vm607_vm2, %v7534_v29  ;;  %v7523_v14 = vmul.f32 %v7515_v47, %v7511_v9  ;;  %7547 = sbr.rel (%p8150_p6) target bundleno = 4638 (0x121e), region = 68 }
0x1140   : > { %v7535_v27 = vadd.f32 %v7527_v36, %v7523_v14 }
0x1142   : > { %7543 = vst.msk [vmem:[#allocation2 + $0x38] sm:$0xff] %vm607_vm2, %v7535_v27 }
0x1143   : > { %v9464_v33 = vld [vmem:[%s11638_s8 + $0x18] sm:$0xff]   ;;  %v9465_v60 = vld [vmem:[%s11638_s8 + $0x10] sm:$0xff]   ;;  %v7548_v18 = vpack.c.bf16 %v7529_v56, %v7528_v61  ;;  %v7550_v44 = vpack.c.bf16 %v7533_v59, %v7532_v12  ;;  %v9466_v4 = vld [vmem:[%s11638_s8 + $0x8] sm:$0xff]   ;;  %v7549_v10 = vpack.c.bf16 %v7531_v63, %v7530_v20  ;;  %v7551_v57 = vpack.c.bf16 %v7535_v27, %v7534_v29 }
0x1144   : > { %9032 = vmatprep.subr.bf16.mxu0 %v9464_v33  ;;  %9048 = vmatprep.subr.bf16.mxu1 %v9464_v33  ;;  %v9467_v46 = vld [vmem:[%s11638_s8] sm:$0xff]  }
0x1145   : > { %9033 = vmatpush3.bf16.msra.mxu0 %v9464_v33  ;;  %9052 = vmatpush3.bf16.msra.mxu1 %v9464_v33  ;;  %v8151_v48 = vld [vmem:[%s11639_s9] ss:$0 sm:$0xff] }
0x1146   : > { %9034 = vmatprep.subr.bf16.mxu0 %v9465_v60  ;;  %9049 = vmatprep.subr.bf16.mxu1 %v9465_v60 }
0x1147   : > { %9040 = vmatprep.mubr.msk.bf16.mxu0 %vm607_vm2, %v7548_v18  ;;  %9044 = vmatprep.mubr.msk.bf16.mxu1 %vm607_vm2, %v7550_v44 }
0x1149   : > { %9035 = vmatpush3.bf16.msra.mxu0 %v9465_v60  ;;  %9053 = vmatpush3.bf16.msra.mxu1 %v9465_v60 }
0x114a   : > { %9036 = vmatprep.subr.bf16.mxu0 %v9466_v4  ;;  %9050 = vmatprep.subr.bf16.mxu1 %v9466_v4 }
0x114d   : > { %9037 = vmatpush3.bf16.msra.mxu0 %v9466_v4  ;;  %9054 = vmatpush3.bf16.msra.mxu1 %v9466_v4 }
0x114e   : > { %9038 = vmatprep.subr.bf16.mxu0 %v9467_v46  ;;  %9051 = vmatprep.subr.bf16.mxu1 %v9467_v46 }
0x1151   : > { %9039 = vmatpush3.bf16.msra.mxu0 %v9467_v46  ;;  %9055 = vmatpush3.bf16.msra.mxu1 %v9467_v46 }
0x1154   : > { %9041 = vmatmul.mubr.msk.bf16.vlgmr.msra.gmra.mxu0 %vm607_vm2, %v7549_v10  ;;  %9045 = vmatmul.mubr.msk.bf16.vlgmr.msra.gmra.mxu1 %vm607_vm2, %v7551_v57 }
0x1214   : > { %v9042_v52 = vpop.f32.mrf.mxu0  ;;  %v9046_v17 = vpop.f32.mrf.mxu1 }
0x1215   : > { %v7646_v26 = vadd.f32 %v9042_v52, %v8151_v48  ;;  %v7662_v41 = vadd.f32 %v9046_v17, %v8151_v48 }
0x1216   : > { %v7637_v13 = vpop.f32.mrf.mxu0  ;;  %v7653_v55 = vpop.f32.mrf.mxu1 }
0x1217   : > { %7670 = vst [vmem:[%s11640_s10 + $0x10] sm:$0xff] %v7646_v26  ;;  %7674 = vst [vmem:[%s11640_s10 + $0x30] sm:$0xff] %v7662_v41  ;;  %v7638_v37 = vadd.f32 %v8151_v48, %v7637_v13  ;;  %v7654_v3 = vadd.f32 %v8151_v48, %v7653_v55 }
0x1218   : > { %v9043_v8 = vpop.f32.mrf.mxu0  ;;  %v9047_v47 = vpop.f32.mrf.mxu1 }
0x1219   : > { %7668 = vst [vmem:[%s11640_s10] sm:$0xff] %v7638_v37  ;;  %7672 = vst [vmem:[%s11640_s10 + $0x20] sm:$0xff] %v7654_v3  ;;  %v7649_v38 = vadd.f32 %v9043_v8, %v8151_v48  ;;  %v7665_v16 = vadd.f32 %v9047_v47, %v8151_v48 }
0x121a   : > { %v7640_v35 = vpop.f32.mrf.mxu0  ;;  %v7656_v36 = vpop.f32.mrf.mxu1 }
0x121b   : > { %7671 = vst [vmem:[%s11640_s10 + $0x18] sm:$0xff] %v7649_v38  ;;  %7675 = vst [vmem:[%s11640_s10 + $0x38] sm:$0xff] %v7665_v16  ;;  %v7641_v39 = vadd.f32 %v8151_v48, %v7640_v35  ;;  %v7657_v23 = vadd.f32 %v8151_v48, %v7656_v36 }
0x121d   : > { %7669 = vst [vmem:[%s11640_s10 + $0x8] sm:$0xff] %v7641_v39  ;;  %7673 = vst [vmem:[%s11640_s10 + $0x28] sm:$0xff] %v7657_v23 }
0x121e PF: > { %s20_s15 = sadd.s32 1, %s9490_s15   ;;  %s11715_s23 = sld [smem:[#allocation3_spill]] }
0x121f   : > { %p17_p7 = scmp.ge.s32.totalorder %s20_s15, 4   ;;  %s11716_s13 = smov %s9486_s14 }
0x1221   :  { %19 = sbr.rel (!%p17_p7) target bundleno = 4 (0x4), region = 119 }
0x1224   : > { %s11717_s14 = smov %s11715_s23 }

</bundles_post_ra>
